<compile_context>
chip_gen: v5e
topology: v5e:2x2
jax: 0.10.0
libtpu: 0.0.40
codegen_flags: <defaults>
</compile_context>

<pallas_src>
import functools

import jax
import jax.numpy as jnp
from jax import lax
from jax.experimental import pallas as pl
from jax.experimental.pallas import tpu as pltpu

EPS = 1e-3  # matches nn.BatchNorm2d(chann, eps=0.001)


# ---------------------------------------------------------------------------
# Fused Pallas kernel: whole non_bottleneck_1d block for one batch element.
#   x_ref : (1, M, C)    activation tile, M = H*W (row-major NHWC flatten)
#   w_ref : (4, 3, C, C) per-stage 3-tap channel-mixing weights (BN pre-folded)
#   b_ref : (4, 1, C)    per-stage biases (BN pre-folded), f32
#   o_ref : (1, M, C)    output tile, f32
# ---------------------------------------------------------------------------
def _non_bottleneck_1d_kernel(x_ref, w_ref, b_ref, o_ref, *, W, d):
    M, C = x_ref.shape[1], x_ref.shape[2]
    cdt = x_ref.dtype                       # MXU input dtype (f32 or bf16)
    x_in = x_ref[0]                         # (M, C), stays in VMEM/vregs

    # Width position of each flattened row; used to zero taps that would wrap
    # across image-row boundaries for the 1x3 (W-direction) convs.
    col = lax.broadcasted_iota(jnp.int32, (M, 1), 0) % W

    def shift_rows(v, s):
        """result[i] = v[i - s], zero filled (s is a static Python int)."""
        if s == 0:
            return v
        z = jnp.zeros((abs(s), C), v.dtype)
        if s > 0:
            return jnp.concatenate([z, v[:M - s]], axis=0)
        return jnp.concatenate([v[-s:], z], axis=0)

    def conv3(vm, v0, vp, stage):
        """3-tap channel-mixing conv (three K=C MXU matmuls) + bias, f32 acc."""
        w = w_ref[stage]                    # (3, C, C)
        acc = jnp.dot(vm, w[0], preferred_element_type=jnp.float32)
        acc = acc + jnp.dot(v0, w[1], preferred_element_type=jnp.float32)
        acc = acc + jnp.dot(vp, w[2], preferred_element_type=jnp.float32)
        return acc + b_ref[stage]           # (M, C) + (1, C)

    def conv_h(v, dil, stage):              # 3x1 conv: taps at +-dil image rows
        return conv3(shift_rows(v, dil * W), v, shift_rows(v, -dil * W), stage)

    def conv_w(v, dil, stage):              # 1x3 conv: taps at +-dil columns
        vm = jnp.where(col >= dil, shift_rows(v, dil), 0.0)
        vp = jnp.where(col < W - dil, shift_rows(v, -dil), 0.0)
        return conv3(vm, v, vp, stage)

    a = jnp.maximum(conv_h(x_in, 1, 0), 0.0).astype(cdt)   # conv3x1_1 + relu
    a = jnp.maximum(conv_w(a, 1, 1), 0.0).astype(cdt)      # conv1x3_1 +bn1 +relu
    a = jnp.maximum(conv_h(a, d, 2), 0.0).astype(cdt)      # conv3x1_2 + relu
    a = conv_w(a, d, 3) + x_in.astype(jnp.float32)         # conv1x3_2 +bn2 +res
    # dropout: p == 0 -> skipped (matches `if self.dropout.p != 0`)
    o_ref[0] = jnp.maximum(a, 0.0).astype(o_ref.dtype)     # final relu


# ---------------------------------------------------------------------------
# Wrapper: layout plumbing, BN folding, single pallas_call over the batch.
# ---------------------------------------------------------------------------
def _bn_affine(gamma, beta, mean, var):
    s = gamma * lax.rsqrt(var + EPS)
    return s, beta - mean * s


def non_bottleneck_1d_forward(x_nchw, p, dilated, compute_dtype=jnp.float32):
    N, C, H, W = x_nchw.shape
    M = H * W
    x = jnp.transpose(x_nchw, (0, 2, 3, 1)).reshape(N, M, C).astype(compute_dtype)

    # PyTorch OIHW -> (tap, C_in, C_out)
    taps_h = lambda w: jnp.transpose(w[:, :, :, 0], (2, 1, 0))   # (C,C,3,1)
    taps_w = lambda w: jnp.transpose(w[:, :, 0, :], (2, 1, 0))   # (C,C,1,3)

    s1, t1 = _bn_affine(p["bn1_gamma"], p["bn1_beta"], p["bn1_mean"], p["bn1_var"])
    s2, t2 = _bn_affine(p["bn2_gamma"], p["bn2_beta"], p["bn2_mean"], p["bn2_var"])

    # Fold the BN affine into the stage-2 / stage-4 weights and biases.
    w_stack = jnp.stack([
        taps_h(p["w3x1_1"]),
        taps_w(p["w1x3_1"]) * s1[None, None, :],
        taps_h(p["w3x1_2"]),
        taps_w(p["w1x3_2"]) * s2[None, None, :],
    ]).astype(compute_dtype)                                     # (4, 3, C, C)
    b_stack = jnp.stack([
        p["b3x1_1"],
        p["b1x3_1"] * s1 + t1,
        p["b3x1_2"],
        p["b1x3_2"] * s2 + t2,
    ]).astype(jnp.float32).reshape(4, 1, C)                      # (4, 1, C)

    itemsize = jnp.dtype(compute_dtype).itemsize
    cost = pl.CostEstimate(
        flops=2 * N * M * C * C * 3 * 4,
        transcendentals=0,
        bytes_accessed=N * M * C * (itemsize + 4)
        + w_stack.size * itemsize + b_stack.size * 4,
    )

    kernel = functools.partial(_non_bottleneck_1d_kernel, W=W, d=dilated)
    out = pl.pallas_call(
        kernel,
        out_shape=jax.ShapeDtypeStruct((N, M, C), jnp.float32),
        grid=(N,),
        in_specs=[
            pl.BlockSpec((1, M, C), lambda n: (n, 0, 0)),        # activations
            pl.BlockSpec((4, 3, C, C), lambda n: (0, 0, 0, 0)),  # weights (resident)
            pl.BlockSpec((4, 1, C), lambda n: (0, 0, 0)),        # biases (resident)
        ],
        out_specs=pl.BlockSpec((1, M, C), lambda n: (n, 0, 0)),
        compiler_params=pltpu.CompilerParams(
            dimension_semantics=("parallel",),
            vmem_limit_bytes=32 * 1024 * 1024,
        ),
        cost_estimate=cost,
    )(x, w_stack, b_stack)

    return jnp.transpose(out.reshape(N, H, W, C), (0, 3, 1, 2))  # NHWC -> NCHW


# ---------------------------------------------------------------------------
# Parameter init (deterministic, PyTorch tensor conventions / shapes)
# ---------------------------------------------------------------------------
def init_params(key, C):
    ks = jax.random.split(key, 16)
    normal = lambda k, shp, s=0.2: s * jax.random.normal(k, shp, jnp.float32)
    return {
        "w3x1_1": normal(ks[0], (C, C, 3, 1)), "b3x1_1": normal(ks[1], (C,), 0.1),
        "w1x3_1": normal(ks[2], (C, C, 1, 3)), "b1x3_1": normal(ks[3], (C,), 0.1),
        "bn1_gamma": 1.0 + normal(ks[4], (C,), 0.1),
        "bn1_beta": normal(ks[5], (C,), 0.1),
        "bn1_mean": normal(ks[6], (C,), 0.1),
        "bn1_var": jax.random.uniform(ks[7], (C,), jnp.float32, 0.5, 1.5),
        "w3x1_2": normal(ks[8], (C, C, 3, 1)), "b3x1_2": normal(ks[9], (C,), 0.1),
        "w1x3_2": normal(ks[10], (C, C, 1, 3)), "b1x3_2": normal(ks[11], (C,), 0.1),
        "bn2_gamma": 1.0 + normal(ks[12], (C,), 0.1),
        "bn2_beta": normal(ks[13], (C,), 0.1),
        "bn2_mean": normal(ks[14], (C,), 0.1),
        "bn2_var": jax.random.uniform(ks[15], (C,), jnp.float32, 0.5, 1.5),
    }


# ---------------------------------------------------------------------------
# Pure-JAX reference (mirrors the PyTorch forward, eval-mode BN, p=0 dropout)
# ---------------------------------------------------------------------------
def _conv2d_ref(x, w, b, pad_hw, dil_hw):
    out = lax.conv_general_dilated(
        x, w, window_strides=(1, 1),
        padding=((pad_hw[0], pad_hw[0]), (pad_hw[1], pad_hw[1])),
        rhs_dilation=dil_hw,
        dimension_numbers=("NCHW", "OIHW", "NCHW"),
        precision=lax.Precision.HIGHEST)
    return out + b.reshape(1, -1, 1, 1)


def _bn_ref(x, gamma, beta, mean, var):
    inv = gamma / jnp.sqrt(var + EPS)
    return x * inv.reshape(1, -1, 1, 1) + (beta - mean * inv).reshape(1, -1, 1, 1)


def non_bottleneck_1d_reference(x, p, d):
    o = jax.nn.relu(_conv2d_ref(x, p["w3x1_1"], p["b3x1_1"], (1, 0), (1, 1)))
    o = _conv2d_ref(o, p["w1x3_1"], p["b1x3_1"], (0, 1), (1, 1))
    o = jax.nn.relu(_bn_ref(o, p["bn1_gamma"], p["bn1_beta"], p["bn1_mean"], p["bn1_var"]))
    o = jax.nn.relu(_conv2d_ref(o, p["w3x1_2"], p["b3x1_2"], (d, 0), (d, 1)))
    o = _conv2d_ref(o, p["w1x3_2"], p["b1x3_2"], (0, d), (1, d))
    o = _bn_ref(o, p["bn2_gamma"], p["bn2_beta"], p["bn2_mean"], p["bn2_var"])
    return jax.nn.relu(o + x)


if __name__ == "__main__":
    key = jax.random.PRNGKey(0)
    kx, kp = jax.random.split(key)

    N, C, H, W = 2, 8, 16, 16      # small NCHW input consistent with nn.Conv2d
    dilated = 2                    # dilation of the second conv pair
    x = jax.random.normal(kx, (N, C, H, W), jnp.float32)
    params = init_params(kp, C)

    fwd = jax.jit(functools.partial(non_bottleneck_1d_forward, dilated=dilated))
    out = jax.block_until_ready(fwd(x, params))

    ref = non_bottleneck_1d_reference(x, params, dilated)
    err = float(jnp.max(jnp.abs(out - ref)))
    if out.shape != x.shape or not (err < 3e-2):
        raise AssertionError(f"Pallas output mismatch: max|diff| = {err}")
    print("KERNEL_OK")
</pallas_src>

<mosaic_0001>
module attributes {stable_mosaic.version = 11 : i64} {
  func.func @_non_bottleneck_1d_kernel(%arg0: i32, %arg1: memref<1x256x8xf32, #tpu.memory_space<vmem>>, %arg2: memref<4x3x8x8xf32, #tpu.memory_space<vmem>>, %arg3: memref<4x1x8xf32, #tpu.memory_space<vmem>>, %arg4: memref<1x256x8xf32, #tpu.memory_space<vmem>>) attributes {dimension_semantics = [#tpu.dimension_semantics<parallel>], iteration_bounds = array<i64: 2>, scalar_prefetch = 0 : i64, scratch_operands = 0 : i64, tpu.core_type = #tpu.core_type<tc>, window_params = [{transform_indices = @transform_0, window_bounds = array<i64: 1, 256, 8>}, {pipeline_mode = #tpu.pipeline_mode<synchronous>, transform_indices = @transform_1, window_bounds = array<i64: 4, 3, 8, 8>}, {pipeline_mode = #tpu.pipeline_mode<synchronous>, transform_indices = @transform_2, window_bounds = array<i64: 4, 1, 8>}, {transform_indices = @transform_3, window_bounds = array<i64: 1, 256, 8>}]} {
    %c0 = arith.constant 0 : index
    %c0_0 = arith.constant 0 : index
    %c0_1 = arith.constant 0 : index
    %0 = vector.load %arg1[%c0, %c0_0, %c0_1] : memref<1x256x8xf32, #tpu.memory_space<vmem>>, vector<1x256x8xf32>
    %1 = vector.shape_cast %0 : vector<1x256x8xf32> to vector<256x8xf32>
    %2 = tpu.iota {dimensions = array<i32: 0>} : vector<256x1xi32>
    %c16_i32 = arith.constant 16 : i32
    %c0_i32 = arith.constant 0 : i32
    %3 = arith.cmpi eq, %c16_i32, %c0_i32 : i32
    %c1_i32 = arith.constant 1 : i32
    %4 = arith.select %3, %c1_i32, %c16_i32 : i32
    %5 = vector.broadcast %4 : i32 to vector<256x1xi32>
    %6 = arith.remsi %2, %5 : vector<256x1xi32>
    %c0_i32_2 = arith.constant 0 : i32
    %7 = vector.broadcast %c0_i32_2 : i32 to vector<256x1xi32>
    %8 = arith.cmpi ne, %6, %7 : vector<256x1xi32>
    %c0_i32_3 = arith.constant 0 : i32
    %9 = vector.broadcast %c0_i32_3 : i32 to vector<256x1xi32>
    %10 = arith.cmpi slt, %6, %9 : vector<256x1xi32>
    %c0_i32_4 = arith.constant 0 : i32
    %11 = arith.cmpi slt, %4, %c0_i32_4 : i32
    %12 = vector.broadcast %11 : i1 to vector<256x1xi1>
    %13 = vector.broadcast %12 : vector<256x1xi1> to vector<256x1xi1>
    %14 = arith.xori %10, %13 : vector<256x1xi1>
    %15 = arith.andi %14, %8 : vector<256x1xi1>
    %16 = vector.broadcast %4 : i32 to vector<256x1xi32>
    %17 = arith.addi %6, %16 : vector<256x1xi32>
    %18 = arith.select %15, %17, %6 : vector<256x1xi1>, vector<256x1xi32>
    %cst = arith.constant 0.000000e+00 : f32
    %19 = vector.broadcast %cst : f32 to vector<16x8xf32>
    %20 = vector.extract_strided_slice %1 {offsets = [0, 0], sizes = [240, 8], strides = [1, 1]} : vector<256x8xf32> to vector<240x8xf32>
    %21 = tpu.concatenate %19, %20 in 0 : vector<16x8xf32>, vector<240x8xf32> -> vector<256x8xf32>
    %cst_5 = arith.constant 0.000000e+00 : f32
    %22 = vector.broadcast %cst_5 : f32 to vector<16x8xf32>
    %23 = vector.extract_strided_slice %1 {offsets = [16, 0], sizes = [240, 8], strides = [1, 1]} : vector<256x8xf32> to vector<240x8xf32>
    %24 = tpu.concatenate %23, %22 in 0 : vector<240x8xf32>, vector<16x8xf32> -> vector<256x8xf32>
    %c0_6 = arith.constant 0 : index
    %c0_7 = arith.constant 0 : index
    %c0_8 = arith.constant 0 : index
    %c0_9 = arith.constant 0 : index
    %25 = vector.load %arg2[%c0_6, %c0_7, %c0_8, %c0_9] : memref<4x3x8x8xf32, #tpu.memory_space<vmem>>, vector<1x3x8x8xf32>
    %26 = vector.shape_cast %25 : vector<1x3x8x8xf32> to vector<3x8x8xf32>
    %27 = vector.extract_strided_slice %26 {offsets = [0, 0, 0], sizes = [1, 8, 8], strides = [1, 1, 1]} : vector<3x8x8xf32> to vector<1x8x8xf32>
    %28 = vector.shape_cast %27 : vector<1x8x8xf32> to vector<8x8xf32>
    %cst_10 = arith.constant dense<0.000000e+00> : vector<256x8xf32>
    %29 = tpu.matmul %21, %28, %cst_10 {dimension_numbers = #tpu.dot_dimension_numbers<[1], [0], [0], [1], [0, 0, 1, 1], [], []>} : vector<256x8xf32>, vector<8x8xf32>, vector<256x8xf32> -> vector<256x8xf32>
    %30 = vector.extract_strided_slice %26 {offsets = [1, 0, 0], sizes = [1, 8, 8], strides = [1, 1, 1]} : vector<3x8x8xf32> to vector<1x8x8xf32>
    %31 = vector.shape_cast %30 : vector<1x8x8xf32> to vector<8x8xf32>
    %cst_11 = arith.constant dense<0.000000e+00> : vector<256x8xf32>
    %32 = tpu.matmul %1, %31, %cst_11 {dimension_numbers = #tpu.dot_dimension_numbers<[1], [0], [0], [1], [0, 0, 1, 1], [], []>} : vector<256x8xf32>, vector<8x8xf32>, vector<256x8xf32> -> vector<256x8xf32>
    %33 = arith.addf %29, %32 : vector<256x8xf32>
    %34 = vector.extract_strided_slice %26 {offsets = [2, 0, 0], sizes = [1, 8, 8], strides = [1, 1, 1]} : vector<3x8x8xf32> to vector<1x8x8xf32>
    %35 = vector.shape_cast %34 : vector<1x8x8xf32> to vector<8x8xf32>
    %cst_12 = arith.constant dense<0.000000e+00> : vector<256x8xf32>
    %36 = tpu.matmul %24, %35, %cst_12 {dimension_numbers = #tpu.dot_dimension_numbers<[1], [0], [0], [1], [0, 0, 1, 1], [], []>} : vector<256x8xf32>, vector<8x8xf32>, vector<256x8xf32> -> vector<256x8xf32>
    %37 = arith.addf %33, %36 : vector<256x8xf32>
    %c0_13 = arith.constant 0 : index
    %c0_14 = arith.constant 0 : index
    %c0_15 = arith.constant 0 : index
    %38 = vector.load %arg3[%c0_13, %c0_14, %c0_15] : memref<4x1x8xf32, #tpu.memory_space<vmem>>, vector<1x1x8xf32>
    %39 = vector.shape_cast %38 : vector<1x1x8xf32> to vector<1x8xf32>
    %40 = vector.broadcast %39 : vector<1x8xf32> to vector<256x8xf32>
    %41 = arith.addf %37, %40 : vector<256x8xf32>
    %cst_16 = arith.constant 0.000000e+00 : f32
    %42 = vector.broadcast %cst_16 : f32 to vector<256x8xf32>
    %43 = arith.maximumf %41, %42 : vector<256x8xf32>
    %c1_i32_17 = arith.constant 1 : i32
    %44 = vector.broadcast %c1_i32_17 : i32 to vector<256x1xi32>
    %45 = arith.cmpi sge, %18, %44 : vector<256x1xi32>
    %cst_18 = arith.constant 0.000000e+00 : f32
    %46 = vector.broadcast %cst_18 : f32 to vector<1x8xf32>
    %47 = vector.extract_strided_slice %43 {offsets = [0, 0], sizes = [255, 8], strides = [1, 1]} : vector<256x8xf32> to vector<255x8xf32>
    %48 = tpu.concatenate %46, %47 in 0 : vector<1x8xf32>, vector<255x8xf32> -> vector<256x8xf32>
    %cst_19 = arith.constant 0.000000e+00 : f32
    %49 = vector.shape_cast %45 : vector<256x1xi1> to vector<256x1xi1>
    %50 = vector.broadcast %49 : vector<256x1xi1> to vector<256x8xi1>
    %51 = vector.broadcast %cst_19 : f32 to vector<256x8xf32>
    %52 = arith.select %50, %48, %51 : vector<256x8xi1>, vector<256x8xf32>
    %c15_i32 = arith.constant 15 : i32
    %53 = vector.broadcast %c15_i32 : i32 to vector<256x1xi32>
    %54 = arith.cmpi slt, %18, %53 : vector<256x1xi32>
    %cst_20 = arith.constant 0.000000e+00 : f32
    %55 = vector.broadcast %cst_20 : f32 to vector<1x8xf32>
    %56 = vector.extract_strided_slice %43 {offsets = [1, 0], sizes = [255, 8], strides = [1, 1]} : vector<256x8xf32> to vector<255x8xf32>
    %57 = tpu.concatenate %56, %55 in 0 : vector<255x8xf32>, vector<1x8xf32> -> vector<256x8xf32>
    %cst_21 = arith.constant 0.000000e+00 : f32
    %58 = vector.shape_cast %54 : vector<256x1xi1> to vector<256x1xi1>
    %59 = vector.broadcast %58 : vector<256x1xi1> to vector<256x8xi1>
    %60 = vector.broadcast %cst_21 : f32 to vector<256x8xf32>
    %61 = arith.select %59, %57, %60 : vector<256x8xi1>, vector<256x8xf32>
    %c1 = arith.constant 1 : index
    %c0_22 = arith.constant 0 : index
    %c0_23 = arith.constant 0 : index
    %c0_24 = arith.constant 0 : index
    %62 = vector.load %arg2[%c1, %c0_22, %c0_23, %c0_24] : memref<4x3x8x8xf32, #tpu.memory_space<vmem>>, vector<1x3x8x8xf32>
    %63 = vector.shape_cast %62 : vector<1x3x8x8xf32> to vector<3x8x8xf32>
    %64 = vector.extract_strided_slice %63 {offsets = [0, 0, 0], sizes = [1, 8, 8], strides = [1, 1, 1]} : vector<3x8x8xf32> to vector<1x8x8xf32>
    %65 = vector.shape_cast %64 : vector<1x8x8xf32> to vector<8x8xf32>
    %cst_25 = arith.constant dense<0.000000e+00> : vector<256x8xf32>
    %66 = tpu.matmul %52, %65, %cst_25 {dimension_numbers = #tpu.dot_dimension_numbers<[1], [0], [0], [1], [0, 0, 1, 1], [], []>} : vector<256x8xf32>, vector<8x8xf32>, vector<256x8xf32> -> vector<256x8xf32>
    %67 = vector.extract_strided_slice %63 {offsets = [1, 0, 0], sizes = [1, 8, 8], strides = [1, 1, 1]} : vector<3x8x8xf32> to vector<1x8x8xf32>
    %68 = vector.shape_cast %67 : vector<1x8x8xf32> to vector<8x8xf32>
    %cst_26 = arith.constant dense<0.000000e+00> : vector<256x8xf32>
    %69 = tpu.matmul %43, %68, %cst_26 {dimension_numbers = #tpu.dot_dimension_numbers<[1], [0], [0], [1], [0, 0, 1, 1], [], []>} : vector<256x8xf32>, vector<8x8xf32>, vector<256x8xf32> -> vector<256x8xf32>
    %70 = arith.addf %66, %69 : vector<256x8xf32>
    %71 = vector.extract_strided_slice %63 {offsets = [2, 0, 0], sizes = [1, 8, 8], strides = [1, 1, 1]} : vector<3x8x8xf32> to vector<1x8x8xf32>
    %72 = vector.shape_cast %71 : vector<1x8x8xf32> to vector<8x8xf32>
    %cst_27 = arith.constant dense<0.000000e+00> : vector<256x8xf32>
    %73 = tpu.matmul %61, %72, %cst_27 {dimension_numbers = #tpu.dot_dimension_numbers<[1], [0], [0], [1], [0, 0, 1, 1], [], []>} : vector<256x8xf32>, vector<8x8xf32>, vector<256x8xf32> -> vector<256x8xf32>
    %74 = arith.addf %70, %73 : vector<256x8xf32>
    %c1_28 = arith.constant 1 : index
    %c0_29 = arith.constant 0 : index
    %c0_30 = arith.constant 0 : index
    %75 = vector.load %arg3[%c1_28, %c0_29, %c0_30] : memref<4x1x8xf32, #tpu.memory_space<vmem>>, vector<1x1x8xf32>
    %76 = vector.shape_cast %75 : vector<1x1x8xf32> to vector<1x8xf32>
    %77 = vector.broadcast %76 : vector<1x8xf32> to vector<256x8xf32>
    %78 = arith.addf %74, %77 : vector<256x8xf32>
    %cst_31 = arith.constant 0.000000e+00 : f32
    %79 = vector.broadcast %cst_31 : f32 to vector<256x8xf32>
    %80 = arith.maximumf %78, %79 : vector<256x8xf32>
    %cst_32 = arith.constant 0.000000e+00 : f32
    %81 = vector.broadcast %cst_32 : f32 to vector<32x8xf32>
    %82 = vector.extract_strided_slice %80 {offsets = [0, 0], sizes = [224, 8], strides = [1, 1]} : vector<256x8xf32> to vector<224x8xf32>
    %83 = tpu.concatenate %81, %82 in 0 : vector<32x8xf32>, vector<224x8xf32> -> vector<256x8xf32>
    %cst_33 = arith.constant 0.000000e+00 : f32
    %84 = vector.broadcast %cst_33 : f32 to vector<32x8xf32>
    %85 = vector.extract_strided_slice %80 {offsets = [32, 0], sizes = [224, 8], strides = [1, 1]} : vector<256x8xf32> to vector<224x8xf32>
    %86 = tpu.concatenate %85, %84 in 0 : vector<224x8xf32>, vector<32x8xf32> -> vector<256x8xf32>
    %c2 = arith.constant 2 : index
    %c0_34 = arith.constant 0 : index
    %c0_35 = arith.constant 0 : index
    %c0_36 = arith.constant 0 : index
    %87 = vector.load %arg2[%c2, %c0_34, %c0_35, %c0_36] : memref<4x3x8x8xf32, #tpu.memory_space<vmem>>, vector<1x3x8x8xf32>
    %88 = vector.shape_cast %87 : vector<1x3x8x8xf32> to vector<3x8x8xf32>
    %89 = vector.extract_strided_slice %88 {offsets = [0, 0, 0], sizes = [1, 8, 8], strides = [1, 1, 1]} : vector<3x8x8xf32> to vector<1x8x8xf32>
    %90 = vector.shape_cast %89 : vector<1x8x8xf32> to vector<8x8xf32>
    %cst_37 = arith.constant dense<0.000000e+00> : vector<256x8xf32>
    %91 = tpu.matmul %83, %90, %cst_37 {dimension_numbers = #tpu.dot_dimension_numbers<[1], [0], [0], [1], [0, 0, 1, 1], [], []>} : vector<256x8xf32>, vector<8x8xf32>, vector<256x8xf32> -> vector<256x8xf32>
    %92 = vector.extract_strided_slice %88 {offsets = [1, 0, 0], sizes = [1, 8, 8], strides = [1, 1, 1]} : vector<3x8x8xf32> to vector<1x8x8xf32>
    %93 = vector.shape_cast %92 : vector<1x8x8xf32> to vector<8x8xf32>
    %cst_38 = arith.constant dense<0.000000e+00> : vector<256x8xf32>
    %94 = tpu.matmul %80, %93, %cst_38 {dimension_numbers = #tpu.dot_dimension_numbers<[1], [0], [0], [1], [0, 0, 1, 1], [], []>} : vector<256x8xf32>, vector<8x8xf32>, vector<256x8xf32> -> vector<256x8xf32>
    %95 = arith.addf %91, %94 : vector<256x8xf32>
    %96 = vector.extract_strided_slice %88 {offsets = [2, 0, 0], sizes = [1, 8, 8], strides = [1, 1, 1]} : vector<3x8x8xf32> to vector<1x8x8xf32>
    %97 = vector.shape_cast %96 : vector<1x8x8xf32> to vector<8x8xf32>
    %cst_39 = arith.constant dense<0.000000e+00> : vector<256x8xf32>
    %98 = tpu.matmul %86, %97, %cst_39 {dimension_numbers = #tpu.dot_dimension_numbers<[1], [0], [0], [1], [0, 0, 1, 1], [], []>} : vector<256x8xf32>, vector<8x8xf32>, vector<256x8xf32> -> vector<256x8xf32>
    %99 = arith.addf %95, %98 : vector<256x8xf32>
    %c2_40 = arith.constant 2 : index
    %c0_41 = arith.constant 0 : index
    %c0_42 = arith.constant 0 : index
    %100 = vector.load %arg3[%c2_40, %c0_41, %c0_42] : memref<4x1x8xf32, #tpu.memory_space<vmem>>, vector<1x1x8xf32>
    %101 = vector.shape_cast %100 : vector<1x1x8xf32> to vector<1x8xf32>
    %102 = vector.broadcast %101 : vector<1x8xf32> to vector<256x8xf32>
    %103 = arith.addf %99, %102 : vector<256x8xf32>
    %cst_43 = arith.constant 0.000000e+00 : f32
    %104 = vector.broadcast %cst_43 : f32 to vector<256x8xf32>
    %105 = arith.maximumf %103, %104 : vector<256x8xf32>
    %c2_i32 = arith.constant 2 : i32
    %106 = vector.broadcast %c2_i32 : i32 to vector<256x1xi32>
    %107 = arith.cmpi sge, %18, %106 : vector<256x1xi32>
    %cst_44 = arith.constant 0.000000e+00 : f32
    %108 = vector.broadcast %cst_44 : f32 to vector<2x8xf32>
    %109 = vector.extract_strided_slice %105 {offsets = [0, 0], sizes = [254, 8], strides = [1, 1]} : vector<256x8xf32> to vector<254x8xf32>
    %110 = tpu.concatenate %108, %109 in 0 : vector<2x8xf32>, vector<254x8xf32> -> vector<256x8xf32>
    %cst_45 = arith.constant 0.000000e+00 : f32
    %111 = vector.shape_cast %107 : vector<256x1xi1> to vector<256x1xi1>
    %112 = vector.broadcast %111 : vector<256x1xi1> to vector<256x8xi1>
    %113 = vector.broadcast %cst_45 : f32 to vector<256x8xf32>
    %114 = arith.select %112, %110, %113 : vector<256x8xi1>, vector<256x8xf32>
    %c14_i32 = arith.constant 14 : i32
    %115 = vector.broadcast %c14_i32 : i32 to vector<256x1xi32>
    %116 = arith.cmpi slt, %18, %115 : vector<256x1xi32>
    %cst_46 = arith.constant 0.000000e+00 : f32
    %117 = vector.broadcast %cst_46 : f32 to vector<2x8xf32>
    %118 = vector.extract_strided_slice %105 {offsets = [2, 0], sizes = [254, 8], strides = [1, 1]} : vector<256x8xf32> to vector<254x8xf32>
    %119 = tpu.concatenate %118, %117 in 0 : vector<254x8xf32>, vector<2x8xf32> -> vector<256x8xf32>
    %cst_47 = arith.constant 0.000000e+00 : f32
    %120 = vector.shape_cast %116 : vector<256x1xi1> to vector<256x1xi1>
    %121 = vector.broadcast %120 : vector<256x1xi1> to vector<256x8xi1>
    %122 = vector.broadcast %cst_47 : f32 to vector<256x8xf32>
    %123 = arith.select %121, %119, %122 : vector<256x8xi1>, vector<256x8xf32>
    %c3 = arith.constant 3 : index
    %c0_48 = arith.constant 0 : index
    %c0_49 = arith.constant 0 : index
    %c0_50 = arith.constant 0 : index
    %124 = vector.load %arg2[%c3, %c0_48, %c0_49, %c0_50] : memref<4x3x8x8xf32, #tpu.memory_space<vmem>>, vector<1x3x8x8xf32>
    %125 = vector.shape_cast %124 : vector<1x3x8x8xf32> to vector<3x8x8xf32>
    %126 = vector.extract_strided_slice %125 {offsets = [0, 0, 0], sizes = [1, 8, 8], strides = [1, 1, 1]} : vector<3x8x8xf32> to vector<1x8x8xf32>
    %127 = vector.shape_cast %126 : vector<1x8x8xf32> to vector<8x8xf32>
    %cst_51 = arith.constant dense<0.000000e+00> : vector<256x8xf32>
    %128 = tpu.matmul %114, %127, %cst_51 {dimension_numbers = #tpu.dot_dimension_numbers<[1], [0], [0], [1], [0, 0, 1, 1], [], []>} : vector<256x8xf32>, vector<8x8xf32>, vector<256x8xf32> -> vector<256x8xf32>
    %129 = vector.extract_strided_slice %125 {offsets = [1, 0, 0], sizes = [1, 8, 8], strides = [1, 1, 1]} : vector<3x8x8xf32> to vector<1x8x8xf32>
    %130 = vector.shape_cast %129 : vector<1x8x8xf32> to vector<8x8xf32>
    %cst_52 = arith.constant dense<0.000000e+00> : vector<256x8xf32>
    %131 = tpu.matmul %105, %130, %cst_52 {dimension_numbers = #tpu.dot_dimension_numbers<[1], [0], [0], [1], [0, 0, 1, 1], [], []>} : vector<256x8xf32>, vector<8x8xf32>, vector<256x8xf32> -> vector<256x8xf32>
    %132 = arith.addf %128, %131 : vector<256x8xf32>
    %133 = vector.extract_strided_slice %125 {offsets = [2, 0, 0], sizes = [1, 8, 8], strides = [1, 1, 1]} : vector<3x8x8xf32> to vector<1x8x8xf32>
    %134 = vector.shape_cast %133 : vector<1x8x8xf32> to vector<8x8xf32>
    %cst_53 = arith.constant dense<0.000000e+00> : vector<256x8xf32>
    %135 = tpu.matmul %123, %134, %cst_53 {dimension_numbers = #tpu.dot_dimension_numbers<[1], [0], [0], [1], [0, 0, 1, 1], [], []>} : vector<256x8xf32>, vector<8x8xf32>, vector<256x8xf32> -> vector<256x8xf32>
    %136 = arith.addf %132, %135 : vector<256x8xf32>
    %c3_54 = arith.constant 3 : index
    %c0_55 = arith.constant 0 : index
    %c0_56 = arith.constant 0 : index
    %137 = vector.load %arg3[%c3_54, %c0_55, %c0_56] : memref<4x1x8xf32, #tpu.memory_space<vmem>>, vector<1x1x8xf32>
    %138 = vector.shape_cast %137 : vector<1x1x8xf32> to vector<1x8xf32>
    %139 = vector.broadcast %138 : vector<1x8xf32> to vector<256x8xf32>
    %140 = arith.addf %136, %139 : vector<256x8xf32>
    %141 = arith.addf %140, %1 : vector<256x8xf32>
    %cst_57 = arith.constant 0.000000e+00 : f32
    %142 = vector.broadcast %cst_57 : f32 to vector<256x8xf32>
    %143 = arith.maximumf %141, %142 : vector<256x8xf32>
    %c0_58 = arith.constant 0 : index
    %c0_59 = arith.constant 0 : index
    %c0_60 = arith.constant 0 : index
    %144 = vector.load %arg4[%c0_58, %c0_59, %c0_60] : memref<1x256x8xf32, #tpu.memory_space<vmem>>, vector<1x256x8xf32>
    %145 = vector.shape_cast %144 : vector<1x256x8xf32> to vector<256x8xf32>
    %146 = vector.shape_cast %143 : vector<256x8xf32> to vector<1x256x8xf32>
    tpu.vector_store %arg4[%c0_58, %c0_59, %c0_60], %146 {strides = array<i32>} : memref<1x256x8xf32, #tpu.memory_space<vmem>>, vector<1x256x8xf32>,
    return
  }
  func.func @transform_0(%arg0: i32) -> (i32, i32, i32) {
    %c0_i32 = arith.constant 0 : i32
    %c0_i32_0 = arith.constant 0 : i32
    %c0_i32_1 = arith.constant 0 : i32
    return %arg0, %c0_i32, %c0_i32_0 : i32, i32, i32
  }
  func.func @transform_1(%arg0: i32) -> (i32, i32, i32, i32) {
    %c0_i32 = arith.constant 0 : i32
    %c0_i32_0 = arith.constant 0 : i32
    %c0_i32_1 = arith.constant 0 : i32
    %c0_i32_2 = arith.constant 0 : i32
    %c0_i32_3 = arith.constant 0 : i32
    return %c0_i32, %c0_i32_0, %c0_i32_1, %c0_i32_2 : i32, i32, i32, i32
  }
  func.func @transform_2(%arg0: i32) -> (i32, i32, i32) {
    %c0_i32 = arith.constant 0 : i32
    %c0_i32_0 = arith.constant 0 : i32
    %c0_i32_1 = arith.constant 0 : i32
    %c0_i32_2 = arith.constant 0 : i32
    return %c0_i32, %c0_i32_0, %c0_i32_1 : i32, i32, i32
  }
  func.func @transform_3(%arg0: i32) -> (i32, i32, i32) {
    %c0_i32 = arith.constant 0 : i32
    %c0_i32_0 = arith.constant 0 : i32
    %c0_i32_1 = arith.constant 0 : i32
    return %arg0, %c0_i32, %c0_i32_0 : i32, i32, i32
  }
}

</mosaic_0001>

<bundles_post_ra>
// kernel: non_bottleneck_1d_forward.1
= control target key start
LH: loop header
LB: loop body
LE: loop exit
PB: predicated region body
PF: predicated region fallthrough
CT: control target
= control target key end

     0   :  { %s4658_s12 = smov 0   ;;  %s6414_s0 = inlined_call_operand.vmem [shape: f32[2,256,8], index: 0, kind: input, shape index: {}]   ;;  %s6415_s1 = inlined_call_operand.vmem [shape: f32[4,3,8,8], index: 1, kind: input, shape index: {}]   ;;  %s6416_s2 = inlined_call_operand.vmem [shape: f32[4,1,8], index: 2, kind: input, shape index: {}]   ;;  %s6417_s3 = inlined_call_operand.vmem [shape: f32[2,256,8], index: 3, kind: output, shape index: {}]  }
   0x1 LB: > { %s4185_s13 = sadd.s32 4294967295, %s4635_s12   ;;  %p4189_p0 = scmp.ge.s32.totalorder %s4635_s12, 1  ;;  %s4635_s12 = sphi %s4658_s12, %s13_s12  }
   0x2   : > { %p137_p1 = scmp.lt.s32.totalorder %s4635_s12, 3 }
   0x4   : > { %p138_p2 = pnand %p4189_p0, %p137_p1 }
   0x6   : > { %141 = sbr.rel (%p138_p2) target bundleno = 1063 (0x427), region = 32 }
   0xb   : > { %v620_v0 = vld [vmem:[%s6415_s1] sm:$0xff]  ;;  %v621_v1 = vld [vmem:[%s6415_s1 + $0x8] sm:$0xff]  ;;  %v622_v2 = vld [vmem:[%s6415_s1 + $0x10] sm:$0xff]  ;;  %p161_p3 = scmp.lt.s32.totalorder %s4185_s13, 1  ;;  %v6428_v5 = vmov 0.0   ;;  %vm623_vm0 = vcmask 64512  }
   0xc   : > { %851 = vmatpush.msra.mxu1 %v620_v0  ;;  %735 = vmatpush.msra.mxu0 %v621_v1  ;;  %v4286_v3 = vld [vmem:[%s6415_s1 + $0x18] sm:$0xff]  ;;  %v4288_v4 = vld [vmem:[%s6415_s1 + $0x28] sm:$0xff]  ;;  %v4287_v22 = vld [vmem:[%s6415_s1 + $0x20] sm:$0xff]  ;;  %vm1451_vm1 = vcmask 1046528   ;;  %vm1226_vm2 = vcmask 1040384  }
   0xd   : > { %852 = vmatmul.f32.vlgmr.msra.gmra.mxu1 %v6428_v5  ;;  %964 = vmatpush.msra.mxu2 %v622_v2  ;;  %s6551_s13 = smov (!%p161_p3, %s4185_s13), 1  ;;  %v4387_v24 = vld [vmem:[%s6415_s1 + $0x38] sm:$0xff]  ;;  %v4386_v25 = vld [vmem:[%s6415_s1 + $0x30] sm:$0xff]  ;;  %v4773_v32 = vld [vmem:[%s6416_s2] ss:$0 sm:$0xff] }
   0xe   : > { %1936 = vmatpush.msrb.mxu0 %v4286_v3  ;;  %2145 = vmatpush.msrb.mxu1 %v4288_v4  ;;  %s4580_s24 = sshll.u32 %s6551_s13, 8 }
   0xf   : > { %s4690_s27 = scalar_lea.vmem %s6414_s0, %s4580_s24  ;;  %1727 = vmatpush.msra.mxu3 %v4287_v22  ;;  %2459 = vmatpush.msrb.mxu2 %v4387_v24  ;;  %s6146_s4 = scalar_lea.vmem %s6417_s3, %s4580_s24 }
  0x10   : > { %v171_v6 = vld [vmem:[%s4690_s27] sm:$0xff]  ;;  %v173_v7 = vld [vmem:[%s4690_s27 + $0x10] sm:$0xff]  ;;  %v172_v8 = vld [vmem:[%s4690_s27 + $0x8] sm:$0xff] }
  0x11   : > { %4194 = vmatmul.msk.f32.vlgmr.msra.gmra.mxu0 %vm623_vm0, %v171_v6  ;;  %4256 = vmatmul.msk.f32.vlgmr.msra.gmra.mxu2 %vm623_vm0, %v173_v7  ;;  %v174_v9 = vld [vmem:[%s4690_s27 + $0x18] sm:$0xff]  ;;  %v175_v10 = vld [vmem:[%s4690_s27 + $0x20] sm:$0xff]  ;;  %v176_v11 = vld [vmem:[%s4690_s27 + $0x28] sm:$0xff] }
  0x12   : > { %v177_v12 = vld [vmem:[%s4690_s27 + $0x30] sm:$0xff]  ;;  %v178_v13 = vld [vmem:[%s4690_s27 + $0x38] sm:$0xff]  ;;  %v179_v14 = vld [vmem:[%s4690_s27 + $0x40] sm:$0xff]  ;;  %2572 = vmatpush.msrb.mxu3 %v4386_v25 }
  0x13   : > { %v180_v15 = vld [vmem:[%s4690_s27 + $0x48] sm:$0xff]  ;;  %v181_v16 = vld [vmem:[%s4690_s27 + $0x50] sm:$0xff]  ;;  %v182_v17 = vld [vmem:[%s4690_s27 + $0x58] sm:$0xff] }
  0x14   : > { %v183_v18 = vld [vmem:[%s4690_s27 + $0x60] sm:$0xff]  ;;  %v184_v19 = vld [vmem:[%s4690_s27 + $0x68] sm:$0xff]  ;;  %v185_v20 = vld [vmem:[%s4690_s27 + $0x70] sm:$0xff] }
  0x15   : > { %855 = vmatmul.f32.gmra.mxu1 %v6428_v5  ;;  %v186_v21 = vld [vmem:[%s4690_s27 + $0x78] sm:$0xff]  ;;  %v187_v23 = vld [vmem:[%s4690_s27 + $0x80] sm:$0xff]  ;;  %v188_v26 = vld [vmem:[%s4690_s27 + $0x88] sm:$0xff] }
  0x16   : > { %v189_v29 = vld [vmem:[%s4690_s27 + $0x90] sm:$0xff]  ;;  %v190_v36 = vld [vmem:[%s4690_s27 + $0x98] sm:$0xff]  ;;  %v191_v44 = vld [vmem:[%s4690_s27 + $0xa0] sm:$0xff] }
  0x17   : > { %v192_v58 = vld [vmem:[%s4690_s27 + $0xa8] sm:$0xff] }
  0x19   : > { %4195 = vmatmul.msk.f32.gmra.mxu0 %vm623_vm0, %v172_v8  ;;  %4257 = vmatmul.msk.f32.gmra.mxu2 %vm623_vm0, %v174_v9 }
  0x1d   : > { %4226 = vmatmul.msk.f32.gmra.mxu1 %vm623_vm0, %v171_v6 }
  0x21   : > { %4196 = vmatmul.msk.f32.gmra.mxu0 %vm623_vm0, %v173_v7  ;;  %4258 = vmatmul.msk.f32.gmra.mxu2 %vm623_vm0, %v175_v10 }
  0x25   : > { %4227 = vmatmul.msk.f32.gmra.mxu1 %vm623_vm0, %v172_v8 }
  0x29   : > { %4197 = vmatmul.msk.f32.gmra.mxu0 %vm623_vm0, %v174_v9  ;;  %4259 = vmatmul.msk.f32.gmra.mxu2 %vm623_vm0, %v176_v11 }
  0x2d   : > { %4228 = vmatmul.msk.f32.gmra.mxu1 %vm623_vm0, %v173_v7  ;;  %v193_v7 = vld [vmem:[%s4690_s27 + $0xb0] sm:$0xff] }
  0x31   : > { %4198 = vmatmul.msk.f32.gmra.mxu0 %vm623_vm0, %v175_v10  ;;  %4260 = vmatmul.msk.f32.gmra.mxu2 %vm623_vm0, %v177_v12 }
  0x35   : > { %4229 = vmatmul.msk.f32.gmra.mxu1 %vm623_vm0, %v174_v9 }
  0x39   : > { %4199 = vmatmul.msk.f32.gmra.mxu0 %vm623_vm0, %v176_v11  ;;  %4261 = vmatmul.msk.f32.gmra.mxu2 %vm623_vm0, %v178_v13 }
  0x3d   : > { %4230 = vmatmul.msk.f32.gmra.mxu1 %vm623_vm0, %v175_v10 }
  0x41   : > { %4200 = vmatmul.msk.f32.gmra.mxu0 %vm623_vm0, %v177_v12  ;;  %4262 = vmatmul.msk.f32.gmra.mxu2 %vm623_vm0, %v179_v14 }
  0x45   : > { %4231 = vmatmul.msk.f32.gmra.mxu1 %vm623_vm0, %v176_v11 }
  0x49   : > { %4201 = vmatmul.msk.f32.gmra.mxu0 %vm623_vm0, %v178_v13  ;;  %4263 = vmatmul.msk.f32.gmra.mxu2 %vm623_vm0, %v180_v15 }
  0x4d   : > { %4232 = vmatmul.msk.f32.gmra.mxu1 %vm623_vm0, %v177_v12 }
  0x51   : > { %4202 = vmatmul.msk.f32.gmra.mxu0 %vm623_vm0, %v179_v14  ;;  %4264 = vmatmul.msk.f32.gmra.mxu2 %vm623_vm0, %v181_v16 }
  0x55   : > { %4233 = vmatmul.msk.f32.gmra.mxu1 %vm623_vm0, %v178_v13 }
  0x59   : > { %4203 = vmatmul.msk.f32.gmra.mxu0 %vm623_vm0, %v180_v15  ;;  %4265 = vmatmul.msk.f32.gmra.mxu2 %vm623_vm0, %v182_v17 }
  0x5d   : > { %4234 = vmatmul.msk.f32.gmra.mxu1 %vm623_vm0, %v179_v14 }
  0x61   : > { %4204 = vmatmul.msk.f32.gmra.mxu0 %vm623_vm0, %v181_v16  ;;  %4266 = vmatmul.msk.f32.gmra.mxu2 %vm623_vm0, %v183_v18 }
  0x65   : > { %4235 = vmatmul.msk.f32.gmra.mxu1 %vm623_vm0, %v180_v15 }
  0x69   : > { %4205 = vmatmul.msk.f32.gmra.mxu0 %vm623_vm0, %v182_v17  ;;  %4267 = vmatmul.msk.f32.gmra.mxu2 %vm623_vm0, %v184_v19 }
  0x6d   : > { %4236 = vmatmul.msk.f32.gmra.mxu1 %vm623_vm0, %v181_v16 }
  0x71   : > { %4206 = vmatmul.msk.f32.gmra.mxu0 %vm623_vm0, %v183_v18  ;;  %4268 = vmatmul.msk.f32.gmra.mxu2 %vm623_vm0, %v185_v20 }
  0x75   : > { %4237 = vmatmul.msk.f32.gmra.mxu1 %vm623_vm0, %v182_v17 }
  0x79   : > { %4207 = vmatmul.msk.f32.gmra.mxu0 %vm623_vm0, %v184_v19  ;;  %4269 = vmatmul.msk.f32.gmra.mxu2 %vm623_vm0, %v186_v21 }
  0x7d   : > { %4238 = vmatmul.msk.f32.gmra.mxu1 %vm623_vm0, %v183_v18 }
  0x81   : > { %4208 = vmatmul.msk.f32.gmra.mxu0 %vm623_vm0, %v185_v20  ;;  %4270 = vmatmul.msk.f32.gmra.mxu2 %vm623_vm0, %v187_v23 }
  0x85   : > { %4239 = vmatmul.msk.f32.gmra.mxu1 %vm623_vm0, %v184_v19  ;;  %v194_v19 = vld [vmem:[%s4690_s27 + $0xb8] sm:$0xff] }
  0x89   : > { %4209 = vmatmul.msk.f32.gmra.mxu0 %vm623_vm0, %v186_v21  ;;  %4271 = vmatmul.msk.f32.gmra.mxu2 %vm623_vm0, %v188_v26 }
  0x8a   : > { %v853_v27 = vpop.f32.mrf.mxu1 }
  0x8d   : > { %4240 = vmatmul.msk.f32.gmra.mxu1 %vm623_vm0, %v185_v20 }
  0x8e   : > { %v737_v28 = vpop.f32.mrf.mxu0 }
  0x8f   : > { %v854_v31 = vadd.f32 %v853_v27, %v737_v28 }
  0x91   : > { %4210 = vmatmul.msk.f32.gmra.mxu0 %vm623_vm0, %v187_v23  ;;  %4272 = vmatmul.msk.f32.gmra.mxu2 %vm623_vm0, %v189_v29 }
  0x92   : > { %v856_v30 = vpop.f32.mrf.mxu1 }
  0x94   : > { %v966_v33 = vpop.f32.mrf.mxu2 }
  0x95   : > { %4241 = vmatmul.msk.f32.gmra.mxu1 %vm623_vm0, %v186_v21  ;;  %v1062_v34 = vadd.f32 %v966_v33, %v854_v31  ;;  %v195_v31 = vld [vmem:[%s4690_s27 + $0xc0] sm:$0xff] }
  0x96   : > { %v740_v35 = vpop.f32.mrf.mxu0 }
  0x97   : > { %v1098_v37 = vadd.f32 %v4773_v32, %v1062_v34  ;;  %v857_v40 = vadd.f32 %v856_v30, %v740_v35 }
  0x99   : > { %4211 = vmatmul.msk.f32.gmra.mxu0 %vm623_vm0, %v188_v26  ;;  %4273 = vmatmul.msk.f32.gmra.mxu2 %vm623_vm0, %v190_v36  ;;  %v4780_v39 = vmax.f32 %v1098_v37, 0.0 }
  0x9a   : > { %v859_v38 = vpop.f32.mrf.mxu1 }
  0x9b   : > { %4289 = vmatmul.msk.f32.vlgmr.msra.gmra.mxu3 %vm623_vm0, %v4780_v39  ;;  %v1227_v48 = vrot.slane %v4780_v39, 7  ;;  %v1452_v49 = vrot.slane %v4780_v39, 1 }
  0x9c   : > { %v969_v41 = vpop.f32.mrf.mxu2 }
  0x9d   : > { %4242 = vmatmul.msk.f32.gmra.mxu1 %vm623_vm0, %v187_v23  ;;  %v1063_v42 = vadd.f32 %v969_v41, %v857_v40 }
  0x9e   : > { %v743_v43 = vpop.f32.mrf.mxu0 }
  0x9f   : > { %v1099_v45 = vadd.f32 %v4773_v32, %v1063_v42  ;;  %v860_v50 = vadd.f32 %v859_v38, %v743_v43 }
  0xa1   : > { %4212 = vmatmul.msk.f32.gmra.mxu0 %vm623_vm0, %v189_v29  ;;  %4274 = vmatmul.msk.f32.gmra.mxu2 %vm623_vm0, %v191_v44  ;;  %v1131_v47 = vmax.f32 %v1099_v45, 0.0  ;;  %v196_v45 = vld [vmem:[%s4690_s27 + $0xc8] sm:$0xff] }
  0xa2   : > { %v862_v46 = vpop.f32.mrf.mxu1 }
  0xa3   : > { %v1453_v51 = vrot.slane %v1131_v47, 1  ;;  %4290 = vmatmul.msk.f32.gmra.mxu3 %vm623_vm0, %v1131_v47  ;;  %v1228_v52 = vrot.slane %v1131_v47, 7 }
  0xa4   : > { %v972_v53 = vpop.f32.mrf.mxu2 }
  0xa5   : > { %4243 = vmatmul.msk.f32.gmra.mxu1 %vm623_vm0, %v188_v26  ;;  %v1064_v54 = vadd.f32 %v972_v53, %v860_v50  ;;  %v4794_v55 = vsel %vm1451_vm1, %v1452_v49, %v1453_v51  ;;  %v4799_v56 = vsel %vm1226_vm2, %v1227_v48, %v1228_v52 }
  0xa6   : > { %v746_v57 = vpop.f32.mrf.mxu0 }
  0xa7   : > { %v1100_v59 = vadd.f32 %v4773_v32, %v1064_v54  ;;  %v863_v62 = vadd.f32 %v862_v46, %v746_v57 }
  0xa9   : > { %4213 = vmatmul.msk.f32.gmra.mxu0 %vm623_vm0, %v190_v36  ;;  %4275 = vmatmul.msk.f32.gmra.mxu2 %vm623_vm0, %v192_v58  ;;  %v1132_v61 = vmax.f32 %v1100_v59, 0.0 }
  0xaa   : > { %v865_v60 = vpop.f32.mrf.mxu1 }
  0xab   : > { %v1230_v63 = vrot.slane %v1132_v61, 7  ;;  %v1455_v0 = vrot.slane %v1132_v61, 1  ;;  %4291 = vmatmul.msk.f32.gmra.mxu3 %vm623_vm0, %v1132_v61 }
  0xac   : > { %v975_v1 = vpop.f32.mrf.mxu2 }
  0xad   : > { %4244 = vmatmul.msk.f32.gmra.mxu1 %vm623_vm0, %v189_v29  ;;  %v1065_v2 = vadd.f32 %v975_v1, %v863_v62  ;;  %v4808_v3 = vsel %vm1451_vm1, %v1453_v51, %v1455_v0  ;;  %v4811_v4 = vsel %vm1226_vm2, %v1228_v52, %v1230_v63 }
  0xae   : > { %v749_v6 = vpop.f32.mrf.mxu0 }
  0xaf   : > { %v1101_v8 = vadd.f32 %v4773_v32, %v1065_v2  ;;  %v866_v11 = vadd.f32 %v865_v60, %v749_v6  ;;  %v197_v60 = vld [vmem:[%s4690_s27 + $0xd0] sm:$0xff] }
  0xb1   : > { %4214 = vmatmul.msk.f32.gmra.mxu0 %vm623_vm0, %v191_v44  ;;  %4276 = vmatmul.msk.f32.gmra.mxu2 %vm623_vm0, %v193_v7  ;;  %v1133_v10 = vmax.f32 %v1101_v8, 0.0 }
  0xb2   : > { %v868_v9 = vpop.f32.mrf.mxu1 }
  0xb3   : > { %4292 = vmatmul.msk.f32.gmra.mxu3 %vm623_vm0, %v1133_v10  ;;  %v1457_v12 = vrot.slane %v1133_v10, 1  ;;  %v1232_v13 = vrot.slane %v1133_v10, 7 }
  0xb4   : > { %v978_v14 = vpop.f32.mrf.mxu2 }
  0xb5   : > { %4245 = vmatmul.msk.f32.gmra.mxu1 %vm623_vm0, %v190_v36  ;;  %v1066_v15 = vadd.f32 %v978_v14, %v866_v11  ;;  %v4820_v16 = vsel %vm1451_vm1, %v1455_v0, %v1457_v12  ;;  %v4823_v17 = vsel %vm1226_vm2, %v1230_v63, %v1232_v13  ;;  %v198_v11 = vld [vmem:[%s4690_s27 + $0xd8] sm:$0xff] }
  0xb6   : > { %v752_v18 = vpop.f32.mrf.mxu0 }
  0xb7   : > { %v1102_v20 = vadd.f32 %v4773_v32, %v1066_v15  ;;  %v869_v23 = vadd.f32 %v868_v9, %v752_v18 }
  0xb9   : > { %4215 = vmatmul.msk.f32.gmra.mxu0 %vm623_vm0, %v192_v58  ;;  %4277 = vmatmul.msk.f32.gmra.mxu2 %vm623_vm0, %v194_v19  ;;  %v1134_v22 = vmax.f32 %v1102_v20, 0.0 }
  0xba   : > { %v871_v21 = vpop.f32.mrf.mxu1 }
  0xbb   : > { %v1234_v24 = vrot.slane %v1134_v22, 7  ;;  %v1459_v25 = vrot.slane %v1134_v22, 1  ;;  %4293 = vmatmul.msk.f32.gmra.mxu3 %vm623_vm0, %v1134_v22 }
  0xbc   : > { %v981_v26 = vpop.f32.mrf.mxu2 }
  0xbd   : > { %4246 = vmatmul.msk.f32.gmra.mxu1 %vm623_vm0, %v191_v44  ;;  %v1067_v27 = vadd.f32 %v981_v26, %v869_v23  ;;  %v4832_v28 = vsel %vm1451_vm1, %v1457_v12, %v1459_v25  ;;  %v4835_v29 = vsel %vm1226_vm2, %v1232_v13, %v1234_v24 }
  0xbe   : > { %v755_v30 = vpop.f32.mrf.mxu0 }
  0xbf   : > { %v1103_v33 = vadd.f32 %v4773_v32, %v1067_v27  ;;  %v872_v36 = vadd.f32 %v871_v21, %v755_v30 }
  0xc1   : > { %4216 = vmatmul.msk.f32.gmra.mxu0 %vm623_vm0, %v193_v7  ;;  %4278 = vmatmul.msk.f32.gmra.mxu2 %vm623_vm0, %v195_v31  ;;  %v1135_v35 = vmax.f32 %v1103_v33, 0.0 }
  0xc2   : > { %v874_v34 = vpop.f32.mrf.mxu1 }
  0xc3   : > { %4294 = vmatmul.msk.f32.gmra.mxu3 %vm623_vm0, %v1135_v35  ;;  %v1461_v37 = vrot.slane %v1135_v35, 1  ;;  %v1236_v38 = vrot.slane %v1135_v35, 7 }
  0xc4   : > { %v984_v40 = vpop.f32.mrf.mxu2 }
  0xc5   : > { %4247 = vmatmul.msk.f32.gmra.mxu1 %vm623_vm0, %v192_v58  ;;  %v1068_v41 = vadd.f32 %v984_v40, %v872_v36  ;;  %v4844_v42 = vsel %vm1451_vm1, %v1459_v25, %v1461_v37  ;;  %v4847_v43 = vsel %vm1226_vm2, %v1234_v24, %v1236_v38  ;;  %v199_v25 = vld [vmem:[%s4690_s27 + $0xe0] sm:$0xff] }
  0xc6   : > { %v758_v44 = vpop.f32.mrf.mxu0 }
  0xc7   : > { %v1104_v46 = vadd.f32 %v4773_v32, %v1068_v41  ;;  %v875_v50 = vadd.f32 %v874_v34, %v758_v44  ;;  %v200_v41 = vld [vmem:[%s4690_s27 + $0xe8] sm:$0xff] }
  0xc9   : > { %4217 = vmatmul.msk.f32.gmra.mxu0 %vm623_vm0, %v194_v19  ;;  %4279 = vmatmul.msk.f32.gmra.mxu2 %vm623_vm0, %v196_v45  ;;  %v1136_v49 = vmax.f32 %v1104_v46, 0.0 }
  0xca   : > { %v877_v47 = vpop.f32.mrf.mxu1 }
  0xcb   : > { %v1238_v51 = vrot.slane %v1136_v49, 7  ;;  %v1463_v52 = vrot.slane %v1136_v49, 1  ;;  %4295 = vmatmul.msk.f32.gmra.mxu3 %vm623_vm0, %v1136_v49 }
  0xcc   : > { %v987_v53 = vpop.f32.mrf.mxu2 }
  0xcd   : > { %4248 = vmatmul.msk.f32.gmra.mxu1 %vm623_vm0, %v193_v7  ;;  %v1069_v54 = vadd.f32 %v987_v53, %v875_v50  ;;  %v4856_v57 = vsel %vm1451_vm1, %v1461_v37, %v1463_v52  ;;  %v4859_v58 = vsel %vm1226_vm2, %v1236_v38, %v1238_v51 }
  0xce   : > { %v761_v59 = vpop.f32.mrf.mxu0 }
  0xcf   : > { %v1105_v61 = vadd.f32 %v4773_v32, %v1069_v54  ;;  %v878_v0 = vadd.f32 %v877_v47, %v761_v59 }
  0xd1   : > { %4218 = vmatmul.msk.f32.gmra.mxu0 %vm623_vm0, %v195_v31  ;;  %4280 = vmatmul.msk.f32.gmra.mxu2 %vm623_vm0, %v197_v60  ;;  %v1137_v63 = vmax.f32 %v1105_v61, 0.0  ;;  %v201_v61 = vld [vmem:[%s4690_s27 + $0xf0] sm:$0xff] }
  0xd2   : > { %v880_v62 = vpop.f32.mrf.mxu1 }
  0xd3   : > { %4296 = vmatmul.msk.f32.gmra.mxu3 %vm623_vm0, %v1137_v63  ;;  %v1465_v1 = vrot.slane %v1137_v63, 1  ;;  %v1240_v2 = vrot.slane %v1137_v63, 7 }
  0xd4   : > { %v990_v6 = vpop.f32.mrf.mxu2 }
  0xd5   : > { %4249 = vmatmul.msk.f32.gmra.mxu1 %vm623_vm0, %v194_v19  ;;  %v1070_v7 = vadd.f32 %v990_v6, %v878_v0  ;;  %v4868_v8 = vsel %vm1451_vm1, %v1463_v52, %v1465_v1  ;;  %v4871_v9 = vsel %vm1226_vm2, %v1238_v51, %v1240_v2 }
  0xd6   : > { %v764_v10 = vpop.f32.mrf.mxu0 }
  0xd7   : > { %v1106_v12 = vadd.f32 %v4773_v32, %v1070_v7  ;;  %v881_v15 = vadd.f32 %v880_v62, %v764_v10 }
  0xd9   : > { %4219 = vmatmul.msk.f32.gmra.mxu0 %vm623_vm0, %v196_v45  ;;  %4281 = vmatmul.msk.f32.gmra.mxu2 %vm623_vm0, %v198_v11  ;;  %v1138_v14 = vmax.f32 %v1106_v12, 0.0 }
  0xda   : > { %v883_v13 = vpop.f32.mrf.mxu1 }
  0xdb   : > { %v1242_v18 = vrot.slane %v1138_v14, 7  ;;  %v1467_v19 = vrot.slane %v1138_v14, 1  ;;  %4297 = vmatmul.msk.f32.gmra.mxu3 %vm623_vm0, %v1138_v14 }
  0xdc   : > { %v993_v20 = vpop.f32.mrf.mxu2 }
  0xdd   : > { %4250 = vmatmul.msk.f32.gmra.mxu1 %vm623_vm0, %v195_v31  ;;  %v1071_v21 = vadd.f32 %v993_v20, %v881_v15  ;;  %v4880_v22 = vsel %vm1451_vm1, %v1465_v1, %v1467_v19  ;;  %v4883_v23 = vsel %vm1226_vm2, %v1240_v2, %v1242_v18  ;;  %v202_v15 = vld [vmem:[%s4690_s27 + $0xf8] sm:$0xff] }
  0xde   : > { %v767_v24 = vpop.f32.mrf.mxu0 }
  0xdf   : > { %v1107_v26 = vadd.f32 %v4773_v32, %v1071_v21  ;;  %v884_v31 = vadd.f32 %v883_v13, %v767_v24 }
  0xe1   : > { %4220 = vmatmul.msk.f32.gmra.mxu0 %vm623_vm0, %v197_v60  ;;  %4282 = vmatmul.msk.f32.gmra.mxu2 %vm623_vm0, %v199_v25  ;;  %v1139_v30 = vmax.f32 %v1107_v26, 0.0 }
  0xe2   : > { %v886_v27 = vpop.f32.mrf.mxu1 }
  0xe3   : > { %4298 = vmatmul.msk.f32.gmra.mxu3 %vm623_vm0, %v1139_v30  ;;  %v1469_v33 = vrot.slane %v1139_v30, 1  ;;  %v1244_v34 = vrot.slane %v1139_v30, 7 }
  0xe4   : > { %v996_v35 = vpop.f32.mrf.mxu2 }
  0xe5   : > { %4251 = vmatmul.msk.f32.gmra.mxu1 %vm623_vm0, %v196_v45  ;;  %v1072_v36 = vadd.f32 %v996_v35, %v884_v31  ;;  %v4892_v37 = vsel %vm1451_vm1, %v1467_v19, %v1469_v33  ;;  %v4895_v38 = vsel %vm1226_vm2, %v1242_v18, %v1244_v34  ;;  %v203_v35 = vlaneseq }
  0xe6   : > { %v770_v40 = vpop.f32.mrf.mxu0 }
  0xe7   : > { %v1108_v44 = vadd.f32 %v4773_v32, %v1072_v36  ;;  %v887_v45 = vadd.f32 %v886_v27, %v770_v40 }
  0xe9   : > { %4221 = vmatmul.msk.f32.gmra.mxu0 %vm623_vm0, %v198_v11  ;;  %4283 = vmatmul.msk.f32.gmra.mxu2 %vm623_vm0, %v200_v41  ;;  %v1140_v47 = vmax.f32 %v1108_v44, 0.0 }
  0xea   : > { %v889_v46 = vpop.f32.mrf.mxu1 }
  0xeb   : > { %v1246_v49 = vrot.slane %v1140_v47, 7  ;;  %v1471_v50 = vrot.slane %v1140_v47, 1  ;;  %4299 = vmatmul.msk.f32.gmra.mxu3 %vm623_vm0, %v1140_v47 }
  0xec   : > { %v999_v51 = vpop.f32.mrf.mxu2 }
  0xed   : > { %4252 = vmatmul.msk.f32.gmra.mxu1 %vm623_vm0, %v197_v60  ;;  %v1073_v52 = vadd.f32 %v999_v51, %v887_v45  ;;  %v4904_v53 = vsel %vm1451_vm1, %v1469_v33, %v1471_v50  ;;  %v4907_v54 = vsel %vm1226_vm2, %v1244_v34, %v1246_v49  ;;  %v4388_v60 = vld [vmem:[%s6415_s1 + $0x40] sm:$0xff]  ;;  %v4941_v45 = vshrl.u32 %v203_v35, 7 }
  0xee   : > { %v773_v59 = vpop.f32.mrf.mxu0  ;;  %2685 = vmatpush.msra.mxu0 %v4388_v60 }
  0xef   : > { %v1109_v62 = vadd.f32 %v4773_v32, %v1073_v52  ;;  %v890_v1 = vadd.f32 %v889_v46, %v773_v59 }
  0xf1   : > { %4222 = vmatmul.msk.f32.gmra.mxu0 %vm623_vm0, %v199_v25  ;;  %4284 = vmatmul.msk.f32.gmra.mxu2 %vm623_vm0, %v201_v61  ;;  %v1141_v0 = vmax.f32 %v1109_v62, 0.0  ;;  %v4952_v62 = vadd.s32 8, %v4941_v45 }
  0xf2   : > { %v892_v63 = vpop.f32.mrf.mxu1 }
  0xf3   : > { %4300 = vmatmul.msk.f32.gmra.mxu3 %vm623_vm0, %v1141_v0  ;;  %v1473_v2 = vrot.slane %v1141_v0, 1  ;;  %v1248_v6 = vrot.slane %v1141_v0, 7 }
  0xf4   : > { %v1002_v7 = vpop.f32.mrf.mxu2 }
  0xf5   : > { %4253 = vmatmul.msk.f32.gmra.mxu1 %vm623_vm0, %v198_v11  ;;  %v1074_v10 = vadd.f32 %v1002_v7, %v890_v1  ;;  %v4919_v12 = vsel %vm1451_vm1, %v1471_v50, %v1473_v2  ;;  %v4922_v13 = vsel %vm1226_vm2, %v1246_v49, %v1248_v6 }
  0xf6   : > { %v776_v14 = vpop.f32.mrf.mxu0 }
  0xf7   : > { %v1110_v18 = vadd.f32 %v4773_v32, %v1074_v10  ;;  %v893_v21 = vadd.f32 %v892_v63, %v776_v14  ;;  %v1322_v10 = vsel %vm1226_vm2, 0.0, %v1227_v48 }
  0xf9   : > { %4223 = vmatmul.msk.f32.gmra.mxu0 %vm623_vm0, %v200_v41  ;;  %4285 = vmatmul.msk.f32.gmra.mxu2 %vm623_vm0, %v202_v15  ;;  %v1142_v20 = vmax.f32 %v1110_v18, 0.0 }
  0xfa   : > { %v895_v19 = vpop.f32.mrf.mxu1 }
  0xfb   : > { %v1250_v11 = vrot.slane %v1142_v20, 7  ;;  %v1475_v24 = vrot.slane %v1142_v20, 1  ;;  %4301 = vmatmul.msk.f32.gmra.mxu3 %vm623_vm0, %v1142_v20 }
  0xfc   : > { %v1005_v26 = vpop.f32.mrf.mxu2 }
  0xfd   : > { %4254 = vmatmul.msk.f32.gmra.mxu1 %vm623_vm0, %v199_v25  ;;  %v1075_v27 = vadd.f32 %v1005_v26, %v893_v21  ;;  %v4931_v30 = vsel %vm1451_vm1, %v1473_v2, %v1475_v24  ;;  %v4934_v31 = vsel %vm1226_vm2, %v1248_v6, %v1250_v11  ;;  %v6424_v6 = vand.u32 15, %v4952_v62 }
  0xfe   : > { %v779_v33 = vpop.f32.mrf.mxu0 }
  0xff   : > { %v1111_v34 = vadd.f32 %v4773_v32, %v1075_v27  ;;  %v896_v44 = vadd.f32 %v895_v19, %v779_v33  ;;  %vm1420_vm4 = vcmp.lt.s32.totalorder %v6424_v6, 15  ;;  %v4979_v33 = vadd.s32 16, %v4941_v45 }
 0x100   : > { %v1613_v48 = vsel %vm1420_vm4, %v4808_v3, 0.0  ;;  %v4989_v3 = vadd.s32 24, %v4941_v45 }
 0x101   : > { %4224 = vmatmul.msk.f32.gmra.mxu0 %vm623_vm0, %v201_v61  ;;  %1055 = vmatmul.f32.gmra.mxu2 %v6428_v5  ;;  %v1143_v40 = vmax.f32 %v1111_v34, 0.0  ;;  %v6427_v61 = vand.u32 15, %v4941_v45 }
 0x102   : > { %v898_v36 = vpop.f32.mrf.mxu1  ;;  %6476 = vst [vmem:[#allocation2_spill] sm:$0xff] %v4989_v3 }
 0x103   : > { %4302 = vmatmul.msk.f32.gmra.mxu3 %vm623_vm0, %v1143_v40  ;;  %v1477_v25 = vrot.slane %v1143_v40, 1  ;;  %v1252_v46 = vrot.slane %v1143_v40, 7  ;;  %vm1162_vm3 = vcmp.ge.s32.totalorder %v6427_v61, 1 }
 0x104   : > { %v1008_v47 = vpop.f32.mrf.mxu2 }
 0x105   : > { %4255 = vmatmul.msk.f32.gmra.mxu1 %vm623_vm0, %v200_v41  ;;  %v1076_v49 = vadd.f32 %v1008_v47, %v896_v44  ;;  %v4944_v50 = vsel %vm1451_vm1, %v1475_v24, %v1477_v25  ;;  %v4947_v51 = vsel %vm1226_vm2, %v1250_v11, %v1252_v46 }
 0x106   : > { %v782_v52 = vpop.f32.mrf.mxu0 }
 0x107   : > { %v1112_v59 = vadd.f32 %v4773_v32, %v1076_v49  ;;  %v899_v0 = vadd.f32 %v898_v36, %v782_v52 }
 0x109   : > { %4225 = vmatmul.msk.f32.gmra.mxu0 %vm623_vm0, %v202_v15  ;;  %1058 = vmatmul.f32.gmra.mxu2 %v6428_v5  ;;  %v1144_v63 = vmax.f32 %v1112_v59, 0.0 }
 0x10a   : > { %v901_v41 = vpop.f32.mrf.mxu1 }
 0x10b   : > { %v1254_v60 = vrot.slane %v1144_v63, 7  ;;  %v1479_v1 = vrot.slane %v1144_v63, 1  ;;  %4303 = vmatmul.msk.f32.gmra.mxu3 %vm623_vm0, %v1144_v63 }
 0x10c   : > { %v1011_v2 = vpop.f32.mrf.mxu2 }
 0x10d   : > { %4353 = vmatmul.msk.f32.vlgmr.msrb.gmra.mxu1 %vm623_vm0, %v4794_v55  ;;  %v1077_v7 = vadd.f32 %v1011_v2, %v899_v0  ;;  %v4966_v14 = vsel %vm1451_vm1, %v1477_v25, %v1479_v1  ;;  %v4969_v15 = vsel %vm1226_vm2, %v1252_v46, %v1254_v60  ;;  %v1387_v55 = vsel %vm1162_vm3, %v1322_v10, 0.0 }
 0x10e   : > { %v785_v18 = vpop.f32.mrf.mxu0  ;;  %v6426_v46 = vand.u32 15, %v4979_v33 }
 0x10f   : > { %v1113_v19 = vadd.f32 %v4773_v32, %v1077_v7  ;;  %v902_v39 = vadd.f32 %v901_v41, %v785_v18  ;;  %v6421_v41 = vand.u32 15, %v4989_v3 }
 0x110   : > { %vm1164_vm5 = vcmp.ge.s32.totalorder %v6426_v46, 1 }
 0x111   : > { %4321 = vmatmul.msk.f32.vlgmr.msrb.gmra.mxu0 %vm623_vm0, %v1387_v55  ;;  %v1145_v21 = vmax.f32 %v1113_v19, 0.0  ;;  %v1389_v7 = vsel %vm1164_vm5, %v4811_v4, 0.0  ;;  %vm1422_vm6 = vcmp.lt.s32.totalorder %v6421_v41, 15  ;;  %v5017_v4 = vadd.s32 32, %v4941_v45 }
 0x112   : > { %v904_v20 = vpop.f32.mrf.mxu1  ;;  %v1615_v19 = vsel %vm1422_vm6, %v4832_v28, 0.0 }
 0x113   : > { %4304 = vmatmul.msk.f32.gmra.mxu3 %vm623_vm0, %v1145_v21  ;;  %v1481_v11 = vrot.slane %v1145_v21, 1  ;;  %v1256_v24 = vrot.slane %v1145_v21, 7  ;;  %6477 = vst [vmem:[#allocation3_spill] sm:$0xff] %v5017_v4 }
 0x114   : > { %v1014_v26 = vpop.f32.mrf.mxu2 }
 0x115   : > { %4354 = vmatmul.msk.f32.gmra.mxu1 %vm623_vm0, %v1613_v48  ;;  %v1078_v27 = vadd.f32 %v1014_v26, %v902_v39  ;;  %v4982_v34 = vsel %vm1451_vm1, %v1479_v1, %v1481_v11  ;;  %v4985_v35 = vsel %vm1226_vm2, %v1254_v60, %v1256_v24 }
 0x116   : > { %v788_v36 = vpop.f32.mrf.mxu0 }
 0x117   : > { %v1114_v40 = vadd.f32 %v4773_v32, %v1078_v27  ;;  %v905_v47 = vadd.f32 %v904_v20, %v788_v36  ;;  %v5029_v27 = vadd.s32 40, %v4941_v45 }
 0x119   : > { %4322 = vmatmul.msk.f32.gmra.mxu0 %vm623_vm0, %v4799_v56  ;;  %v1146_v25 = vmax.f32 %v1114_v40, 0.0  ;;  %6478 = vst [vmem:[#allocation4_spill] sm:$0xff] %v5029_v27 }
 0x11a   : > { %v907_v44 = vpop.f32.mrf.mxu1 }
 0x11b   : > { %v1258_v49 = vrot.slane %v1146_v25, 7  ;;  %v1483_v52 = vrot.slane %v1146_v25, 1  ;;  %4305 = vmatmul.msk.f32.gmra.mxu3 %vm623_vm0, %v1146_v25 }
 0x11c   : > { %v1017_v59 = vpop.f32.mrf.mxu2 }
 0x11d   : > { %4355 = vmatmul.msk.f32.gmra.mxu1 %vm623_vm0, %v4820_v16  ;;  %v1079_v63 = vadd.f32 %v1017_v59, %v905_v47  ;;  %v5001_v56 = vsel %vm1451_vm1, %v1481_v11, %v1483_v52  ;;  %v5004_v0 = vsel %vm1226_vm2, %v1256_v24, %v1258_v49  ;;  %v6418_v59 = vand.u32 15, %v5029_v27 }
 0x11e   : > { %v791_v60 = vpop.f32.mrf.mxu0  ;;  %v5006_v1 = vpop.f32.mrf.mxu3 }
 0x11f   : > { %v1115_v2 = vadd.f32 %v4773_v32, %v1079_v63  ;;  %v908_v18 = vadd.f32 %v907_v44, %v791_v60  ;;  %v6422_v44 = vand.u32 15, %v5017_v4  ;;  %vm1424_vm8 = vcmp.lt.s32.totalorder %v6418_v59, 15 }
 0x121   : > { %4323 = vmatmul.msk.f32.gmra.mxu0 %vm623_vm0, %v1389_v7  ;;  %v1147_v10 = vmax.f32 %v1115_v2, 0.0  ;;  %vm1166_vm7 = vcmp.ge.s32.totalorder %v6422_v44, 1 }
 0x122   : > { %v910_v16 = vpop.f32.mrf.mxu1 }
 0x123   : > { %4306 = vmatmul.msk.f32.gmra.mxu3 %vm623_vm0, %v1147_v10  ;;  %v1485_v55 = vrot.slane %v1147_v10, 1  ;;  %v1260_v20 = vrot.slane %v1147_v10, 7  ;;  %v1391_v10 = vsel %vm1166_vm7, %v4835_v29, 0.0  ;;  %v5057_v29 = vadd.s32 48, %v4941_v45 }
 0x124   : > { %v1020_v21 = vpop.f32.mrf.mxu2 }
 0x125   : > { %4356 = vmatmul.msk.f32.gmra.mxu1 %vm623_vm0, %v1615_v19  ;;  %v1080_v39 = vadd.f32 %v1020_v21, %v908_v18  ;;  %v5020_v48 = vsel %vm1451_vm1, %v1483_v52, %v1485_v55  ;;  %v5023_v11 = vsel %vm1226_vm2, %v1258_v49, %v1260_v20  ;;  %6479 = vst [vmem:[#allocation5_spill] sm:$0xff] %v5057_v29 }
 0x126   : > { %v794_v24 = vpop.f32.mrf.mxu0  ;;  %v5025_v26 = vpop.f32.mrf.mxu3 }
 0x127   : > { %v1116_v28 = vadd.f32 %v4773_v32, %v1080_v39  ;;  %v911_v25 = vadd.f32 %v910_v16, %v794_v24 }
 0x129   : > { %4324 = vmatmul.msk.f32.gmra.mxu0 %vm623_vm0, %v4823_v17  ;;  %v1148_v40 = vmax.f32 %v1116_v28, 0.0 }
 0x12a   : > { %v913_v36 = vpop.f32.mrf.mxu1 }
 0x12b   : > { %v1262_v47 = vrot.slane %v1148_v40, 7  ;;  %v1487_v52 = vrot.slane %v1148_v40, 1  ;;  %4307 = vmatmul.msk.f32.gmra.mxu3 %vm623_vm0, %v1148_v40 }
 0x12c   : > { %v1023_v49 = vpop.f32.mrf.mxu2 }
 0x12d   : > { %4357 = vmatmul.msk.f32.gmra.mxu1 %vm623_vm0, %v4844_v42  ;;  %v1081_v63 = vadd.f32 %v1023_v49, %v911_v25  ;;  %v5041_v17 = vsel %vm1451_vm1, %v1485_v55, %v1487_v52  ;;  %v5044_v60 = vsel %vm1226_vm2, %v1260_v20, %v1262_v47  ;;  %v1617_v55 = vsel %vm1424_vm8, %v4856_v57, 0.0 }
 0x12e   : > { %v797_v2 = vpop.f32.mrf.mxu0  ;;  %v5046_v7 = vpop.f32.mrf.mxu3  ;;  %v5069_v49 = vadd.s32 56, %v4941_v45 }
 0x12f   : > { %v1117_v16 = vadd.f32 %v4773_v32, %v1081_v63  ;;  %v914_v19 = vadd.f32 %v913_v36, %v797_v2 }
 0x130   : > { %6480 = vst [vmem:[#allocation6_spill] sm:$0xff] %v5069_v49 }
 0x131   : > { %4325 = vmatmul.msk.f32.gmra.mxu0 %vm623_vm0, %v1391_v10  ;;  %v1149_v18 = vmax.f32 %v1117_v16, 0.0  ;;  %v6420_v16 = vand.u32 15, %v5057_v29 }
 0x132   : > { %v916_v42 = vpop.f32.mrf.mxu1 }
 0x133   : > { %4308 = vmatmul.msk.f32.gmra.mxu3 %vm623_vm0, %v1149_v18  ;;  %v1489_v20 = vrot.slane %v1149_v18, 1  ;;  %v1264_v21 = vrot.slane %v1149_v18, 7  ;;  %vm1168_vm9 = vcmp.ge.s32.totalorder %v6420_v16, 1 }
 0x134   : > { %v1026_v39 = vpop.f32.mrf.mxu2 }
 0x135   : > { %4358 = vmatmul.msk.f32.gmra.mxu1 %vm623_vm0, %v1617_v55  ;;  %v1082_v24 = vadd.f32 %v1026_v39, %v914_v19  ;;  %v5060_v28 = vsel %vm1451_vm1, %v1487_v52, %v1489_v20  ;;  %v5063_v40 = vsel %vm1226_vm2, %v1262_v47, %v1264_v21  ;;  %v6419_v19 = vand.u32 15, %v5069_v49 }
 0x136   : > { %v800_v36 = vpop.f32.mrf.mxu0  ;;  %v5065_v25 = vpop.f32.mrf.mxu3 }
 0x137   : > { %v1118_v57 = vadd.f32 %v4773_v32, %v1082_v24  ;;  %v917_v52 = vadd.f32 %v916_v42, %v800_v36  ;;  %vm1426_vm10 = vcmp.lt.s32.totalorder %v6419_v19, 15 }
 0x139   : > { %4326 = vmatmul.msk.f32.gmra.mxu0 %vm623_vm0, %v4847_v43  ;;  %v1150_v2 = vmax.f32 %v1118_v57, 0.0  ;;  %v1393_v57 = vsel %vm1168_vm9, %v4859_v58, 0.0  ;;  %v5097_v58 = vadd.s32 64, %v4941_v45 }
 0x13a   : > { %v919_v63 = vpop.f32.mrf.mxu1 }
 0x13b   : > { %v1266_v10 = vrot.slane %v1150_v2, 7  ;;  %v1491_v18 = vrot.slane %v1150_v2, 1  ;;  %4309 = vmatmul.msk.f32.gmra.mxu3 %vm623_vm0, %v1150_v2  ;;  %6481 = vst [vmem:[#allocation7_spill] sm:$0xff] %v5097_v58 }
 0x13c   : > { %v1029_v47 = vpop.f32.mrf.mxu2 }
 0x13d   : > { %4359 = vmatmul.msk.f32.gmra.mxu1 %vm623_vm0, %v4868_v8  ;;  %v1083_v55 = vadd.f32 %v1029_v47, %v917_v52  ;;  %v5081_v43 = vsel %vm1451_vm1, %v1489_v20, %v1491_v18  ;;  %v5084_v39 = vsel %vm1226_vm2, %v1264_v21, %v1266_v10  ;;  %v1619_v20 = vsel %vm1426_vm10, %v4880_v22, 0.0 }
 0x13e   : > { %v803_v42 = vpop.f32.mrf.mxu0  ;;  %v5086_v24 = vpop.f32.mrf.mxu3 }
 0x13f   : > { %v1119_v36 = vadd.f32 %v4773_v32, %v1083_v55  ;;  %v920_v52 = vadd.f32 %v919_v63, %v803_v42 }
 0x141   : > { %4327 = vmatmul.msk.f32.gmra.mxu0 %vm623_vm0, %v1393_v57  ;;  %v1151_v2 = vmax.f32 %v1119_v36, 0.0  ;;  %v5109_v36 = vadd.s32 72, %v4941_v45 }
 0x142   : > { %v922_v8 = vpop.f32.mrf.mxu1 }
 0x143   : > { %4310 = vmatmul.msk.f32.gmra.mxu3 %vm623_vm0, %v1151_v2  ;;  %v1493_v21 = vrot.slane %v1151_v2, 1  ;;  %v1268_v47 = vrot.slane %v1151_v2, 7  ;;  %6482 = vst [vmem:[#allocation8_spill] sm:$0xff] %v5109_v36 }
 0x144   : > { %v1032_v59 = vpop.f32.mrf.mxu2 }
 0x145   : > { %4360 = vmatmul.msk.f32.gmra.mxu1 %vm623_vm0, %v1619_v20  ;;  %v1084_v55 = vadd.f32 %v1032_v59, %v920_v52  ;;  %v5100_v19 = vsel %vm1451_vm1, %v1491_v18, %v1493_v21  ;;  %v5103_v57 = vsel %vm1226_vm2, %v1266_v10, %v1268_v47  ;;  %v6423_v52 = vand.u32 15, %v5097_v58 }
 0x146   : > { %v806_v63 = vpop.f32.mrf.mxu0  ;;  %v5105_v42 = vpop.f32.mrf.mxu3 }
 0x147   : > { %v1120_v22 = vadd.f32 %v4773_v32, %v1084_v55  ;;  %v923_v18 = vadd.f32 %v922_v8, %v806_v63  ;;  %v6425_v55 = vand.u32 15, %v5109_v36  ;;  %vm1170_vm11 = vcmp.ge.s32.totalorder %v6423_v52, 1 }
 0x148   : > { %v1395_v44 = vsel %vm1170_vm11, %v4883_v23, 0.0  ;;  %v5137_v23 = vadd.s32 80, %v4941_v45 }
 0x149   : > { %4328 = vmatmul.msk.f32.gmra.mxu0 %vm623_vm0, %v4871_v9  ;;  %v1152_v59 = vmax.f32 %v1120_v22, 0.0  ;;  %vm1428_vm12 = vcmp.lt.s32.totalorder %v6425_v55, 15 }
 0x14a   : > { %v925_v2 = vpop.f32.mrf.mxu1  ;;  %6483 = vst [vmem:[#allocation9_spill] sm:$0xff] %v5137_v23 }
 0x14b   : > { %v1270_v20 = vrot.slane %v1152_v59, 7  ;;  %v1495_v16 = vrot.slane %v1152_v59, 1  ;;  %4311 = vmatmul.msk.f32.gmra.mxu3 %vm623_vm0, %v1152_v59 }
 0x14c   : > { %v1035_v10 = vpop.f32.mrf.mxu2 }
 0x14d   : > { %4361 = vmatmul.msk.f32.gmra.mxu1 %vm623_vm0, %v4892_v37  ;;  %v1085_v41 = vadd.f32 %v1035_v10, %v923_v18  ;;  %v5121_v9 = vsel %vm1451_vm1, %v1493_v21, %v1495_v16  ;;  %v5124_v22 = vsel %vm1226_vm2, %v1268_v47, %v1270_v20  ;;  %v1621_v21 = vsel %vm1428_vm12, %v4904_v53, 0.0 }
 0x14e   : > { %v809_v8 = vpop.f32.mrf.mxu0  ;;  %v5126_v63 = vpop.f32.mrf.mxu3 }
 0x14f   : > { %v1121_v59 = vadd.f32 %v4773_v32, %v1085_v41  ;;  %v926_v10 = vadd.f32 %v925_v2, %v809_v8 }
 0x151   : > { %4329 = vmatmul.msk.f32.gmra.mxu0 %vm623_vm0, %v1395_v44  ;;  %v1153_v18 = vmax.f32 %v1121_v59, 0.0  ;;  %v5149_v59 = vadd.s32 88, %v4941_v45 }
 0x152   : > { %v928_v37 = vpop.f32.mrf.mxu1 }
 0x153   : > { %4312 = vmatmul.msk.f32.gmra.mxu3 %vm623_vm0, %v1153_v18  ;;  %v1497_v47 = vrot.slane %v1153_v18, 1  ;;  %v1272_v52 = vrot.slane %v1153_v18, 7  ;;  %6484 = vst [vmem:[#allocation10_spill] sm:$0xff] %v5149_v59 }
 0x154   : > { %v1038_v6 = vpop.f32.mrf.mxu2 }
 0x155   : > { %4362 = vmatmul.msk.f32.gmra.mxu1 %vm623_vm0, %v1621_v21  ;;  %v1086_v41 = vadd.f32 %v1038_v6, %v926_v10  ;;  %v5140_v55 = vsel %vm1451_vm1, %v1495_v16, %v1497_v47  ;;  %v5143_v44 = vsel %vm1226_vm2, %v1270_v20, %v1272_v52  ;;  %v6430_v6 = vand.u32 15, %v5137_v23 }
 0x156   : > { %v812_v2 = vpop.f32.mrf.mxu0  ;;  %v5145_v8 = vpop.f32.mrf.mxu3 }
 0x157   : > { %v1122_v53 = vadd.f32 %v4773_v32, %v1086_v41  ;;  %v929_v46 = vadd.f32 %v928_v37, %v812_v2  ;;  %v6432_v41 = vand.u32 15, %v5149_v59  ;;  %vm1172_vm13 = vcmp.ge.s32.totalorder %v6430_v6, 1 }
 0x159   : > { %v1154_v18 = vmax.f32 %v1122_v53, 0.0  ;;  %4330 = vmatmul.msk.f32.gmra.mxu0 %vm623_vm0, %v4895_v38  ;;  %vm1430_vm14 = vcmp.lt.s32.totalorder %v6432_v41, 15 }
 0x15a   : > { %v931_v21 = vpop.f32.mrf.mxu1 }
 0x15b   : > { %v1274_v16 = vrot.slane %v1154_v18, 7  ;;  %v1499_v10 = vrot.slane %v1154_v18, 1  ;;  %4313 = vmatmul.msk.f32.gmra.mxu3 %vm623_vm0, %v1154_v18  ;;  %v1397_v18 = vsel %vm1172_vm13, %v4907_v54, 0.0  ;;  %v5177_v54 = vadd.s32 96, %v4941_v45 }
 0x15c   : > { %v1041_v20 = vpop.f32.mrf.mxu2 }
 0x15d   : > { %4363 = vmatmul.msk.f32.gmra.mxu1 %vm623_vm0, %v4919_v12  ;;  %v1087_v61 = vadd.f32 %v1041_v20, %v929_v46  ;;  %v5161_v53 = vsel %vm1451_vm1, %v1497_v47, %v1499_v10  ;;  %v5164_v38 = vsel %vm1226_vm2, %v1272_v52, %v1274_v16  ;;  %v1623_v52 = vsel %vm1430_vm14, %v4931_v30, 0.0  ;;  %6485 = vst [vmem:[#allocation11_spill] sm:$0xff] %v5177_v54 }
 0x15e   : > { %v815_v5 = vpop.f32.mrf.mxu0  ;;  %v5166_v37 = vpop.f32.mrf.mxu3 }
 0x15f   : > { %v1123_v2 = vadd.f32 %v4773_v32, %v1087_v61  ;;  %v932_v20 = vadd.f32 %v931_v21, %v815_v5 }
 0x161   : > { %v1155_v12 = vmax.f32 %v1123_v2, 0.0  ;;  %4331 = vmatmul.msk.f32.gmra.mxu0 %vm623_vm0, %v1397_v18  ;;  %v5189_v18 = vadd.s32 104, %v4941_v45 }
 0x162   : > { %v934_v46 = vpop.f32.mrf.mxu1 }
 0x163   : > { %4314 = vmatmul.msk.f32.gmra.mxu3 %vm623_vm0, %v1155_v12  ;;  %v1501_v47 = vrot.slane %v1155_v12, 1  ;;  %v1276_v6 = vrot.slane %v1155_v12, 7  ;;  %6486 = vst [vmem:[#allocation12_spill] sm:$0xff] %v5189_v18 }
 0x164   : > { %v1044_v36 = vpop.f32.mrf.mxu2 }
 0x165   : > { %4364 = vmatmul.msk.f32.gmra.mxu1 %vm623_vm0, %v1623_v52  ;;  %v1088_v61 = vadd.f32 %v1044_v36, %v932_v20  ;;  %v5180_v41 = vsel %vm1451_vm1, %v1499_v10, %v1501_v47  ;;  %v5183_v2 = vsel %vm1226_vm2, %v1274_v16, %v1276_v6  ;;  %v6436_v36 = vand.u32 15, %v5177_v54 }
 0x166   : > { %v818_v5 = vpop.f32.mrf.mxu0  ;;  %v5185_v21 = vpop.f32.mrf.mxu3 }
 0x167   : > { %v1124_v30 = vadd.f32 %v4773_v32, %v1088_v61  ;;  %v935_v59 = vadd.f32 %v934_v46, %v818_v5  ;;  %v6438_v61 = vand.u32 15, %v5189_v18  ;;  %vm1174_vm15 = vcmp.ge.s32.totalorder %v6436_v36, 1 }
 0x169   : > { %v1156_v12 = vmax.f32 %v1124_v30, 0.0  ;;  %4332 = vmatmul.msk.f32.gmra.mxu0 %vm623_vm0, %v4922_v13  ;;  %vm1432_vm3 = vcmp.lt.s32.totalorder %v6438_v61, 15 }
 0x16a   : > { %v937_v52 = vpop.f32.mrf.mxu1 }
 0x16b   : > { %v1278_v10 = vrot.slane %v1156_v12, 7  ;;  %v1503_v20 = vrot.slane %v1156_v12, 1  ;;  %4315 = vmatmul.msk.f32.gmra.mxu3 %vm623_vm0, %v1156_v12  ;;  %v1399_v12 = vsel %vm1174_vm15, %v4934_v31, 0.0  ;;  %v5217_v31 = vadd.s32 112, %v4941_v45 }
 0x16c   : > { %v1047_v16 = vpop.f32.mrf.mxu2 }
 0x16d   : > { %4365 = vmatmul.msk.f32.gmra.mxu1 %vm623_vm0, %v4944_v50  ;;  %v1089_v23 = vadd.f32 %v1047_v16, %v935_v59  ;;  %v5201_v30 = vsel %vm1451_vm1, %v1501_v47, %v1503_v20  ;;  %v5204_v13 = vsel %vm1226_vm2, %v1276_v6, %v1278_v10  ;;  %v1625_v6 = vsel %vm1432_vm3, %v4966_v14, 0.0  ;;  %6487 = vst [vmem:[#allocation13_spill] sm:$0xff] %v5217_v31 }
 0x16e   : > { %v821_v49 = vpop.f32.mrf.mxu0  ;;  %v5206_v46 = vpop.f32.mrf.mxu3 }
 0x16f   : > { %v1125_v5 = vadd.f32 %v4773_v32, %v1089_v23  ;;  %v938_v16 = vadd.f32 %v937_v52, %v821_v49 }
 0x171   : > { %v1157_v50 = vmax.f32 %v1125_v5, 0.0  ;;  %4333 = vmatmul.msk.f32.gmra.mxu0 %vm623_vm0, %v1399_v12  ;;  %v5229_v12 = vadd.s32 120, %v4941_v45 }
 0x172   : > { %v940_v59 = vpop.f32.mrf.mxu1 }
 0x173   : > { %4316 = vmatmul.msk.f32.gmra.mxu3 %vm623_vm0, %v1157_v50  ;;  %v1505_v47 = vrot.slane %v1157_v50, 1  ;;  %v1280_v36 = vrot.slane %v1157_v50, 7  ;;  %6488 = vst [vmem:[#allocation14_spill] sm:$0xff] %v5229_v12 }
 0x174   : > { %v1050_v54 = vpop.f32.mrf.mxu2 }
 0x175   : > { %4366 = vmatmul.msk.f32.gmra.mxu1 %vm623_vm0, %v1625_v6  ;;  %v1090_v23 = vadd.f32 %v1050_v54, %v938_v16  ;;  %v5220_v61 = vsel %vm1451_vm1, %v1503_v20, %v1505_v47  ;;  %v5223_v5 = vsel %vm1226_vm2, %v1278_v10, %v1280_v36  ;;  %v6441_v54 = vand.u32 15, %v5217_v31 }
 0x176   : > { %v824_v49 = vpop.f32.mrf.mxu0  ;;  %v5225_v52 = vpop.f32.mrf.mxu3 }
 0x177   : > { %v1126_v14 = vadd.f32 %v4773_v32, %v1090_v23  ;;  %v941_v18 = vadd.f32 %v940_v59, %v824_v49  ;;  %v6444_v32 = vand.u32 15, %v5229_v12  ;;  %vm1176_vm4 = vcmp.ge.s32.totalorder %v6441_v54, 1  ;;  %v4595_v49 = vld [vmem:[%s6416_s2] ss:$0 sm:$0xff] }
 0x179   : > { %v1158_v50 = vmax.f32 %v1126_v14, 0.0  ;;  %4334 = vmatmul.msk.f32.gmra.mxu0 %vm623_vm0, %v4947_v51  ;;  %vm1434_vm5 = vcmp.lt.s32.totalorder %v6444_v32, 15 }
 0x17a   : > { %v943_v6 = vpop.f32.mrf.mxu1 }
 0x17b   : > { %v1282_v20 = vrot.slane %v1158_v50, 7  ;;  %v1507_v16 = vrot.slane %v1158_v50, 1  ;;  %4317 = vmatmul.msk.f32.gmra.mxu3 %vm623_vm0, %v1158_v50  ;;  %v1401_v50 = vsel %vm1176_vm4, %v4969_v15, 0.0  ;;  %v5259_v15 = vadd.s32 128, %v4941_v45 }
 0x17c   : > { %v1053_v10 = vpop.f32.mrf.mxu2 }
 0x17d   : > { %4367 = vmatmul.msk.f32.gmra.mxu1 %vm623_vm0, %v4982_v34  ;;  %v1091_v23 = vadd.f32 %v1053_v10, %v941_v18  ;;  %v5241_v14 = vsel %vm1451_vm1, %v1505_v47, %v1507_v16  ;;  %v5244_v51 = vsel %vm1226_vm2, %v1280_v36, %v1282_v20  ;;  %v1627_v36 = vsel %vm1434_vm5, %v5001_v56, 0.0  ;;  %v4479_v56 = vld [vmem:[%s6415_s1 + $0x50] sm:$0xff] }
 0x17e   : > { %v827_v58 = vpop.f32.mrf.mxu0  ;;  %v5246_v59 = vpop.f32.mrf.mxu3  ;;  %3449 = vmatpush.msra.mxu1 %v4479_v56 }
 0x17f   : > { %v1127_v34 = vadd.f32 %v4595_v49, %v1091_v23  ;;  %v944_v47 = vadd.f32 %v943_v6, %v827_v58  ;;  %v4480_v58 = vld [vmem:[%s6415_s1 + $0x58] sm:$0xff] }
 0x180   : > { %3867 = vmatpush.msra.mxu3 %v4480_v58 }
 0x181   : > { %v1159_v18 = vmax.f32 %v1127_v34, 0.0  ;;  %4335 = vmatmul.msk.f32.gmra.mxu0 %vm623_vm0, %v1401_v50  ;;  %v4478_v34 = vld [vmem:[%s6415_s1 + $0x48] sm:$0xff] }
 0x182   : > { %v946_v10 = vpop.f32.mrf.mxu1  ;;  %3658 = vmatpush.msra.mxu2 %v4478_v34 }
 0x183   : > { %4318 = vmatmul.msk.f32.gmra.mxu3 %vm623_vm0, %v1159_v18  ;;  %v1509_v54 = vrot.slane %v1159_v18, 1  ;;  %v1284_v31 = vrot.slane %v1159_v18, 7 }
 0x184   : > { %v1056_v27 = vpop.f32.mrf.mxu2 }
 0x185   : > { %4368 = vmatmul.msk.f32.gmra.mxu1 %vm623_vm0, %v1627_v36  ;;  %v1092_v23 = vadd.f32 %v1056_v27, %v944_v47  ;;  %v5271_v6 = vsel %vm1451_vm1, %v1507_v16, %v1509_v54  ;;  %v5274_v27 = vsel %vm1226_vm2, %v1282_v20, %v1284_v31  ;;  %v5279_v36 = vadd.s32 136, %v4941_v45 }
 0x186   : > { %v830_v50 = vpop.f32.mrf.mxu0  ;;  %v5276_v18 = vpop.f32.mrf.mxu3  ;;  %v6450_v16 = vand.u32 15, %v5259_v15 }
 0x187   : > { %v1128_v47 = vadd.f32 %v4595_v49, %v1092_v23  ;;  %v947_v3 = vadd.f32 %v946_v10, %v830_v50  ;;  %v6449_v23 = vand.u32 15, %v5279_v36 }
 0x188   : > { %vm1178_vm6 = vcmp.ge.s32.totalorder %v6450_v16, 1 }
 0x189   : > { %v1160_v32 = vmax.f32 %v1128_v47, 0.0  ;;  %4336 = vmatmul.msk.f32.gmra.mxu0 %vm623_vm0, %v4985_v35  ;;  %vm1436_vm7 = vcmp.lt.s32.totalorder %v6449_v23, 15  ;;  %v6489_v23 = vmov 0.0  }
 0x18a   : > { %v2147_v12 = vpop.f32.mrf.mxu1 }
 0x18b   : > { %v1286_v29 = vrot.slane %v1160_v32, 7  ;;  %v1511_v20 = vrot.slane %v1160_v32, 1  ;;  %4319 = vmatmul.msk.f32.gmra.mxu3 %vm623_vm0, %v1160_v32 }
 0x18c   : > { %v1059_v4 = vpop.f32.mrf.mxu2 }
 0x18d   : > { %4369 = vmatmul.msk.f32.gmra.mxu1 %vm623_vm0, %v5020_v48  ;;  %v1093_v34 = vadd.f32 %v1059_v4, %v947_v3  ;;  %v5291_v35 = vsel %vm1451_vm1, %v1509_v54, %v1511_v20  ;;  %v5294_v58 = vsel %vm1226_vm2, %v1284_v31, %v1286_v29  ;;  %v5302_v48 = vld [vmem:[%s6416_s2 + $0x1] ss:$0 sm:$0xff]  ;;  %v1403_v3 = vsel %vm1178_vm6, %v5004_v0, 0.0 }
 0x18e   : > { %v5296_v56 = vpop.f32.mrf.mxu3  ;;  %v1938_v10 = vpop.f32.mrf.mxu0 }
 0x18f   : > { %v1129_v32 = vadd.f32 %v4595_v49, %v1093_v34  ;;  %v1939_v50 = vadd.f32 %v1938_v10, %v5006_v1  ;;  %v1629_v1 = vsel %vm1436_vm7, %v5041_v17, 0.0 }
 0x191   : > { %v5307_v4 = vmax.f32 %v1129_v32, 0.0  ;;  %v2243_v31 = vadd.f32 %v2147_v12, %v1939_v50  ;;  %4337 = vmatmul.msk.f32.gmra.mxu0 %vm623_vm0, %v1403_v3  ;;  %v5321_v12 = vadd.s32 144, %v4941_v45 }
 0x192   : > { %v2150_v54 = vpop.f32.mrf.mxu1 }
 0x193   : > { %v5311_v49 = vadd.f32 %v5302_v48, %v2243_v31  ;;  %4320 = vmatmul.msk.f32.gmra.mxu3 %vm623_vm0, %v5307_v4  ;;  %v6452_v47 = vrot.slane %v5307_v4, 1  ;;  %v1288_v0 = vrot.slane %v5307_v4, 7  ;;  %v5338_v31 = vadd.s32 152, %v4941_v45 }
 0x195   : > { %4370 = vmatmul.msk.f32.gmra.mxu1 %vm623_vm0, %v1629_v1  ;;  %v2312_v34 = vmax.f32 %v5311_v49, 0.0  ;;  %v5326_v10 = vsel %vm1451_vm1, %v1511_v20, %v6452_v47  ;;  %v5329_v32 = vsel %vm1226_vm2, %v1286_v29, %v1288_v0  ;;  %v6451_v29 = vand.u32 15, %v5321_v12 }
 0x196   : > { %v5331_v17 = vpop.f32.mrf.mxu3  ;;  %v1941_v50 = vpop.f32.mrf.mxu0 }
 0x197   : > { %v1942_v3 = vadd.f32 %v1941_v50, %v5025_v26  ;;  %4389 = vmatmul.msk.f32.vlgmr.msrb.gmra.mxu2 %vm623_vm0, %v2312_v34  ;;  %v6453_v26 = vand.u32 15, %v5338_v31  ;;  %vm1180_vm2 = vcmp.ge.s32.totalorder %v6451_v29, 1 }
 0x199   : > { %v2244_v1 = vadd.f32 %v2150_v54, %v1942_v3  ;;  %4338 = vmatmul.msk.f32.gmra.mxu0 %vm623_vm0, %v5023_v11  ;;  %vm1438_vm8 = vcmp.lt.s32.totalorder %v6453_v26, 15 }
 0x19a   : > { %v2153_v20 = vpop.f32.mrf.mxu1 }
 0x19b   : > { %v5344_v0 = vadd.f32 %v5302_v48, %v2244_v1  ;;  %2573 = vmatmul.f32.vlgmr.msrb.gmra.mxu3 %v6489_v23  ;;  %v1405_v1 = vsel %vm1180_vm2, %v5044_v60, 0.0  ;;  %v5371_v60 = vadd.s32 160, %v4941_v45 }
 0x19d   : > { %4371 = vmatmul.msk.f32.gmra.mxu1 %vm623_vm0, %v5060_v28  ;;  %v6456_v50 = vmax.f32 %v5344_v0, 0.0 }
 0x19e   : > { %v5353_v54 = vpop.f32.mrf.mxu3  ;;  %v1944_v11 = vpop.f32.mrf.mxu0 }
 0x19f   : > { %v1945_v3 = vadd.f32 %v1944_v11, %v5046_v7  ;;  %4390 = vmatmul.msk.f32.gmra.mxu2 %vm623_vm0, %v6456_v50  ;;  %v1631_v7 = vsel %vm1438_vm8, %v5081_v43, 0.0  ;;  %vm3173_vm8 = vcmask 1045504  }
 0x1a1   : > { %v2245_v28 = vadd.f32 %v2153_v20, %v1945_v3  ;;  %4339 = vmatmul.msk.f32.gmra.mxu0 %vm623_vm0, %v1405_v1  ;;  %v5380_v1 = vadd.s32 168, %v4941_v45 }
 0x1a2   : > { %v2156_v16 = vpop.f32.mrf.mxu1 }
 0x1a3   : > { %v5364_v29 = vadd.f32 %v5302_v48, %v2245_v28  ;;  %2576 = vmatmul.f32.gmra.mxu3 %v6489_v23 }
 0x1a5   : > { %4372 = vmatmul.msk.f32.gmra.mxu1 %vm623_vm0, %v1631_v7  ;;  %v6454_v11 = vmax.f32 %v5364_v29, 0.0  ;;  %v6455_v7 = vand.u32 15, %v5371_v60 }
 0x1a6   : > { %v5373_v47 = vpop.f32.mrf.mxu3  ;;  %v1947_v20 = vpop.f32.mrf.mxu0 }
 0x1a7   : > { %v1948_v3 = vadd.f32 %v1947_v20, %v5065_v25  ;;  %4391 = vmatmul.msk.f32.gmra.mxu2 %vm623_vm0, %v6454_v11  ;;  %v6457_v25 = vand.u32 15, %v5380_v1  ;;  %vm1182_vm9 = vcmp.ge.s32.totalorder %v6455_v7, 1 }
 0x1a9   : > { %v2246_v43 = vadd.f32 %v2156_v16, %v1948_v3  ;;  %4340 = vmatmul.msk.f32.gmra.mxu0 %vm623_vm0, %v5063_v40  ;;  %vm1440_vm10 = vcmp.lt.s32.totalorder %v6457_v25, 15 }
 0x1aa   : > { %v2159_v28 = vpop.f32.mrf.mxu1  ;;  %v1633_v50 = vsel %vm1440_vm10, %v5121_v9, 0.0 }
 0x1ab   : > { %v5386_v26 = vadd.f32 %v5302_v48, %v2246_v43  ;;  %2579 = vmatmul.f32.gmra.mxu3 %v6489_v23  ;;  %v1407_v43 = vsel %vm1182_vm9, %v5084_v39, 0.0 }
 0x1ad   : > { %4373 = vmatmul.msk.f32.gmra.mxu1 %vm623_vm0, %v5100_v19  ;;  %v2315_v20 = vmax.f32 %v5386_v26, 0.0  ;;  %v5504_v26 = vadd.s32 216, %v4941_v45 }
 0x1ae   : > { %v5395_v16 = vpop.f32.mrf.mxu3  ;;  %v1950_v40 = vpop.f32.mrf.mxu0 }
 0x1af   : > { %v1951_v3 = vadd.f32 %v1950_v40, %v5086_v24  ;;  %4392 = vmatmul.msk.f32.gmra.mxu2 %vm623_vm0, %v2315_v20  ;;  %v5412_v40 = vadd.s32 176, %v4941_v45  ;;  %6492 = vst [vmem:[#allocation15_spill] sm:$0xff] %v5504_v26 }
 0x1b1   : > { %v2247_v19 = vadd.f32 %v2159_v28, %v1951_v3  ;;  %4341 = vmatmul.msk.f32.gmra.mxu0 %vm623_vm0, %v1407_v43  ;;  %v5420_v3 = vadd.s32 184, %v4941_v45 }
 0x1b2   : > { %v2162_v11 = vpop.f32.mrf.mxu1 }
 0x1b3   : > { %v2284_v7 = vadd.f32 %v5302_v48, %v2247_v19  ;;  %2582 = vmatmul.f32.gmra.mxu3 %v6489_v23 }
 0x1b5   : > { %4374 = vmatmul.msk.f32.gmra.mxu1 %vm623_vm0, %v1633_v50  ;;  %v5409_v24 = vmax.f32 %v2284_v7, 0.0  ;;  %v6467_v50 = vand.u32 15, %v5412_v40 }
 0x1b6   : > { %v5414_v39 = vpop.f32.mrf.mxu3  ;;  %v1953_v25 = vpop.f32.mrf.mxu0 }
 0x1b7   : > { %v1954_v28 = vadd.f32 %v1953_v25, %v5105_v42  ;;  %4393 = vmatmul.msk.f32.gmra.mxu2 %vm623_vm0, %v5409_v24  ;;  %v6465_v42 = vand.u32 15, %v5420_v3  ;;  %vm1184_vm11 = vcmp.ge.s32.totalorder %v6467_v50, 1 }
 0x1b8   : > { %v1409_v49 = vsel %vm1184_vm11, %v5124_v22, 0.0  ;;  %v5454_v22 = vadd.s32 192, %v4941_v45 }
 0x1b9   : > { %v2248_v43 = vadd.f32 %v2162_v11, %v1954_v28  ;;  %4342 = vmatmul.msk.f32.gmra.mxu0 %vm623_vm0, %v5103_v57  ;;  %vm1442_vm12 = vcmp.lt.s32.totalorder %v6465_v42, 15 }
 0x1ba   : > { %v2165_v9 = vpop.f32.mrf.mxu1 }
 0x1bb   : > { %v2285_v7 = vadd.f32 %v5302_v48, %v2248_v43  ;;  %4421 = vmatmul.msk.f32.gmra.mxu3 %vm623_vm0, %v2312_v34  ;;  %v6490_v43 = vmax.f32 %v5344_v0, 0.0  ;;  %v5462_v0 = vadd.s32 200, %v4941_v45 }
 0x1bd   : > { %4375 = vmatmul.msk.f32.gmra.mxu1 %vm623_vm0, %v5140_v55  ;;  %v5432_v25 = vmax.f32 %v2285_v7, 0.0 }
 0x1be   : > { %v5436_v57 = vpop.f32.mrf.mxu3  ;;  %v1956_v11 = vpop.f32.mrf.mxu0 }
 0x1bf   : > { %v1957_v19 = vadd.f32 %v1956_v11, %v5126_v63  ;;  %4394 = vmatmul.msk.f32.gmra.mxu2 %vm623_vm0, %v5432_v25  ;;  %v1635_v63 = vsel %vm1442_vm12, %v5161_v53, 0.0 }
 0x1c1   : > { %v2249_v55 = vadd.f32 %v2165_v9, %v1957_v19  ;;  %4343 = vmatmul.msk.f32.gmra.mxu0 %vm623_vm0, %v1409_v49 }
 0x1c2   : > { %v2168_v34 = vpop.f32.mrf.mxu1 }
 0x1c3   : > { %v2286_v28 = vadd.f32 %v5302_v48, %v2249_v55  ;;  %4422 = vmatmul.msk.f32.gmra.mxu3 %vm623_vm0, %v6490_v43  ;;  %v6466_v55 = vand.u32 15, %v5454_v22  ;;  %v6491_v43 = vmax.f32 %v5364_v29, 0.0 }
 0x1c5   : > { %4376 = vmatmul.msk.f32.gmra.mxu1 %vm623_vm0, %v1635_v63  ;;  %v5451_v7 = vmax.f32 %v2286_v28, 0.0  ;;  %vm1186_vm13 = vcmp.ge.s32.totalorder %v6466_v55, 1 }
 0x1c6   : > { %v5456_v11 = vpop.f32.mrf.mxu3  ;;  %v1959_v9 = vpop.f32.mrf.mxu0  ;;  %v1411_v29 = vsel %vm1186_vm13, %v5164_v38, 0.0  ;;  %v5496_v38 = vadd.s32 208, %v4941_v45 }
 0x1c7   : > { %v1960_v19 = vadd.f32 %v1959_v9, %v5145_v8  ;;  %4395 = vmatmul.msk.f32.gmra.mxu2 %vm623_vm0, %v5451_v7  ;;  %v6463_v8 = vand.u32 15, %v5462_v0 }
 0x1c9   : > { %v2250_v49 = vadd.f32 %v2168_v34, %v1960_v19  ;;  %4344 = vmatmul.msk.f32.gmra.mxu0 %vm623_vm0, %v5143_v44  ;;  %vm1444_vm14 = vcmp.lt.s32.totalorder %v6463_v8, 15 }
 0x1ca   : > { %v2171_v53 = vpop.f32.mrf.mxu1 }
 0x1cb   : > { %v2287_v28 = vadd.f32 %v5302_v48, %v2250_v49  ;;  %4423 = vmatmul.msk.f32.gmra.mxu3 %vm623_vm0, %v6491_v43 }
 0x1cd   : > { %4377 = vmatmul.msk.f32.gmra.mxu1 %vm623_vm0, %v5180_v41  ;;  %v5474_v63 = vmax.f32 %v2287_v28, 0.0 }
 0x1ce   : > { %v5478_v44 = vpop.f32.mrf.mxu3  ;;  %v1962_v34 = vpop.f32.mrf.mxu0 }
 0x1cf   : > { %v1963_v9 = vadd.f32 %v1962_v34, %v5166_v37  ;;  %4396 = vmatmul.msk.f32.gmra.mxu2 %vm623_vm0, %v5474_v63  ;;  %v1637_v37 = vsel %vm1444_vm14, %v5201_v30, 0.0 }
 0x1d1   : > { %v2251_v41 = vadd.f32 %v2171_v53, %v1963_v9  ;;  %4345 = vmatmul.msk.f32.gmra.mxu0 %vm623_vm0, %v1411_v29  ;;  %v6464_v9 = vand.u32 15, %v5496_v38 }
 0x1d2   : > { %v2174_v19 = vpop.f32.mrf.mxu1 }
 0x1d3   : > { %v2288_v49 = vadd.f32 %v5302_v48, %v2251_v41  ;;  %4424 = vmatmul.msk.f32.gmra.mxu3 %vm623_vm0, %v2315_v20  ;;  %vm1188_vm15 = vcmp.ge.s32.totalorder %v6464_v9, 1 }
 0x1d5   : > { %4378 = vmatmul.msk.f32.gmra.mxu1 %vm623_vm0, %v1637_v37  ;;  %v5493_v28 = vmax.f32 %v2288_v49, 0.0  ;;  %v1413_v37 = vsel %vm1188_vm15, %v5204_v13, 0.0  ;;  %v5536_v13 = vadd.s32 224, %v4941_v45 }
 0x1d6   : > { %v5498_v43 = vpop.f32.mrf.mxu3  ;;  %v1965_v53 = vpop.f32.mrf.mxu0 }
 0x1d7   : > { %v1966_v34 = vadd.f32 %v1965_v53, %v5185_v21  ;;  %4397 = vmatmul.msk.f32.gmra.mxu2 %vm623_vm0, %v5493_v28  ;;  %v6458_v21 = vand.u32 15, %v5504_v26 }
 0x1d9   : > { %v2252_v20 = vadd.f32 %v2174_v19, %v1966_v34  ;;  %4346 = vmatmul.msk.f32.gmra.mxu0 %vm623_vm0, %v5183_v2  ;;  %vm1446_vm3 = vcmp.lt.s32.totalorder %v6458_v21, 15 }
 0x1da   : > { %v2177_v30 = vpop.f32.mrf.mxu1 }
 0x1db   : > { %v2289_v29 = vadd.f32 %v5302_v48, %v2252_v20  ;;  %4425 = vmatmul.msk.f32.gmra.mxu3 %vm623_vm0, %v5409_v24  ;;  %v1639_v20 = vsel %vm1446_vm3, %v5241_v14, 0.0 }
 0x1dd   : > { %4379 = vmatmul.msk.f32.gmra.mxu1 %vm623_vm0, %v5220_v61  ;;  %v5515_v41 = vmax.f32 %v2289_v29, 0.0 }
 0x1de   : > { %v5519_v19 = vpop.f32.mrf.mxu3  ;;  %v1968_v2 = vpop.f32.mrf.mxu0 }
 0x1df   : > { %v1969_v49 = vadd.f32 %v1968_v2, %v5206_v46  ;;  %4398 = vmatmul.msk.f32.gmra.mxu2 %vm623_vm0, %v5515_v41 }
 0x1e1   : > { %v2253_v61 = vadd.f32 %v2177_v30, %v1969_v49  ;;  %4347 = vmatmul.msk.f32.gmra.mxu0 %vm623_vm0, %v1413_v37  ;;  %v5544_v49 = vadd.s32 232, %v4941_v45 }
 0x1e2   : > { %v2180_v53 = vpop.f32.mrf.mxu1 }
 0x1e3   : > { %v2290_v34 = vadd.f32 %v5302_v48, %v2253_v61  ;;  %4426 = vmatmul.msk.f32.gmra.mxu3 %vm623_vm0, %v5432_v25  ;;  %6493 = vst [vmem:[#allocation16_spill] sm:$0xff] %v5544_v49  ;;  %v6461_v61 = vand.u32 15, %v5536_v13 }
 0x1e5   : > { %4380 = vmatmul.msk.f32.gmra.mxu1 %vm623_vm0, %v1639_v20  ;;  %v5533_v46 = vmax.f32 %v2290_v34, 0.0  ;;  %vm1190_vm4 = vcmp.ge.s32.totalorder %v6461_v61, 1 }
 0x1e6   : > { %v5538_v29 = vpop.f32.mrf.mxu3  ;;  %v1971_v30 = vpop.f32.mrf.mxu0 }
 0x1e7   : > { %v1972_v2 = vadd.f32 %v1971_v30, %v5225_v52  ;;  %4399 = vmatmul.msk.f32.gmra.mxu2 %vm623_vm0, %v5533_v46  ;;  %v6459_v52 = vand.u32 15, %v5544_v49 }
 0x1e9   : > { %v2254_v37 = vadd.f32 %v2180_v53, %v1972_v2  ;;  %4348 = vmatmul.msk.f32.gmra.mxu0 %vm623_vm0, %v5223_v5  ;;  %v1415_v2 = vsel %vm1190_vm4, %v5244_v51, 0.0  ;;  %vm1448_vm5 = vcmp.lt.s32.totalorder %v6459_v52, 15  ;;  %v5576_v51 = vadd.s32 240, %v4941_v45 }
 0x1ea   : > { %v2183_v14 = vpop.f32.mrf.mxu1  ;;  %v1641_v21 = vsel %vm1448_vm5, %v5291_v35, 0.0 }
 0x1eb   : > { %v2291_v34 = vadd.f32 %v5302_v48, %v2254_v37  ;;  %4427 = vmatmul.msk.f32.gmra.mxu3 %vm623_vm0, %v5451_v7  ;;  %6494 = vst [vmem:[#allocation17_spill] sm:$0xff] %v5576_v51 }
 0x1ed   : > { %4381 = vmatmul.msk.f32.gmra.mxu1 %vm623_vm0, %v5271_v6  ;;  %v5555_v20 = vmax.f32 %v2291_v34, 0.0 }
 0x1ee   : > { %v5559_v53 = vpop.f32.mrf.mxu3  ;;  %v1974_v5 = vpop.f32.mrf.mxu0 }
 0x1ef   : > { %v1975_v30 = vadd.f32 %v1974_v5, %v5246_v59  ;;  %4400 = vmatmul.msk.f32.gmra.mxu2 %vm623_vm0, %v5555_v20 }
 0x1f1   : > { %v2255_v6 = vadd.f32 %v2183_v14, %v1975_v30  ;;  %4349 = vmatmul.msk.f32.gmra.mxu0 %vm623_vm0, %v1415_v2  ;;  %v5584_v2 = vadd.s32 248, %v4941_v45 }
 0x1f2   : > { %v2186_v37 = vpop.f32.mrf.mxu1 }
 0x1f3   : > { %v2292_v34 = vadd.f32 %v5302_v48, %v2255_v6  ;;  %4428 = vmatmul.msk.f32.gmra.mxu3 %vm623_vm0, %v5474_v63  ;;  %6495 = vst [vmem:[#allocation18_spill] sm:$0xff] %v5584_v2 }
 0x1f5   : > { %4382 = vmatmul.msk.f32.gmra.mxu1 %vm623_vm0, %v1641_v21  ;;  %v5573_v59 = vmax.f32 %v2292_v34, 0.0  ;;  %v6460_v21 = vand.u32 15, %v5576_v51 }
 0x1f6   : > { %v5578_v5 = vpop.f32.mrf.mxu3  ;;  %v1977_v14 = vpop.f32.mrf.mxu0 }
 0x1f7   : > { %v1978_v30 = vadd.f32 %v1977_v14, %v5276_v18  ;;  %4401 = vmatmul.msk.f32.gmra.mxu2 %vm623_vm0, %v5573_v59  ;;  %v6462_v18 = vand.u32 15, %v5584_v2  ;;  %vm1192_vm6 = vcmp.ge.s32.totalorder %v6460_v21, 1 }
 0x1f9   : > { %v2256_v6 = vadd.f32 %v2186_v37, %v1978_v30  ;;  %4350 = vmatmul.msk.f32.gmra.mxu0 %vm623_vm0, %v5274_v27  ;;  %vm1450_vm7 = vcmp.lt.s32.totalorder %v6462_v18, 15 }
 0x1fa   : > { %v2189_v35 = vpop.f32.mrf.mxu1 }
 0x1fb   : > { %v2293_v34 = vadd.f32 %v5302_v48, %v2256_v6  ;;  %4429 = vmatmul.msk.f32.gmra.mxu3 %vm623_vm0, %v5493_v28  ;;  %v1417_v6 = vsel %vm1192_vm6, %v5294_v58, 0.0 }
 0x1fd   : > { %4383 = vmatmul.msk.f32.gmra.mxu1 %vm623_vm0, %v5326_v10  ;;  %v5595_v14 = vmax.f32 %v2293_v34, 0.0  ;;  %v6496_v10 = vrot.slane %v5307_v4, 1 }
 0x1fe   : > { %v5599_v37 = vpop.f32.mrf.mxu3  ;;  %v1980_v27 = vpop.f32.mrf.mxu0 }
 0x1ff   : > { %v1981_v30 = vadd.f32 %v1980_v27, %v5296_v56  ;;  %4402 = vmatmul.msk.f32.gmra.mxu2 %vm623_vm0, %v5595_v14  ;;  %v1547_v34 = vsel %vm1451_vm1, %v6496_v10, 0.0  ;;  %vm2948_vm1 = vcmask 1041408  }
 0x200   : > { %v1643_v56 = vsel %vm1450_vm7, %v1547_v34, 0.0 }
 0x201   : > { %v2257_v52 = vadd.f32 %v2189_v35, %v1981_v30  ;;  %4351 = vmatmul.msk.f32.gmra.mxu0 %vm623_vm0, %v1417_v6 }
 0x202   : > { %v2192_v21 = vpop.f32.mrf.mxu1 }
 0x203   : > { %v2294_v61 = vadd.f32 %v5302_v48, %v2257_v52  ;;  %4430 = vmatmul.msk.f32.gmra.mxu3 %vm623_vm0, %v5515_v41 }
 0x205   : > { %4384 = vmatmul.msk.f32.gmra.mxu1 %vm623_vm0, %v1643_v56  ;;  %v5615_v58 = vmax.f32 %v2294_v61, 0.0 }
 0x206   : > { %v5617_v27 = vpop.f32.mrf.mxu3  ;;  %v1983_v18 = vpop.f32.mrf.mxu0 }
 0x207   : > { %v1984_v4 = vadd.f32 %v1983_v18, %v5331_v17  ;;  %4403 = vmatmul.msk.f32.gmra.mxu2 %vm623_vm0, %v5615_v58 }
 0x209   : > { %v2258_v35 = vadd.f32 %v2192_v21, %v1984_v4  ;;  %4352 = vmatmul.msk.f32.gmra.mxu0 %vm623_vm0, %v5329_v32 }
 0x20a   : > { %v2195_v52 = vpop.f32.mrf.mxu1 }
 0x20b   : > { %v2295_v30 = vadd.f32 %v5302_v48, %v2258_v35  ;;  %4431 = vmatmul.msk.f32.gmra.mxu3 %vm623_vm0, %v5533_v46 }
 0x20d   : > { %v5627_v61 = vmax.f32 %v2295_v30, 0.0 }
 0x20e   : > { %v5629_v6 = vpop.f32.mrf.mxu3  ;;  %v1986_v10 = vpop.f32.mrf.mxu0 }
 0x20f   : > { %v1987_v17 = vadd.f32 %v1986_v10, %v5353_v54  ;;  %4404 = vmatmul.msk.f32.gmra.mxu2 %vm623_vm0, %v5627_v61 }
 0x211   : > { %v2259_v21 = vadd.f32 %v2195_v52, %v1987_v17  ;;  %4449 = vmatmul.msk.f32.vlgmr.msra.gmra.mxu0 %vm623_vm0, %v5409_v24 }
 0x212   : > { %v2198_v18 = vpop.f32.mrf.mxu1 }
 0x213   : > { %v2296_v32 = vadd.f32 %v5302_v48, %v2259_v21  ;;  %4432 = vmatmul.msk.f32.gmra.mxu3 %vm623_vm0, %v5555_v20 }
 0x215   : > { %v5639_v34 = vmax.f32 %v2296_v32, 0.0 }
 0x216   : > { %v5641_v56 = vpop.f32.mrf.mxu3  ;;  %v1989_v4 = vpop.f32.mrf.mxu0 }
 0x217   : > { %v1990_v54 = vadd.f32 %v1989_v4, %v5373_v47  ;;  %4405 = vmatmul.msk.f32.gmra.mxu2 %vm623_vm0, %v5639_v34 }
 0x219   : > { %v2260_v35 = vadd.f32 %v2198_v18, %v1990_v54  ;;  %4450 = vmatmul.msk.f32.gmra.mxu0 %vm623_vm0, %v5432_v25 }
 0x21a   : > { %v2201_v52 = vpop.f32.mrf.mxu1  ;;  %v2461_v24 = vpop.f32.mrf.mxu2 }
 0x21b   : > { %v2297_v30 = vadd.f32 %v5302_v48, %v2260_v35  ;;  %4433 = vmatmul.msk.f32.gmra.mxu3 %vm623_vm0, %v5573_v59 }
 0x21d   : > { %v5651_v10 = vmax.f32 %v2297_v30, 0.0 }
 0x21e   : > { %v1992_v17 = vpop.f32.mrf.mxu0  ;;  %v2574_v21 = vpop.f32.mrf.mxu3 }
 0x21f   : > { %v1993_v47 = vadd.f32 %v1992_v17, %v5395_v16  ;;  %v5654_v32 = vadd.f32 %v2574_v21, %v2461_v24  ;;  %4406 = vmatmul.msk.f32.gmra.mxu2 %vm623_vm0, %v5651_v10 }
 0x221   : > { %v2261_v18 = vadd.f32 %v2201_v52, %v1993_v47  ;;  %4451 = vmatmul.msk.f32.gmra.mxu0 %vm623_vm0, %v5451_v7 }
 0x222   : > { %v2204_v4 = vpop.f32.mrf.mxu1  ;;  %v2464_v25 = vpop.f32.mrf.mxu2 }
 0x223   : > { %v2298_v54 = vadd.f32 %v5302_v48, %v2261_v18  ;;  %4434 = vmatmul.msk.f32.gmra.mxu3 %vm623_vm0, %v5595_v14 }
 0x225   : > { %v5663_v35 = vmax.f32 %v2298_v54, 0.0 }
 0x226   : > { %v1995_v30 = vpop.f32.mrf.mxu0  ;;  %v2577_v16 = vpop.f32.mrf.mxu3 }
 0x227   : > { %v1996_v24 = vadd.f32 %v1995_v30, %v5414_v39  ;;  %v5666_v17 = vadd.f32 %v2577_v16, %v2464_v25  ;;  %4407 = vmatmul.msk.f32.gmra.mxu2 %vm623_vm0, %v5663_v35 }
 0x229   : > { %v2262_v52 = vadd.f32 %v2204_v4, %v1996_v24  ;;  %4452 = vmatmul.msk.f32.gmra.mxu0 %vm623_vm0, %v5474_v63 }
 0x22a   : > { %v2207_v21 = vpop.f32.mrf.mxu1  ;;  %v2467_v7 = vpop.f32.mrf.mxu2 }
 0x22b   : > { %v2299_v47 = vadd.f32 %v5302_v48, %v2262_v52  ;;  %4435 = vmatmul.msk.f32.gmra.mxu3 %vm623_vm0, %v5615_v58 }
 0x22d   : > { %v5675_v18 = vmax.f32 %v2299_v47, 0.0 }
 0x22e   : > { %v1998_v54 = vpop.f32.mrf.mxu0  ;;  %v2580_v39 = vpop.f32.mrf.mxu3 }
 0x22f   : > { %v1999_v25 = vadd.f32 %v1998_v54, %v5436_v57  ;;  %v5678_v30 = vadd.f32 %v2580_v39, %v2467_v7  ;;  %4408 = vmatmul.msk.f32.gmra.mxu2 %vm623_vm0, %v5675_v18 }
 0x231   : > { %v2263_v4 = vadd.f32 %v2207_v21, %v1999_v25  ;;  %4453 = vmatmul.msk.f32.gmra.mxu0 %vm623_vm0, %v5493_v28 }
 0x232   : > { %v2210_v16 = vpop.f32.mrf.mxu1  ;;  %v2470_v63 = vpop.f32.mrf.mxu2 }
 0x233   : > { %v2300_v24 = vadd.f32 %v5302_v48, %v2263_v4  ;;  %4436 = vmatmul.msk.f32.gmra.mxu3 %vm623_vm0, %v5627_v61 }
 0x235   : > { %v5687_v52 = vmax.f32 %v2300_v24, 0.0 }
 0x236   : > { %v2001_v47 = vpop.f32.mrf.mxu0  ;;  %v2583_v57 = vpop.f32.mrf.mxu3 }
 0x237   : > { %v2002_v7 = vadd.f32 %v2001_v47, %v5456_v11  ;;  %v5690_v54 = vadd.f32 %v2583_v57, %v2470_v63  ;;  %4409 = vmatmul.msk.f32.gmra.mxu2 %vm623_vm0, %v5687_v52 }
 0x239   : > { %v2264_v21 = vadd.f32 %v2210_v16, %v2002_v7  ;;  %4454 = vmatmul.msk.f32.gmra.mxu0 %vm623_vm0, %v5515_v41 }
 0x23a   : > { %v2213_v39 = vpop.f32.mrf.mxu1  ;;  %v2473_v28 = vpop.f32.mrf.mxu2 }
 0x23b   : > { %v2301_v25 = vadd.f32 %v5302_v48, %v2264_v21  ;;  %4437 = vmatmul.msk.f32.gmra.mxu3 %vm623_vm0, %v5639_v34 }
 0x23d   : > { %v5699_v4 = vmax.f32 %v2301_v25, 0.0 }
 0x23e   : > { %v2004_v24 = vpop.f32.mrf.mxu0  ;;  %v2586_v11 = vpop.f32.mrf.mxu3 }
 0x23f   : > { %v2005_v63 = vadd.f32 %v2004_v24, %v5478_v44  ;;  %v5702_v47 = vadd.f32 %v2586_v11, %v2473_v28  ;;  %4410 = vmatmul.msk.f32.gmra.mxu2 %vm623_vm0, %v5699_v4 }
 0x241   : > { %v2265_v16 = vadd.f32 %v2213_v39, %v2005_v63  ;;  %4455 = vmatmul.msk.f32.gmra.mxu0 %vm623_vm0, %v5533_v46 }
 0x242   : > { %v2216_v57 = vpop.f32.mrf.mxu1  ;;  %v2476_v41 = vpop.f32.mrf.mxu2 }
 0x243   : > { %v2302_v7 = vadd.f32 %v5302_v48, %v2265_v16  ;;  %4438 = vmatmul.msk.f32.gmra.mxu3 %vm623_vm0, %v5651_v10 }
 0x245   : > { %v5711_v21 = vmax.f32 %v2302_v7, 0.0 }
 0x246   : > { %v2007_v25 = vpop.f32.mrf.mxu0  ;;  %v2589_v44 = vpop.f32.mrf.mxu3 }
 0x247   : > { %v2008_v28 = vadd.f32 %v2007_v25, %v5498_v43  ;;  %v5714_v24 = vadd.f32 %v2589_v44, %v2476_v41  ;;  %4411 = vmatmul.msk.f32.gmra.mxu2 %vm623_vm0, %v5711_v21 }
 0x249   : > { %v2266_v39 = vadd.f32 %v2216_v57, %v2008_v28  ;;  %4456 = vmatmul.msk.f32.gmra.mxu0 %vm623_vm0, %v5555_v20 }
 0x24a   : > { %v2219_v11 = vpop.f32.mrf.mxu1  ;;  %v2479_v46 = vpop.f32.mrf.mxu2 }
 0x24b   : > { %v2303_v63 = vadd.f32 %v5302_v48, %v2266_v39  ;;  %4439 = vmatmul.msk.f32.gmra.mxu3 %vm623_vm0, %v5663_v35 }
 0x24d   : > { %v5723_v16 = vmax.f32 %v2303_v63, 0.0 }
 0x24e   : > { %v2010_v7 = vpop.f32.mrf.mxu0  ;;  %v2592_v43 = vpop.f32.mrf.mxu3 }
 0x24f   : > { %v2011_v41 = vadd.f32 %v2010_v7, %v5519_v19  ;;  %v5726_v25 = vadd.f32 %v2592_v43, %v2479_v46  ;;  %4412 = vmatmul.msk.f32.gmra.mxu2 %vm623_vm0, %v5723_v16 }
 0x251   : > { %v2267_v57 = vadd.f32 %v2219_v11, %v2011_v41  ;;  %4457 = vmatmul.msk.f32.gmra.mxu0 %vm623_vm0, %v5573_v59 }
 0x252   : > { %v2222_v44 = vpop.f32.mrf.mxu1  ;;  %v2482_v20 = vpop.f32.mrf.mxu2 }
 0x253   : > { %v2304_v28 = vadd.f32 %v5302_v48, %v2267_v57  ;;  %4440 = vmatmul.msk.f32.gmra.mxu3 %vm623_vm0, %v5675_v18 }
 0x255   : > { %v5735_v39 = vmax.f32 %v2304_v28, 0.0 }
 0x256   : > { %v2013_v63 = vpop.f32.mrf.mxu0  ;;  %v2595_v19 = vpop.f32.mrf.mxu3 }
 0x257   : > { %v2014_v46 = vadd.f32 %v2013_v63, %v5538_v29  ;;  %v5738_v7 = vadd.f32 %v2595_v19, %v2482_v20  ;;  %4413 = vmatmul.msk.f32.gmra.mxu2 %vm623_vm0, %v5735_v39 }
 0x259   : > { %v2268_v11 = vadd.f32 %v2222_v44, %v2014_v46  ;;  %4458 = vmatmul.msk.f32.gmra.mxu0 %vm623_vm0, %v5595_v14 }
 0x25a   : > { %v2225_v43 = vpop.f32.mrf.mxu1  ;;  %v5744_v59 = vpop.f32.mrf.mxu2 }
 0x25b   : > { %v2305_v41 = vadd.f32 %v5302_v48, %v2268_v11  ;;  %4441 = vmatmul.msk.f32.gmra.mxu3 %vm623_vm0, %v5687_v52 }
 0x25d   : > { %v5749_v57 = vmax.f32 %v2305_v41, 0.0 }
 0x25e   : > { %v2016_v29 = vpop.f32.mrf.mxu0  ;;  %v5751_v20 = vpop.f32.mrf.mxu3 }
 0x25f   : > { %v2017_v28 = vadd.f32 %v2016_v29, %v5559_v53  ;;  %4414 = vmatmul.msk.f32.gmra.mxu2 %vm623_vm0, %v5749_v57 }
 0x261   : > { %v2269_v44 = vadd.f32 %v2225_v43, %v2017_v28  ;;  %4459 = vmatmul.msk.f32.gmra.mxu0 %vm623_vm0, %v5615_v58 }
 0x262   : > { %v2228_v63 = vpop.f32.mrf.mxu1  ;;  %v5758_v14 = vpop.f32.mrf.mxu2 }
 0x263   : > { %v2306_v19 = vadd.f32 %v5302_v48, %v2269_v44  ;;  %4442 = vmatmul.msk.f32.gmra.mxu3 %vm623_vm0, %v5699_v4 }
 0x265   : > { %v5763_v46 = vmax.f32 %v2306_v19, 0.0 }
 0x266   : > { %v2019_v11 = vpop.f32.mrf.mxu0  ;;  %v5765_v41 = vpop.f32.mrf.mxu3 }
 0x267   : > { %v2020_v53 = vadd.f32 %v2019_v11, %v5578_v5  ;;  %4415 = vmatmul.msk.f32.gmra.mxu2 %vm623_vm0, %v5763_v46 }
 0x269   : > { %v2270_v43 = vadd.f32 %v2228_v63, %v2020_v53  ;;  %4460 = vmatmul.msk.f32.gmra.mxu0 %vm623_vm0, %v5627_v61 }
 0x26a   : > { %v2231_v29 = vpop.f32.mrf.mxu1  ;;  %v5772_v58 = vpop.f32.mrf.mxu2 }
 0x26b   : > { %v2307_v28 = vadd.f32 %v5302_v48, %v2270_v43  ;;  %4443 = vmatmul.msk.f32.gmra.mxu3 %vm623_vm0, %v5711_v21 }
 0x26d   : > { %v5777_v44 = vmax.f32 %v2307_v28, 0.0 }
 0x26e   : > { %v2022_v19 = vpop.f32.mrf.mxu0  ;;  %v5779_v8 = vpop.f32.mrf.mxu3 }
 0x26f   : > { %v2023_v5 = vadd.f32 %v2022_v19, %v5599_v37  ;;  %4416 = vmatmul.msk.f32.gmra.mxu2 %vm623_vm0, %v5777_v44 }
 0x271   : > { %v2271_v63 = vadd.f32 %v2231_v29, %v2023_v5  ;;  %4461 = vmatmul.msk.f32.gmra.mxu0 %vm623_vm0, %v5639_v34 }
 0x272   : > { %v5786_v61 = vpop.f32.mrf.mxu2  ;;  %v2234_v53 = vpop.f32.mrf.mxu1 }
 0x273   : > { %v5789_v11 = vadd.f32 %v5302_v48, %v2271_v63  ;;  %4444 = vmatmul.msk.f32.gmra.mxu3 %vm623_vm0, %v5723_v16 }
 0x275   : > { %v6471_v43 = vmax.f32 %v5789_v11, 0.0 }
 0x276   : > { %v2025_v28 = vpop.f32.mrf.mxu0  ;;  %v5794_v37 = vpop.f32.mrf.mxu3 }
 0x277   : > { %v2026_v19 = vadd.f32 %v2025_v28, %v5617_v27  ;;  %4417 = vmatmul.msk.f32.gmra.mxu2 %vm623_vm0, %v6471_v43 }
 0x279   : > { %v2272_v34 = vadd.f32 %v2234_v53, %v2026_v19  ;;  %4462 = vmatmul.msk.f32.gmra.mxu0 %vm623_vm0, %v5651_v10 }
 0x27a   : > { %v5802_v29 = vpop.f32.mrf.mxu2  ;;  %v2237_v9 = vpop.f32.mrf.mxu1 }
 0x27b   : > { %v5805_v5 = vadd.f32 %v5302_v48, %v2272_v34  ;;  %4445 = vmatmul.msk.f32.gmra.mxu3 %vm623_vm0, %v5735_v39 }
 0x27d   : > { %v6470_v63 = vmax.f32 %v5805_v5, 0.0 }
 0x27e   : > { %v2028_v27 = vpop.f32.mrf.mxu0  ;;  %v5810_v28 = vpop.f32.mrf.mxu3 }
 0x27f   : > { %v2029_v42 = vadd.f32 %v2028_v27, %v5629_v6  ;;  %4418 = vmatmul.msk.f32.gmra.mxu2 %vm623_vm0, %v6470_v63 }
 0x281   : > { %v2273_v10 = vadd.f32 %v2237_v9, %v2029_v42  ;;  %4463 = vmatmul.msk.f32.gmra.mxu0 %vm623_vm0, %v5663_v35 }
 0x282   : > { %v5818_v53 = vpop.f32.mrf.mxu2  ;;  %v2240_v42 = vpop.f32.mrf.mxu1 }
 0x283   : > { %v5821_v19 = vadd.f32 %v5302_v48, %v2273_v10  ;;  %4446 = vmatmul.msk.f32.gmra.mxu3 %vm623_vm0, %v5749_v57 }
 0x285   : > { %v6468_v34 = vmax.f32 %v5821_v19, 0.0 }
 0x286   : > { %v2031_v55 = vpop.f32.mrf.mxu0  ;;  %v5826_v6 = vpop.f32.mrf.mxu3 }
 0x287   : > { %v2032_v27 = vadd.f32 %v2031_v55, %v5641_v56  ;;  %4419 = vmatmul.msk.f32.gmra.mxu2 %vm623_vm0, %v6468_v34  ;;  %v5845_v55 = vld [vmem:[%s6416_s2 + $0x2] ss:$0 sm:$0xff] }
 0x289   : > { %v2274_v9 = vadd.f32 %v2240_v42, %v2032_v27  ;;  %4464 = vmatmul.msk.f32.gmra.mxu0 %vm623_vm0, %v5675_v18 }
 0x28a   : > { %v5834_v35 = vpop.f32.mrf.mxu2 }
 0x28b   : > { %v5837_v10 = vadd.f32 %v5302_v48, %v2274_v9  ;;  %4447 = vmatmul.msk.f32.gmra.mxu3 %vm623_vm0, %v5763_v46 }
 0x28d   : > { %v6469_v50 = vmax.f32 %v5837_v10, 0.0 }
 0x28e   : > { %v5847_v56 = vpop.f32.mrf.mxu3  ;;  %v2687_v27 = vpop.f32.mrf.mxu0 }
 0x28f   : > { %v2783_v18 = vadd.f32 %v2687_v27, %v5654_v32  ;;  %4420 = vmatmul.msk.f32.gmra.mxu2 %vm623_vm0, %v6469_v50  ;;  %v6497_v32 = vand.u32 15, %v4941_v45 }
 0x291   : > { %v2820_v48 = vadd.f32 %v5845_v55, %v2783_v18  ;;  %4465 = vmatmul.msk.f32.gmra.mxu0 %vm623_vm0, %v5687_v52  ;;  %vm2884_vm2 = vcmp.ge.s32.totalorder %v6497_v32, 2 }
 0x292   : > { %v5856_v42 = vpop.f32.mrf.mxu2 }
 0x293   : > { %v2852_v9 = vmax.f32 %v2820_v48, 0.0  ;;  %4448 = vmatmul.msk.f32.gmra.mxu3 %vm623_vm0, %v5777_v44 }
 0x295   : > { %v2949_v34 = vrot.slane %v2852_v9, 6  ;;  %4481 = vmatmul.msk.f32.vlgmr.msra.gmra.mxu1 %vm623_vm0, %v2852_v9  ;;  %v3174_v45 = vrot.slane %v2852_v9, 2 }
 0x296   : > { %v5863_v27 = vpop.f32.mrf.mxu3  ;;  %v2690_v50 = vpop.f32.mrf.mxu0 }
 0x297   : > { %v2784_v18 = vadd.f32 %v2690_v50, %v5666_v17  ;;  %v3044_v52 = vsel %vm2948_vm1, 0.0, %v2949_v34 }
 0x298   : > { %v3109_v63 = vsel %vm2884_vm2, %v3044_v52, 0.0 }
 0x299   : > { %v2821_v48 = vadd.f32 %v5845_v55, %v2784_v18  ;;  %4466 = vmatmul.msk.f32.gmra.mxu0 %vm623_vm0, %v5699_v4  ;;  %4513 = vmatmul.msk.f32.vlgmr.msra.gmra.mxu2 %vm623_vm0, %v3109_v63 }
 0x29a   : > { %v5871_v43 = vpop.f32.mrf.mxu2 }
 0x29b   : > { %v2853_v2 = vmax.f32 %v2821_v48, 0.0 }
 0x29d   : > { %v3175_v32 = vrot.slane %v2853_v2, 2  ;;  %4482 = vmatmul.msk.f32.gmra.mxu1 %vm623_vm0, %v2853_v2  ;;  %v2950_v49 = vrot.slane %v2853_v2, 6 }
 0x29e   : > { %v5874_v50 = vpop.f32.mrf.mxu3  ;;  %v2693_v17 = vpop.f32.mrf.mxu0 }
 0x29f   : > { %v2785_v52 = vadd.f32 %v2693_v17, %v5678_v30  ;;  %v3176_v18 = vsel %vm3173_vm8, %v3174_v45, %v3175_v32  ;;  %v2951_v4 = vsel %vm2948_vm1, %v2949_v34, %v2950_v49  ;;  %v6498_v30 = vand.u32 15, %v4979_v33 }
 0x2a0   : > { %4545 = vmatmul.msk.f32.vlgmr.msra.gmra.mxu3 %vm623_vm0, %v3176_v18  ;;  %v6499_v34 = vand.u32 15, %v4952_v62 }
 0x2a1   : > { %v2822_v63 = vadd.f32 %v5845_v55, %v2785_v52  ;;  %4467 = vmatmul.msk.f32.gmra.mxu0 %vm623_vm0, %v5711_v21  ;;  %4514 = vmatmul.msk.f32.gmra.mxu2 %vm623_vm0, %v2951_v4  ;;  %vm2886_vm9 = vcmp.ge.s32.totalorder %v6498_v30, 2 }
 0x2a2   : > { %v5884_v9 = vpop.f32.mrf.mxu2  ;;  %vm3142_vm10 = vcmp.lt.s32.totalorder %v6499_v34, 14 }
 0x2a3   : > { %v2854_v2 = vmax.f32 %v2822_v63, 0.0 }
 0x2a5   : > { %v2952_v48 = vrot.slane %v2854_v2, 6  ;;  %v3177_v51 = vrot.slane %v2854_v2, 2  ;;  %4483 = vmatmul.msk.f32.gmra.mxu1 %vm623_vm0, %v2854_v2 }
 0x2a6   : > { %v5891_v45 = vpop.f32.mrf.mxu3  ;;  %v2696_v17 = vpop.f32.mrf.mxu0 }
 0x2a7   : > { %v2786_v21 = vadd.f32 %v2696_v17, %v5690_v54  ;;  %v2953_v52 = vsel %vm2948_vm1, %v2950_v49, %v2952_v48  ;;  %v3178_v18 = vsel %vm3173_vm8, %v3175_v32, %v3177_v51 }
 0x2a8   : > { %v3111_v4 = vsel %vm2886_vm9, %v2953_v52, 0.0  ;;  %v3335_v63 = vsel %vm3142_vm10, %v3178_v18, 0.0 }
 0x2a9   : > { %v2823_v26 = vadd.f32 %v5845_v55, %v2786_v21  ;;  %4468 = vmatmul.msk.f32.gmra.mxu0 %vm623_vm0, %v5723_v16  ;;  %4515 = vmatmul.msk.f32.gmra.mxu2 %vm623_vm0, %v3111_v4 }
 0x2aa   : > { %4546 = vmatmul.msk.f32.gmra.mxu3 %vm623_vm0, %v3335_v63  ;;  %v5901_v62 = vpop.f32.mrf.mxu2 }
 0x2ab   : > { %v2855_v33 = vmax.f32 %v2823_v26, 0.0 }
 0x2ad   : > { %4484 = vmatmul.msk.f32.gmra.mxu1 %vm623_vm0, %v2855_v33  ;;  %v2954_v54 = vrot.slane %v2855_v33, 6  ;;  %v3179_v49 = vrot.slane %v2855_v33, 2 }
 0x2ae   : > { %v5904_v2 = vpop.f32.mrf.mxu3  ;;  %v2699_v32 = vpop.f32.mrf.mxu0 }
 0x2af   : > { %v2787_v30 = vadd.f32 %v2699_v32, %v5702_v47  ;;  %v2955_v34 = vsel %vm2948_vm1, %v2952_v48, %v2954_v54  ;;  %v3180_v16 = vsel %vm3173_vm8, %v3177_v51, %v3179_v49  ;;  %v6500_v47 = vld [vmem:[#allocation3_spill] sm:$0xff]  ;;  %v6502_v51 = vld [vmem:[#allocation2_spill] sm:$0xff] }
 0x2b0   : > { %v6501_v48 = vand.u32 15, %v6500_v47  ;;  %v6503_v4 = vand.u32 15, %v6502_v51 }
 0x2b1   : > { %v2824_v17 = vadd.f32 %v5845_v55, %v2787_v30  ;;  %4469 = vmatmul.msk.f32.gmra.mxu0 %vm623_vm0, %v5735_v39  ;;  %4516 = vmatmul.msk.f32.gmra.mxu2 %vm623_vm0, %v2955_v34 }
 0x2b2   : > { %4547 = vmatmul.msk.f32.gmra.mxu3 %vm623_vm0, %v3180_v16  ;;  %v5914_v26 = vpop.f32.mrf.mxu2  ;;  %vm2888_vm11 = vcmp.ge.s32.totalorder %v6501_v48, 2  ;;  %vm3144_vm12 = vcmp.lt.s32.totalorder %v6503_v4, 14 }
 0x2b3   : > { %v2856_v21 = vmax.f32 %v2824_v17, 0.0 }
 0x2b5   : > { %v2956_v52 = vrot.slane %v2856_v21, 6  ;;  %v3181_v18 = vrot.slane %v2856_v21, 2  ;;  %4485 = vmatmul.msk.f32.gmra.mxu1 %vm623_vm0, %v2856_v21 }
 0x2b6   : > { %v5921_v63 = vpop.f32.mrf.mxu3  ;;  %v2702_v39 = vpop.f32.mrf.mxu0 }
 0x2b7   : > { %v2788_v33 = vadd.f32 %v2702_v39, %v5714_v24  ;;  %v2957_v32 = vsel %vm2948_vm1, %v2954_v54, %v2956_v52  ;;  %v3182_v30 = vsel %vm3173_vm8, %v3179_v49, %v3181_v18 }
 0x2b8   : > { %v3113_v34 = vsel %vm2888_vm11, %v2957_v32, 0.0  ;;  %v3337_v16 = vsel %vm3144_vm12, %v3182_v30, 0.0 }
 0x2b9   : > { %v2825_v17 = vadd.f32 %v5845_v55, %v2788_v33  ;;  %4470 = vmatmul.msk.f32.gmra.mxu0 %vm623_vm0, %v5749_v57  ;;  %4517 = vmatmul.msk.f32.gmra.mxu2 %vm623_vm0, %v3113_v34 }
 0x2ba   : > { %4548 = vmatmul.msk.f32.gmra.mxu3 %vm623_vm0, %v3337_v16  ;;  %v5931_v21 = vpop.f32.mrf.mxu2 }
 0x2bb   : > { %v2857_v47 = vmax.f32 %v2825_v17, 0.0 }
 0x2bd   : > { %4486 = vmatmul.msk.f32.gmra.mxu1 %vm623_vm0, %v2857_v47  ;;  %v2958_v24 = vrot.slane %v2857_v47, 6  ;;  %v3183_v54 = vrot.slane %v2857_v47, 2 }
 0x2be   : > { %v5934_v48 = vpop.f32.mrf.mxu3  ;;  %v2705_v49 = vpop.f32.mrf.mxu0 }
 0x2bf   : > { %v2789_v51 = vadd.f32 %v2705_v49, %v5726_v25  ;;  %v2959_v4 = vsel %vm2948_vm1, %v2956_v52, %v2958_v24  ;;  %v3184_v57 = vsel %vm3173_vm8, %v3181_v18, %v3183_v54  ;;  %v6504_v25 = vld [vmem:[#allocation5_spill] sm:$0xff]  ;;  %v6506_v18 = vld [vmem:[#allocation4_spill] sm:$0xff] }
 0x2c0   : > { %v6505_v52 = vand.u32 15, %v6504_v25  ;;  %v6507_v16 = vand.u32 15, %v6506_v18 }
 0x2c1   : > { %v2826_v39 = vadd.f32 %v5845_v55, %v2789_v51  ;;  %4471 = vmatmul.msk.f32.gmra.mxu0 %vm623_vm0, %v5763_v46  ;;  %4518 = vmatmul.msk.f32.gmra.mxu2 %vm623_vm0, %v2959_v4 }
 0x2c2   : > { %4549 = vmatmul.msk.f32.gmra.mxu3 %vm623_vm0, %v3184_v57  ;;  %v5944_v33 = vpop.f32.mrf.mxu2  ;;  %vm2890_vm13 = vcmp.ge.s32.totalorder %v6505_v52, 2  ;;  %vm3146_vm14 = vcmp.lt.s32.totalorder %v6507_v16, 14 }
 0x2c3   : > { %v2858_v32 = vmax.f32 %v2826_v39, 0.0 }
 0x2c5   : > { %v2960_v30 = vrot.slane %v2858_v32, 6  ;;  %v3185_v34 = vrot.slane %v2858_v32, 2  ;;  %4487 = vmatmul.msk.f32.gmra.mxu1 %vm623_vm0, %v2858_v32 }
 0x2c6   : > { %v5951_v17 = vpop.f32.mrf.mxu3  ;;  %v2708_v46 = vpop.f32.mrf.mxu0 }
 0x2c7   : > { %v2790_v47 = vadd.f32 %v2708_v46, %v5738_v7  ;;  %v2961_v49 = vsel %vm2948_vm1, %v2958_v24, %v2960_v30  ;;  %v3186_v51 = vsel %vm3173_vm8, %v3183_v54, %v3185_v34  ;;  %v2599_v7 = vadd.f32 %v5751_v20, %v5744_v59 }
 0x2c8   : > { %v3115_v4 = vsel %vm2890_vm13, %v2961_v49, 0.0  ;;  %v3339_v57 = vsel %vm3146_vm14, %v3186_v51, 0.0  ;;  %v6508_v49 = vmax.f32 %v5789_v11, 0.0  ;;  %v2602_v51 = vadd.f32 %v5765_v41, %v5758_v14  ;;  %v6511_v11 = vld [vmem:[#allocation6_spill] sm:$0xff] }
 0x2c9   : > { %v2827_v39 = vadd.f32 %v5845_v55, %v2790_v47  ;;  %4472 = vmatmul.msk.f32.gmra.mxu0 %vm623_vm0, %v5777_v44  ;;  %4519 = vmatmul.msk.f32.gmra.mxu2 %vm623_vm0, %v3115_v4 }
 0x2ca   : > { %4550 = vmatmul.msk.f32.gmra.mxu3 %vm623_vm0, %v3339_v57  ;;  %v5961_v32 = vpop.f32.mrf.mxu2 }
 0x2cb   : > { %v2859_v25 = vmax.f32 %v2827_v39, 0.0  ;;  %v6512_v39 = vand.u32 15, %v6511_v11 }
 0x2cd   : > { %4488 = vmatmul.msk.f32.gmra.mxu1 %vm623_vm0, %v2859_v25  ;;  %v2962_v24 = vrot.slane %v2859_v25, 6  ;;  %v3187_v54 = vrot.slane %v2859_v25, 2  ;;  %vm3148_vm3 = vcmp.lt.s32.totalorder %v6512_v39, 14 }
 0x2ce   : > { %v5966_v52 = vpop.f32.mrf.mxu3  ;;  %v2711_v18 = vpop.f32.mrf.mxu0 }
 0x2cf   : > { %v2791_v16 = vadd.f32 %v2711_v18, %v2599_v7  ;;  %v2963_v44 = vsel %vm2948_vm1, %v2960_v30, %v2962_v24  ;;  %v3188_v46 = vsel %vm3173_vm8, %v3185_v34, %v3187_v54  ;;  %v6509_v34 = vld [vmem:[#allocation7_spill] sm:$0xff] }
 0x2d0   : > { %v6510_v57 = vand.u32 15, %v6509_v34 }
 0x2d1   : > { %v2828_v47 = vadd.f32 %v5845_v55, %v2791_v16  ;;  %4473 = vmatmul.msk.f32.gmra.mxu0 %vm623_vm0, %v6508_v49  ;;  %4520 = vmatmul.msk.f32.gmra.mxu2 %vm623_vm0, %v2963_v44 }
 0x2d2   : > { %4551 = vmatmul.msk.f32.gmra.mxu3 %vm623_vm0, %v3188_v46  ;;  %v5976_v59 = vpop.f32.mrf.mxu2  ;;  %vm2892_vm15 = vcmp.ge.s32.totalorder %v6510_v57, 2 }
 0x2d3   : > { %v2860_v20 = vmax.f32 %v2828_v47, 0.0  ;;  %v6513_v47 = vmax.f32 %v5805_v5, 0.0 }
 0x2d5   : > { %v2964_v4 = vrot.slane %v2860_v20, 6  ;;  %v3189_v30 = vrot.slane %v2860_v20, 2  ;;  %4489 = vmatmul.msk.f32.gmra.mxu1 %vm623_vm0, %v2860_v20 }
 0x2d6   : > { %v5985_v25 = vpop.f32.mrf.mxu3  ;;  %v2714_v7 = vpop.f32.mrf.mxu0 }
 0x2d7   : > { %v2792_v18 = vadd.f32 %v2714_v7, %v2602_v51  ;;  %v2965_v16 = vsel %vm2948_vm1, %v2962_v24, %v2964_v4  ;;  %v3190_v44 = vsel %vm3173_vm8, %v3187_v54, %v3189_v30  ;;  %v2605_v24 = vadd.f32 %v5779_v8, %v5772_v58 }
 0x2d8   : > { %v3117_v46 = vsel %vm2892_vm15, %v2965_v16, 0.0  ;;  %v3341_v14 = vsel %vm3148_vm3, %v3190_v44, 0.0  ;;  %v2608_v16 = vadd.f32 %v5794_v37, %v5786_v61 }
 0x2d9   : > { %v2829_v41 = vadd.f32 %v5845_v55, %v2792_v18  ;;  %4474 = vmatmul.msk.f32.gmra.mxu0 %vm623_vm0, %v6513_v47  ;;  %4521 = vmatmul.msk.f32.gmra.mxu2 %vm623_vm0, %v3117_v46  ;;  %v6514_v18 = vmax.f32 %v5821_v19, 0.0  ;;  %v6517_v19 = vld [vmem:[#allocation8_spill] sm:$0xff] }
 0x2da   : > { %4552 = vmatmul.msk.f32.gmra.mxu3 %vm623_vm0, %v3341_v14  ;;  %v5995_v49 = vpop.f32.mrf.mxu2  ;;  %v6518_v14 = vand.u32 15, %v6517_v19 }
 0x2db   : > { %v2861_v20 = vmax.f32 %v2829_v41, 0.0 }
 0x2dc   : > { %vm3150_vm5 = vcmp.lt.s32.totalorder %v6518_v14, 14  ;;  %v2614_v14 = vadd.f32 %v5826_v6, %v5818_v53 }
 0x2dd   : > { %v2966_v51 = vrot.slane %v2861_v20, 6  ;;  %v3191_v54 = vrot.slane %v2861_v20, 2  ;;  %4490 = vmatmul.msk.f32.gmra.mxu1 %vm623_vm0, %v2861_v20 }
 0x2de   : > { %v6000_v34 = vpop.f32.mrf.mxu3  ;;  %v2717_v57 = vpop.f32.mrf.mxu0 }
 0x2df   : > { %v2793_v5 = vadd.f32 %v2717_v57, %v2605_v24  ;;  %v2967_v11 = vsel %vm2948_vm1, %v2964_v4, %v2966_v51  ;;  %v3192_v39 = vsel %vm3173_vm8, %v3189_v30, %v3191_v54  ;;  %v6515_v30 = vld [vmem:[#allocation9_spill] sm:$0xff] }
 0x2e0   : > { %v6516_v46 = vand.u32 15, %v6515_v30 }
 0x2e1   : > { %v2830_v7 = vadd.f32 %v5845_v55, %v2793_v5  ;;  %4475 = vmatmul.msk.f32.gmra.mxu0 %vm623_vm0, %v6514_v18  ;;  %4522 = vmatmul.msk.f32.gmra.mxu2 %vm623_vm0, %v2967_v11  ;;  %v6519_v11 = vmax.f32 %v5837_v10, 0.0 }
 0x2e2   : > { %4553 = vmatmul.msk.f32.gmra.mxu3 %vm623_vm0, %v3192_v39  ;;  %v6010_v8 = vpop.f32.mrf.mxu2  ;;  %vm2894_vm4 = vcmp.ge.s32.totalorder %v6516_v46, 2 }
 0x2e3   : > { %v2862_v58 = vmax.f32 %v2830_v7, 0.0 }
 0x2e5   : > { %v2968_v44 = vrot.slane %v2862_v58, 6  ;;  %v3193_v4 = vrot.slane %v2862_v58, 2  ;;  %4491 = vmatmul.msk.f32.gmra.mxu1 %vm623_vm0, %v2862_v58 }
 0x2e6   : > { %v6019_v41 = vpop.f32.mrf.mxu3  ;;  %v2720_v47 = vpop.f32.mrf.mxu0 }
 0x2e7   : > { %v2794_v20 = vadd.f32 %v2720_v47, %v2608_v16  ;;  %v2969_v24 = vsel %vm2948_vm1, %v2966_v51, %v2968_v44  ;;  %v3194_v57 = vsel %vm3173_vm8, %v3191_v54, %v3193_v4  ;;  %v2611_v51 = vadd.f32 %v5810_v28, %v5802_v29 }
 0x2e8   : > { %v3119_v5 = vsel %vm2894_vm4, %v2969_v24, 0.0  ;;  %v3343_v61 = vsel %vm3150_vm5, %v3194_v57, 0.0  ;;  %v6522_v24 = vld [vmem:[#allocation10_spill] sm:$0xff] }
 0x2e9   : > { %v2831_v37 = vadd.f32 %v5845_v55, %v2794_v20  ;;  %4476 = vmatmul.msk.f32.gmra.mxu0 %vm623_vm0, %v6519_v11  ;;  %4523 = vmatmul.msk.f32.gmra.mxu2 %vm623_vm0, %v3119_v5  ;;  %v6523_v57 = vand.u32 15, %v6522_v24  ;;  %v2620_v24 = vadd.f32 %v5863_v27, %v5856_v42 }
 0x2ea   : > { %4554 = vmatmul.msk.f32.gmra.mxu3 %vm623_vm0, %v3343_v61  ;;  %v6029_v39 = vpop.f32.mrf.mxu2 }
 0x2eb   : > { %v2863_v7 = vmax.f32 %v2831_v37, 0.0  ;;  %vm3152_vm7 = vcmp.lt.s32.totalorder %v6523_v57, 14 }
 0x2ed   : > { %v2970_v18 = vrot.slane %v2863_v7, 6  ;;  %v3195_v54 = vrot.slane %v2863_v7, 2  ;;  %4492 = vmatmul.msk.f32.gmra.mxu1 %vm623_vm0, %v2863_v7 }
 0x2ee   : > { %v6034_v58 = vpop.f32.mrf.mxu3  ;;  %v2723_v16 = vpop.f32.mrf.mxu0 }
 0x2ef   : > { %v2795_v10 = vadd.f32 %v2723_v16, %v2611_v51  ;;  %v2971_v30 = vsel %vm2948_vm1, %v2968_v44, %v2970_v18  ;;  %v3196_v46 = vsel %vm3173_vm8, %v3193_v4, %v3195_v54  ;;  %v6520_v44 = vld [vmem:[#allocation11_spill] sm:$0xff] }
 0x2f0   : > { %v6521_v4 = vand.u32 15, %v6520_v44 }
 0x2f1   : > { %v2832_v19 = vadd.f32 %v5845_v55, %v2795_v10  ;;  %2770 = vmatmul.f32.gmra.mxu0 %v6489_v23  ;;  %4524 = vmatmul.msk.f32.gmra.mxu2 %vm623_vm0, %v2971_v30  ;;  %v2617_v30 = vadd.f32 %v5847_v56, %v5834_v35 }
 0x2f2   : > { %4555 = vmatmul.msk.f32.gmra.mxu3 %vm623_vm0, %v3196_v46  ;;  %v6042_v29 = vpop.f32.mrf.mxu2  ;;  %vm2896_vm6 = vcmp.ge.s32.totalorder %v6521_v4, 2 }
 0x2f3   : > { %v2864_v28 = vmax.f32 %v2832_v19, 0.0 }
 0x2f5   : > { %v2972_v47 = vrot.slane %v2864_v28, 6  ;;  %v3197_v20 = vrot.slane %v2864_v28, 2  ;;  %4493 = vmatmul.msk.f32.gmra.mxu1 %vm623_vm0, %v2864_v28 }
 0x2f6   : > { %v6051_v5 = vpop.f32.mrf.mxu3  ;;  %v2726_v61 = vpop.f32.mrf.mxu0 }
 0x2f7   : > { %v2796_v37 = vadd.f32 %v2726_v61, %v2614_v14  ;;  %v2973_v11 = vsel %vm2948_vm1, %v2970_v18, %v2972_v47  ;;  %v3198_v7 = vsel %vm3173_vm8, %v3195_v54, %v3197_v20 }
 0x2f8   : > { %v3121_v51 = vsel %vm2896_vm6, %v2973_v11, 0.0  ;;  %v3345_v53 = vsel %vm3152_vm7, %v3198_v7, 0.0 }
 0x2f9   : > { %v2833_v6 = vadd.f32 %v5845_v55, %v2796_v37  ;;  %2773 = vmatmul.f32.gmra.mxu0 %v6489_v23  ;;  %4525 = vmatmul.msk.f32.gmra.mxu2 %vm623_vm0, %v3121_v51  ;;  %v6526_v37 = vld [vmem:[#allocation12_spill] sm:$0xff] }
 0x2fa   : > { %4556 = vmatmul.msk.f32.gmra.mxu3 %vm623_vm0, %v3345_v53  ;;  %v6059_v16 = vpop.f32.mrf.mxu2  ;;  %v6527_v11 = vand.u32 15, %v6526_v37 }
 0x2fb   : > { %v2865_v10 = vmax.f32 %v2833_v6, 0.0 }
 0x2fc   : > { %vm3154_vm9 = vcmp.lt.s32.totalorder %v6527_v11, 14 }
 0x2fd   : > { %v2974_v46 = vrot.slane %v2865_v10, 6  ;;  %v3199_v18 = vrot.slane %v2865_v10, 2  ;;  %4494 = vmatmul.msk.f32.gmra.mxu1 %vm623_vm0, %v2865_v10 }
 0x2fe   : > { %v6064_v54 = vpop.f32.mrf.mxu3  ;;  %v2729_v19 = vpop.f32.mrf.mxu0 }
 0x2ff   : > { %v2797_v28 = vadd.f32 %v2729_v19, %v2617_v30  ;;  %v2975_v14 = vsel %vm2948_vm1, %v2972_v47, %v2974_v46  ;;  %v3200_v44 = vsel %vm3173_vm8, %v3197_v20, %v3199_v18  ;;  %v6524_v47 = vld [vmem:[#allocation13_spill] sm:$0xff] }
 0x300   : > { %v6525_v20 = vand.u32 15, %v6524_v47 }
 0x301   : > { %v2834_v4 = vadd.f32 %v5845_v55, %v2797_v28  ;;  %2776 = vmatmul.f32.gmra.mxu0 %v6489_v23  ;;  %4526 = vmatmul.msk.f32.gmra.mxu2 %vm623_vm0, %v2975_v14  ;;  %v2623_v14 = vadd.f32 %v5874_v50, %v5871_v43  ;;  %v2626_v50 = vadd.f32 %v5891_v45, %v5884_v9 }
 0x302   : > { %4557 = vmatmul.msk.f32.gmra.mxu3 %vm623_vm0, %v3200_v44  ;;  %v6072_v35 = vpop.f32.mrf.mxu2  ;;  %vm2898_vm2 = vcmp.ge.s32.totalorder %v6525_v20, 2 }
 0x303   : > { %v2866_v56 = vmax.f32 %v2834_v4, 0.0 }
 0x305   : > { %v2976_v57 = vrot.slane %v2866_v56, 6  ;;  %v3201_v61 = vrot.slane %v2866_v56, 2  ;;  %4495 = vmatmul.msk.f32.gmra.mxu1 %vm623_vm0, %v2866_v56 }
 0x306   : > { %v2732_v7 = vpop.f32.mrf.mxu0  ;;  %v6081_v51 = vpop.f32.mrf.mxu3 }
 0x307   : > { %v2798_v53 = vadd.f32 %v2732_v7, %v2620_v24  ;;  %v2977_v6 = vsel %vm2948_vm1, %v2974_v46, %v2976_v57  ;;  %v3202_v10 = vsel %vm3173_vm8, %v3199_v18, %v3201_v61 }
 0x308   : > { %v3123_v30 = vsel %vm2898_vm2, %v2977_v6, 0.0  ;;  %v3347_v42 = vsel %vm3154_vm9, %v3202_v10, 0.0 }
 0x309   : > { %v2835_v27 = vadd.f32 %v5845_v55, %v2798_v53  ;;  %2779 = vmatmul.f32.gmra.mxu0 %v6489_v23  ;;  %4527 = vmatmul.msk.f32.gmra.mxu2 %vm623_vm0, %v3123_v30 }
 0x30a   : > { %4558 = vmatmul.msk.f32.gmra.mxu3 %vm623_vm0, %v3347_v42  ;;  %v6089_v19 = vpop.f32.mrf.mxu2 }
 0x30b   : > { %v2867_v28 = vmax.f32 %v2835_v27, 0.0 }
 0x30d   : > { %v2978_v44 = vrot.slane %v2867_v28, 6  ;;  %v3203_v46 = vrot.slane %v2867_v28, 2  ;;  %4496 = vmatmul.msk.f32.gmra.mxu1 %vm623_vm0, %v2867_v28 }
 0x30e   : > { %v2735_v18 = vpop.f32.mrf.mxu0  ;;  %v6096_v24 = vpop.f32.mrf.mxu3 }
 0x30f   : > { %v2799_v4 = vadd.f32 %v2735_v18, %v2623_v14  ;;  %v2979_v56 = vsel %vm2948_vm1, %v2976_v57, %v2978_v44  ;;  %v3204_v23 = vsel %vm3173_vm8, %v3201_v61, %v3203_v46  ;;  %v6528_v57 = vand.u32 15, %v5259_v15  ;;  %v6529_v61 = vld [vmem:[#allocation14_spill] sm:$0xff] }
 0x310   : > { %v6530_v53 = vand.u32 15, %v6529_v61 }
 0x311   : > { %v2836_v47 = vadd.f32 %v5845_v55, %v2799_v4  ;;  %4528 = vmatmul.msk.f32.gmra.mxu2 %vm623_vm0, %v2979_v56  ;;  %vm2900_vm10 = vcmp.ge.s32.totalorder %v6528_v57, 2  ;;  %v2629_v4 = vadd.f32 %v5904_v2, %v5901_v62  ;;  %v6128_v62 = vld [vmem:[%s6416_s2 + $0x3] ss:$0 sm:$0xff] }
 0x312   : > { %4559 = vmatmul.msk.f32.gmra.mxu3 %vm623_vm0, %v3204_v23  ;;  %v3451_v20 = vpop.f32.mrf.mxu1  ;;  %v6103_v37 = vpop.f32.mrf.mxu2  ;;  %vm3156_vm11 = vcmp.lt.s32.totalorder %v6530_v53, 14 }
 0x313   : > { %v2868_v43 = vmax.f32 %v2836_v47, 0.0 }
 0x315   : > { %v2980_v11 = vrot.slane %v2868_v43, 6  ;;  %v3205_v7 = vrot.slane %v2868_v43, 2  ;;  %4497 = vmatmul.msk.f32.gmra.mxu1 %vm623_vm0, %v2868_v43 }
 0x316   : > { %v2738_v6 = vpop.f32.mrf.mxu0  ;;  %v6115_v15 = vpop.f32.mrf.mxu3 }
 0x317   : > { %v2800_v10 = vadd.f32 %v2738_v6, %v2626_v50  ;;  %v2981_v30 = vsel %vm2948_vm1, %v2978_v44, %v2980_v11  ;;  %v3206_v42 = vsel %vm3173_vm8, %v3203_v46, %v3205_v7 }
 0x318   : > { %v3125_v27 = vsel %vm2900_vm10, %v2981_v30, 0.0  ;;  %v3349_v9 = vsel %vm3156_vm11, %v3206_v42, 0.0  ;;  %v6532_v42 = vand.u32 15, %v5279_v36 }
 0x319   : > { %v2837_v45 = vadd.f32 %v5845_v55, %v2800_v10  ;;  %4529 = vmatmul.msk.f32.gmra.mxu2 %vm623_vm0, %v3125_v27 }
 0x31a   : > { %4560 = vmatmul.msk.f32.gmra.mxu3 %vm623_vm0, %v3349_v9  ;;  %v3454_v28 = vpop.f32.mrf.mxu1  ;;  %vm3158_vm13 = vcmp.lt.s32.totalorder %v6532_v42, 14 }
 0x31b   : > { %v2869_v14 = vmax.f32 %v2837_v45, 0.0 }
 0x31c   : > { %v3660_v18 = vpop.f32.mrf.mxu2 }
 0x31d   : > { %v2982_v56 = vrot.slane %v2869_v14, 6  ;;  %v3207_v44 = vrot.slane %v2869_v14, 2  ;;  %4498 = vmatmul.msk.f32.gmra.mxu1 %vm623_vm0, %v2869_v14  ;;  %v3661_v57 = vadd.f32 %v3660_v18, %v3451_v20  ;;  %v6531_v20 = vand.u32 15, %v5321_v12 }
 0x31e   : > { %v2741_v46 = vpop.f32.mrf.mxu0 }
 0x31f   : > { %v2801_v23 = vadd.f32 %v2741_v46, %v2629_v4  ;;  %v2983_v47 = vsel %vm2948_vm1, %v2980_v11, %v2982_v56  ;;  %v3208_v43 = vsel %vm3173_vm8, %v3205_v7, %v3207_v44  ;;  %v2632_v11 = vadd.f32 %v5921_v63, %v5914_v26  ;;  %v4596_v63 = vld [vmem:[%s4690_s27] sm:$0xff] }
 0x320   : > { %vm2902_vm12 = vcmp.ge.s32.totalorder %v6531_v20, 2 }
 0x321   : > { %v2838_v50 = vadd.f32 %v5845_v55, %v2801_v23  ;;  %4530 = vmatmul.msk.f32.gmra.mxu2 %vm623_vm0, %v2983_v47 }
 0x322   : > { %4561 = vmatmul.msk.f32.gmra.mxu3 %vm623_vm0, %v3208_v43  ;;  %v3457_v61 = vpop.f32.mrf.mxu1  ;;  %v2635_v43 = vadd.f32 %v5934_v48, %v5931_v21  ;;  %v4597_v21 = vld [vmem:[%s4690_s27 + $0x8] sm:$0xff] }
 0x323   : > { %v2870_v2 = vmax.f32 %v2838_v50, 0.0  ;;  %v3869_v53 = vpop.f32.mrf.mxu3 }
 0x324   : > { %v3965_v7 = vadd.f32 %v3869_v53, %v3661_v57  ;;  %v3663_v6 = vpop.f32.mrf.mxu2 }
 0x325   : > { %v2984_v10 = vrot.slane %v2870_v2, 6  ;;  %v3209_v30 = vrot.slane %v2870_v2, 2  ;;  %4499 = vmatmul.msk.f32.gmra.mxu1 %vm623_vm0, %v2870_v2  ;;  %v3664_v23 = vadd.f32 %v3663_v6, %v3454_v28 }
 0x326   : > { %v4002_v27 = vadd.f32 %v6128_v62, %v3965_v7  ;;  %v2744_v9 = vpop.f32.mrf.mxu0 }
 0x327   : > { %v2802_v45 = vadd.f32 %v2744_v9, %v2632_v11  ;;  %v2985_v14 = vsel %vm2948_vm1, %v2982_v56, %v2984_v10  ;;  %v3210_v26 = vsel %vm3173_vm8, %v3207_v44, %v3209_v30 }
 0x328   : > { %v4034_v18 = vadd.f32 %v4596_v63, %v4002_v27  ;;  %v3127_v4 = vsel %vm2902_vm12, %v2985_v14, 0.0  ;;  %v3351_v46 = vsel %vm3158_vm13, %v3210_v26, 0.0 }
 0x329   : > { %v2839_v36 = vadd.f32 %v5845_v55, %v2802_v45  ;;  %4531 = vmatmul.msk.f32.gmra.mxu2 %vm623_vm0, %v3127_v4  ;;  %v2638_v45 = vadd.f32 %v5951_v17, %v5944_v33  ;;  %v6533_v4 = vand.u32 15, %v5371_v60 }
 0x32a   : > { %v4066_v12 = vmax.f32 %v4034_v18, 0.0  ;;  %4562 = vmatmul.msk.f32.gmra.mxu3 %vm623_vm0, %v3351_v46  ;;  %v3460_v56 = vpop.f32.mrf.mxu1  ;;  %v6534_v46 = vand.u32 15, %v5338_v31  ;;  %v4598_v31 = vld [vmem:[%s4690_s27 + $0x10] sm:$0xff] }
 0x32b   : > { %v2871_v44 = vmax.f32 %v2839_v36, 0.0  ;;  %vm2904_vm14 = vcmp.ge.s32.totalorder %v6533_v4, 2 }
 0x32c   : > { %4098 = vst.msk [vmem:[%s6146_s4] sm:$0xff] %vm623_vm0, %v4066_v12  ;;  %v3666_v47 = vpop.f32.mrf.mxu2  ;;  %vm3160_vm15 = vcmp.lt.s32.totalorder %v6534_v46, 14 }
 0x32d   : > { %v2986_v50 = vrot.slane %v2871_v44, 6  ;;  %v3211_v57 = vrot.slane %v2871_v44, 2  ;;  %v3872_v2 = vpop.f32.mrf.mxu3  ;;  %4500 = vmatmul.msk.f32.gmra.mxu1 %vm623_vm0, %v2871_v44  ;;  %v3667_v14 = vadd.f32 %v3666_v47, %v3457_v61 }
 0x32e   : > { %v3966_v53 = vadd.f32 %v3872_v2, %v3664_v23  ;;  %v2747_v11 = vpop.f32.mrf.mxu0 }
 0x32f   : > { %v2803_v7 = vadd.f32 %v2747_v11, %v2635_v43  ;;  %v2987_v20 = vsel %vm2948_vm1, %v2984_v10, %v2986_v50  ;;  %v3212_v42 = vsel %vm3173_vm8, %v3209_v30, %v3211_v57 }
 0x330   : > { %v4003_v27 = vadd.f32 %v6128_v62, %v3966_v53 }
 0x331   : > { %v2840_v28 = vadd.f32 %v5845_v55, %v2803_v7  ;;  %4532 = vmatmul.msk.f32.gmra.mxu2 %vm623_vm0, %v2987_v20 }
 0x332   : > { %v4035_v48 = vadd.f32 %v4597_v21, %v4003_v27  ;;  %4563 = vmatmul.msk.f32.gmra.mxu3 %vm623_vm0, %v3212_v42  ;;  %v3463_v6 = vpop.f32.mrf.mxu1 }
 0x333   : > { %v2872_v9 = vmax.f32 %v2840_v28, 0.0 }
 0x334   : > { %v4067_v10 = vmax.f32 %v4035_v48, 0.0  ;;  %v3669_v26 = vpop.f32.mrf.mxu2 }
 0x335   : > { %v2988_v30 = vrot.slane %v2872_v9, 6  ;;  %v3213_v63 = vrot.slane %v2872_v9, 2  ;;  %v3875_v18 = vpop.f32.mrf.mxu3  ;;  %4501 = vmatmul.msk.f32.gmra.mxu1 %vm623_vm0, %v2872_v9  ;;  %v3670_v11 = vadd.f32 %v3669_v26, %v3460_v56 }
 0x336   : > { %4099 = vst.msk [vmem:[%s6146_s4 + $0x8] sm:$0xff] %vm623_vm0, %v4067_v10  ;;  %v3967_v36 = vadd.f32 %v3875_v18, %v3667_v14  ;;  %v2750_v12 = vpop.f32.mrf.mxu0  ;;  %v2644_v18 = vadd.f32 %v5985_v25, %v5976_v59 }
 0x337   : > { %v2804_v33 = vadd.f32 %v2750_v12, %v2638_v45  ;;  %v2989_v17 = vsel %vm2948_vm1, %v2986_v50, %v2988_v30  ;;  %v3214_v61 = vsel %vm3173_vm8, %v3211_v57, %v3213_v63  ;;  %v2641_v57 = vadd.f32 %v5966_v52, %v5961_v32  ;;  %v4599_v32 = vld [vmem:[%s4690_s27 + $0x18] sm:$0xff] }
 0x338   : > { %v4004_v44 = vadd.f32 %v6128_v62, %v3967_v36  ;;  %v3129_v23 = vsel %vm2904_vm14, %v2989_v17, 0.0  ;;  %v3353_v47 = vsel %vm3160_vm15, %v3214_v61, 0.0  ;;  %v6536_v17 = vand.u32 15, %v5380_v1  ;;  %v4600_v1 = vld [vmem:[%s4690_s27 + $0x20] sm:$0xff] }
 0x339   : > { %v2841_v60 = vadd.f32 %v5845_v55, %v2804_v33  ;;  %4533 = vmatmul.msk.f32.gmra.mxu2 %vm623_vm0, %v3129_v23  ;;  %v6535_v33 = vand.u32 15, %v5412_v40 }
 0x33a   : > { %v4036_v43 = vadd.f32 %v4598_v31, %v4004_v44  ;;  %4564 = vmatmul.msk.f32.gmra.mxu3 %vm623_vm0, %v3353_v47  ;;  %v3466_v2 = vpop.f32.mrf.mxu1  ;;  %vm3162_vm4 = vcmp.lt.s32.totalorder %v6536_v17, 14 }
 0x33b   : > { %v2873_v53 = vmax.f32 %v2841_v60, 0.0  ;;  %vm2906_vm3 = vcmp.ge.s32.totalorder %v6535_v33, 2 }
 0x33c   : > { %v4068_v7 = vmax.f32 %v4036_v43, 0.0  ;;  %v3672_v50 = vpop.f32.mrf.mxu2 }
 0x33d   : > { %v2990_v20 = vrot.slane %v2873_v53, 6  ;;  %v3215_v42 = vrot.slane %v2873_v53, 2  ;;  %v3878_v27 = vpop.f32.mrf.mxu3  ;;  %4502 = vmatmul.msk.f32.gmra.mxu1 %vm623_vm0, %v2873_v53  ;;  %v3673_v4 = vadd.f32 %v3672_v50, %v3463_v6 }
 0x33e   : > { %4100 = vst.msk [vmem:[%s6146_s4 + $0x10] sm:$0xff] %vm623_vm0, %v4068_v7  ;;  %v3968_v28 = vadd.f32 %v3878_v27, %v3670_v11  ;;  %v2753_v21 = vpop.f32.mrf.mxu0 }
 0x33f   : > { %v2805_v48 = vadd.f32 %v2753_v21, %v2641_v57  ;;  %v2991_v9 = vsel %vm2948_vm1, %v2988_v30, %v2990_v20  ;;  %v3216_v56 = vsel %vm3173_vm8, %v3213_v63, %v3215_v42  ;;  %v2647_v57 = vadd.f32 %v6000_v34, %v5995_v49  ;;  %v4601_v49 = vld [vmem:[%s4690_s27 + $0x28] sm:$0xff] }
 0x340   : > { %v4005_v45 = vadd.f32 %v6128_v62, %v3968_v28 }
 0x341   : > { %v2842_v14 = vadd.f32 %v5845_v55, %v2805_v48  ;;  %4534 = vmatmul.msk.f32.gmra.mxu2 %vm623_vm0, %v2991_v9 }
 0x342   : > { %v4037_v52 = vadd.f32 %v4599_v32, %v4005_v45  ;;  %4565 = vmatmul.msk.f32.gmra.mxu3 %vm623_vm0, %v3216_v56  ;;  %v3469_v10 = vpop.f32.mrf.mxu1 }
 0x343   : > { %v2874_v26 = vmax.f32 %v2842_v14, 0.0 }
 0x344   : > { %v4069_v30 = vmax.f32 %v4037_v52, 0.0  ;;  %v3675_v46 = vpop.f32.mrf.mxu2  ;;  %v2650_v52 = vadd.f32 %v6019_v41, %v6010_v8 }
 0x345   : > { %v2992_v63 = vrot.slane %v2874_v26, 6  ;;  %v3217_v36 = vrot.slane %v2874_v26, 2  ;;  %v3881_v12 = vpop.f32.mrf.mxu3  ;;  %4503 = vmatmul.msk.f32.gmra.mxu1 %vm623_vm0, %v2874_v26  ;;  %v3676_v11 = vadd.f32 %v3675_v46, %v3466_v2 }
 0x346   : > { %4101 = vst.msk [vmem:[%s6146_s4 + $0x18] sm:$0xff] %vm623_vm0, %v4069_v30  ;;  %v3969_v61 = vadd.f32 %v3881_v12, %v3673_v4  ;;  %v2756_v44 = vpop.f32.mrf.mxu0  ;;  %v6538_v12 = vand.u32 15, %v5420_v3  ;;  %v4602_v3 = vld [vmem:[%s4690_s27 + $0x30] sm:$0xff] }
 0x347   : > { %v2806_v59 = vadd.f32 %v2756_v44, %v2644_v18  ;;  %v2993_v25 = vsel %vm2948_vm1, %v2990_v20, %v2992_v63  ;;  %v3218_v6 = vsel %vm3173_vm8, %v3215_v42, %v3217_v36 }
 0x348   : > { %v4006_v23 = vadd.f32 %v6128_v62, %v3969_v61  ;;  %v3131_v47 = vsel %vm2906_vm3, %v2993_v25, 0.0  ;;  %v3355_v60 = vsel %vm3162_vm4, %v3218_v6, 0.0  ;;  %vm3164_vm6 = vcmp.lt.s32.totalorder %v6538_v12, 14 }
 0x349   : > { %v2843_v40 = vadd.f32 %v5845_v55, %v2806_v59  ;;  %4535 = vmatmul.msk.f32.gmra.mxu2 %vm623_vm0, %v3131_v47 }
 0x34a   : > { %v4038_v31 = vadd.f32 %v4600_v1, %v4006_v23  ;;  %4566 = vmatmul.msk.f32.gmra.mxu3 %vm623_vm0, %v3355_v60  ;;  %v3472_v43 = vpop.f32.mrf.mxu1  ;;  %v2653_v1 = vadd.f32 %v6034_v58, %v6029_v39  ;;  %v4603_v39 = vld [vmem:[%s4690_s27 + $0x38] sm:$0xff] }
 0x34b   : > { %v2875_v53 = vmax.f32 %v2843_v40, 0.0 }
 0x34c   : > { %v4070_v7 = vmax.f32 %v4038_v31, 0.0  ;;  %v3678_v50 = vpop.f32.mrf.mxu2 }
 0x34d   : > { %v2994_v20 = vrot.slane %v2875_v53, 6  ;;  %v3219_v42 = vrot.slane %v2875_v53, 2  ;;  %v3884_v27 = vpop.f32.mrf.mxu3  ;;  %4504 = vmatmul.msk.f32.gmra.mxu1 %vm623_vm0, %v2875_v53  ;;  %v3679_v26 = vadd.f32 %v3678_v50, %v3469_v10 }
 0x34e   : > { %4102 = vst.msk [vmem:[%s6146_s4 + $0x20] sm:$0xff] %vm623_vm0, %v4070_v7  ;;  %v3970_v28 = vadd.f32 %v3884_v27, %v3676_v11  ;;  %v2759_v21 = vpop.f32.mrf.mxu0 }
 0x34f   : > { %v2807_v48 = vadd.f32 %v2759_v21, %v2647_v57  ;;  %v2995_v9 = vsel %vm2948_vm1, %v2992_v63, %v2994_v20  ;;  %v3220_v2 = vsel %vm3173_vm8, %v3217_v36, %v3219_v42  ;;  %v6537_v36 = vand.u32 15, %v5454_v22 }
 0x350   : > { %v4007_v56 = vadd.f32 %v6128_v62, %v3970_v28 }
 0x351   : > { %v2844_v45 = vadd.f32 %v5845_v55, %v2807_v48  ;;  %4536 = vmatmul.msk.f32.gmra.mxu2 %vm623_vm0, %v2995_v9  ;;  %vm2908_vm5 = vcmp.ge.s32.totalorder %v6537_v36, 2  ;;  %v2656_v48 = vadd.f32 %v6051_v5, %v6042_v29 }
 0x352   : > { %v4039_v34 = vadd.f32 %v4601_v49, %v4007_v56  ;;  %4567 = vmatmul.msk.f32.gmra.mxu3 %vm623_vm0, %v3220_v2  ;;  %v3475_v14 = vpop.f32.mrf.mxu1 }
 0x353   : > { %v2876_v32 = vmax.f32 %v2844_v45, 0.0 }
 0x354   : > { %v4071_v18 = vmax.f32 %v4039_v34, 0.0  ;;  %v3681_v4 = vpop.f32.mrf.mxu2 }
 0x355   : > { %v2996_v30 = vrot.slane %v2876_v32, 6  ;;  %v3221_v46 = vrot.slane %v2876_v32, 2  ;;  %v3887_v63 = vpop.f32.mrf.mxu3  ;;  %4505 = vmatmul.msk.f32.gmra.mxu1 %vm623_vm0, %v2876_v32  ;;  %v3682_v47 = vadd.f32 %v3681_v4, %v3472_v43  ;;  %v6539_v32 = vand.u32 15, %v5496_v38 }
 0x356   : > { %4103 = vst.msk [vmem:[%s6146_s4 + $0x28] sm:$0xff] %vm623_vm0, %v4071_v18  ;;  %v3971_v33 = vadd.f32 %v3887_v63, %v3679_v26  ;;  %v2762_v17 = vpop.f32.mrf.mxu0 }
 0x357   : > { %v2808_v8 = vadd.f32 %v2762_v17, %v2650_v52  ;;  %v2997_v41 = vsel %vm2948_vm1, %v2994_v20, %v2996_v30  ;;  %v3222_v10 = vsel %vm3173_vm8, %v3219_v42, %v3221_v46  ;;  %vm2910_vm7 = vcmp.ge.s32.totalorder %v6539_v32, 2 }
 0x358   : > { %v4008_v61 = vadd.f32 %v6128_v62, %v3971_v33  ;;  %v3133_v44 = vsel %vm2908_vm5, %v2997_v41, 0.0  ;;  %v3357_v59 = vsel %vm3164_vm6, %v3222_v10, 0.0  ;;  %v6540_v52 = vand.u32 15, %v5462_v0  ;;  %v4604_v0 = vld [vmem:[%s4690_s27 + $0x40] sm:$0xff] }
 0x359   : > { %v2845_v22 = vadd.f32 %v5845_v55, %v2808_v8  ;;  %4537 = vmatmul.msk.f32.gmra.mxu2 %vm623_vm0, %v3133_v44  ;;  %v2659_v41 = vadd.f32 %v6064_v54, %v6059_v16  ;;  %v6274_v16 = vld [vmem:[%s6416_s2 + $0x2] ss:$0 sm:$0xff] }
 0x35a   : > { %v4040_v25 = vadd.f32 %v4602_v3, %v4008_v61  ;;  %4568 = vmatmul.msk.f32.gmra.mxu3 %vm623_vm0, %v3357_v59  ;;  %v3478_v6 = vpop.f32.mrf.mxu1  ;;  %vm3166_vm2 = vcmp.lt.s32.totalorder %v6540_v52, 14  ;;  %v2665_v52 = vadd.f32 %v6096_v24, %v6089_v19  ;;  %v4608_v19 = vld [vmem:[%s4690_s27 + $0x58] sm:$0xff] }
 0x35b   : > { %v2877_v23 = vmax.f32 %v2845_v22, 0.0 }
 0x35c   : > { %v4072_v60 = vmax.f32 %v4040_v25, 0.0  ;;  %v3684_v40 = vpop.f32.mrf.mxu2 }
 0x35d   : > { %v2998_v31 = vrot.slane %v2877_v23, 6  ;;  %v3223_v53 = vrot.slane %v2877_v23, 2  ;;  %v3890_v11 = vpop.f32.mrf.mxu3  ;;  %4506 = vmatmul.msk.f32.gmra.mxu1 %vm623_vm0, %v2877_v23  ;;  %v3685_v9 = vadd.f32 %v3684_v40, %v3475_v14  ;;  %v4606_v23 = vld [vmem:[%s4690_s27 + $0x48] sm:$0xff] }
 0x35e   : > { %4104 = vst.msk [vmem:[%s6146_s4 + $0x30] sm:$0xff] %vm623_vm0, %v4072_v60  ;;  %v3972_v7 = vadd.f32 %v3890_v11, %v3682_v47  ;;  %v2765_v50 = vpop.f32.mrf.mxu0 }
 0x35f   : > { %v2809_v57 = vadd.f32 %v2765_v50, %v2653_v1  ;;  %v2999_v20 = vsel %vm2948_vm1, %v2996_v30, %v2998_v31  ;;  %v3224_v43 = vsel %vm3173_vm8, %v3221_v46, %v3223_v53  ;;  %v2662_v1 = vadd.f32 %v6081_v51, %v6072_v35 }
 0x360   : > { %v4009_v42 = vadd.f32 %v6128_v62, %v3972_v7 }
 0x361   : > { %v2846_v27 = vadd.f32 %v5845_v55, %v2809_v57  ;;  %4538 = vmatmul.msk.f32.gmra.mxu2 %vm623_vm0, %v2999_v20  ;;  %v6541_v20 = vand.u32 15, %v5536_v13 }
 0x362   : > { %v4041_v58 = vadd.f32 %v4603_v39, %v4009_v42  ;;  %4569 = vmatmul.msk.f32.gmra.mxu3 %vm623_vm0, %v3224_v43  ;;  %v3481_v28 = vpop.f32.mrf.mxu1  ;;  %v6542_v43 = vld [vmem:[#allocation15_spill] sm:$0xff] }
 0x363   : > { %v2878_v21 = vmax.f32 %v2846_v27, 0.0  ;;  %vm2912_vm9 = vcmp.ge.s32.totalorder %v6541_v20, 2  ;;  %v6543_v42 = vand.u32 15, %v6542_v43 }
 0x364   : > { %v4073_v2 = vmax.f32 %v4041_v58, 0.0  ;;  %v3687_v56 = vpop.f32.mrf.mxu2 }
 0x365   : > { %v3000_v45 = vrot.slane %v2878_v21, 6  ;;  %v3225_v49 = vrot.slane %v2878_v21, 2  ;;  %v3893_v34 = vpop.f32.mrf.mxu3  ;;  %4507 = vmatmul.msk.f32.gmra.mxu1 %vm623_vm0, %v2878_v21  ;;  %v3688_v33 = vadd.f32 %v3687_v56, %v3478_v6  ;;  %vm3168_vm10 = vcmp.lt.s32.totalorder %v6543_v42, 14 }
 0x366   : > { %4105 = vst.msk [vmem:[%s6146_s4 + $0x38] sm:$0xff] %vm623_vm0, %v4073_v2  ;;  %v3973_v26 = vadd.f32 %v3893_v34, %v3685_v9  ;;  %v2768_v18 = vpop.f32.mrf.mxu0  ;;  %v4607_v9 = vld [vmem:[%s4690_s27 + $0x50] sm:$0xff] }
 0x367   : > { %v2810_v29 = vadd.f32 %v2768_v18, %v2656_v48  ;;  %v3001_v5 = vsel %vm2948_vm1, %v2998_v31, %v3000_v45  ;;  %v3226_v14 = vsel %vm3173_vm8, %v3223_v53, %v3225_v49 }
 0x368   : > { %v4010_v4 = vadd.f32 %v6128_v62, %v3973_v26  ;;  %v3135_v30 = vsel %vm2910_vm7, %v3001_v5, 0.0  ;;  %v3359_v46 = vsel %vm3166_vm2, %v3226_v14, 0.0 }
 0x369   : > { %v2847_v38 = vadd.f32 %v5845_v55, %v2810_v29  ;;  %4539 = vmatmul.msk.f32.gmra.mxu2 %vm623_vm0, %v3135_v30 }
 0x36a   : > { %v4042_v63 = vadd.f32 %v4604_v0, %v4010_v4  ;;  %4570 = vmatmul.msk.f32.gmra.mxu3 %vm623_vm0, %v3359_v46  ;;  %v3484_v36 = vpop.f32.mrf.mxu1 }
 0x36b   : > { %v2879_v12 = vmax.f32 %v2847_v38, 0.0 }
 0x36c   : > { %v4074_v17 = vmax.f32 %v4042_v63, 0.0  ;;  %v3690_v8 = vpop.f32.mrf.mxu2 }
 0x36d   : > { %v3002_v10 = vrot.slane %v2879_v12, 6  ;;  %v3227_v61 = vrot.slane %v2879_v12, 2  ;;  %v3896_v44 = vpop.f32.mrf.mxu3  ;;  %4508 = vmatmul.msk.f32.gmra.mxu1 %vm623_vm0, %v2879_v12  ;;  %v3691_v31 = vadd.f32 %v3690_v8, %v3481_v28  ;;  %v2668_v12 = vadd.f32 %v6115_v15, %v6103_v37 }
 0x36e   : > { %4106 = vst.msk [vmem:[%s6146_s4 + $0x40] sm:$0xff] %vm623_vm0, %v4074_v17  ;;  %v3974_v55 = vadd.f32 %v3896_v44, %v3688_v33  ;;  %v2771_v59 = vpop.f32.mrf.mxu0  ;;  %v6544_v44 = vld [vmem:[#allocation17_spill] sm:$0xff] }
 0x36f   : > { %v2811_v22 = vadd.f32 %v2771_v59, %v2659_v41  ;;  %v3003_v3 = vsel %vm2948_vm1, %v3000_v45, %v3002_v10  ;;  %v3228_v25 = vsel %vm3173_vm8, %v3225_v49, %v3227_v61  ;;  %v6546_v59 = vld [vmem:[#allocation16_spill] sm:$0xff] }
 0x370   : > { %v4011_v6 = vadd.f32 %v6128_v62, %v3974_v55  ;;  %v6545_v55 = vand.u32 15, %v6544_v44 }
 0x371   : > { %v2848_v54 = vadd.f32 %v6274_v16, %v2811_v22  ;;  %4540 = vmatmul.msk.f32.gmra.mxu2 %vm623_vm0, %v3003_v3  ;;  %v6547_v22 = vand.u32 15, %v6546_v59 }
 0x372   : > { %v4043_v47 = vadd.f32 %v4606_v23, %v4011_v6  ;;  %4571 = vmatmul.msk.f32.gmra.mxu3 %vm623_vm0, %v3228_v25  ;;  %v3487_v60 = vpop.f32.mrf.mxu1  ;;  %vm2914_vm11 = vcmp.ge.s32.totalorder %v6545_v55, 2 }
 0x373   : > { %v2880_v40 = vmax.f32 %v2848_v54, 0.0  ;;  %vm3170_vm12 = vcmp.lt.s32.totalorder %v6547_v22, 14 }
 0x374   : > { %v4075_v53 = vmax.f32 %v4043_v47, 0.0  ;;  %v3693_v11 = vpop.f32.mrf.mxu2 }
 0x375   : > { %v3004_v7 = vrot.slane %v2880_v40, 6  ;;  %v3229_v50 = vrot.slane %v2880_v40, 2  ;;  %v3899_v57 = vpop.f32.mrf.mxu3  ;;  %4509 = vmatmul.msk.f32.gmra.mxu1 %vm623_vm0, %v2880_v40  ;;  %v3694_v49 = vadd.f32 %v3693_v11, %v3484_v36  ;;  %v4609_v40 = vld [vmem:[%s4690_s27 + $0x60] sm:$0xff] }
 0x376   : > { %4107 = vst.msk [vmem:[%s6146_s4 + $0x48] sm:$0xff] %vm623_vm0, %v4075_v53  ;;  %v3975_v27 = vadd.f32 %v3899_v57, %v3691_v31  ;;  %v2774_v39 = vpop.f32.mrf.mxu0 }
 0x377   : > { %v2812_v35 = vadd.f32 %v2774_v39, %v2662_v1  ;;  %v3005_v51 = vsel %vm2948_vm1, %v3002_v10, %v3004_v7  ;;  %v3230_v58 = vsel %vm3173_vm8, %v3227_v61, %v3229_v50 }
 0x378   : > { %v4012_v28 = vadd.f32 %v6128_v62, %v3975_v27  ;;  %v3137_v21 = vsel %vm2912_vm9, %v3005_v51, 0.0  ;;  %v3361_v48 = vsel %vm3168_vm10, %v3230_v58, 0.0 }
 0x379   : > { %v2849_v13 = vadd.f32 %v6274_v16, %v2812_v35  ;;  %4541 = vmatmul.msk.f32.gmra.mxu2 %vm623_vm0, %v3137_v21  ;;  %v4610_v35 = vld [vmem:[%s4690_s27 + $0x68] sm:$0xff] }
 0x37a   : > { %v4044_v2 = vadd.f32 %v4607_v9, %v4012_v28  ;;  %4572 = vmatmul.msk.f32.gmra.mxu3 %vm623_vm0, %v3361_v48  ;;  %v3490_v56 = vpop.f32.mrf.mxu1 }
 0x37b   : > { %v2881_v45 = vmax.f32 %v2849_v13, 0.0 }
 0x37c   : > { %v4076_v34 = vmax.f32 %v4044_v2, 0.0  ;;  %v3696_v32 = vpop.f32.mrf.mxu2  ;;  %v6548_v2 = vld [vmem:[#allocation18_spill] sm:$0xff] }
 0x37d   : > { %v3006_v26 = vrot.slane %v2881_v45, 6  ;;  %v3231_v18 = vrot.slane %v2881_v45, 2  ;;  %v3902_v29 = vpop.f32.mrf.mxu3  ;;  %4510 = vmatmul.msk.f32.gmra.mxu1 %vm623_vm0, %v2881_v45  ;;  %v3697_v33 = vadd.f32 %v3696_v32, %v3487_v60  ;;  %v4611_v32 = vld [vmem:[%s4690_s27 + $0x70] sm:$0xff] }
 0x37e   : > { %4108 = vst.msk [vmem:[%s6146_s4 + $0x50] sm:$0xff] %vm623_vm0, %v4076_v34  ;;  %v3976_v5 = vadd.f32 %v3902_v29, %v3694_v49  ;;  %v2777_v14 = vpop.f32.mrf.mxu0 }
 0x37f   : > { %v2813_v4 = vadd.f32 %v2777_v14, %v2665_v52  ;;  %v3007_v30 = vsel %vm2948_vm1, %v3004_v7, %v3006_v26  ;;  %v3232_v46 = vsel %vm3173_vm8, %v3229_v50, %v3231_v18 }
 0x380   : > { %v4013_v38 = vadd.f32 %v6128_v62, %v3976_v5 }
 0x381   : > { %v2850_v0 = vadd.f32 %v6274_v16, %v2813_v4  ;;  %4542 = vmatmul.msk.f32.gmra.mxu2 %vm623_vm0, %v3007_v30 }
 0x382   : > { %v4045_v24 = vadd.f32 %v4608_v19, %v4013_v38  ;;  %4573 = vmatmul.msk.f32.gmra.mxu3 %vm623_vm0, %v3232_v46  ;;  %v3493_v63 = vpop.f32.mrf.mxu1  ;;  %v4612_v46 = vld [vmem:[%s4690_s27 + $0x78] sm:$0xff] }
 0x383   : > { %v2882_v36 = vmax.f32 %v2850_v0, 0.0 }
 0x384   : > { %v4077_v17 = vmax.f32 %v4045_v24, 0.0  ;;  %v3699_v8 = vpop.f32.mrf.mxu2 }
 0x385   : > { %v3008_v41 = vrot.slane %v2882_v36, 6  ;;  %v3233_v10 = vrot.slane %v2882_v36, 2  ;;  %v3905_v61 = vpop.f32.mrf.mxu3  ;;  %4511 = vmatmul.msk.f32.gmra.mxu1 %vm623_vm0, %v2882_v36  ;;  %v3700_v11 = vadd.f32 %v3699_v8, %v3490_v56  ;;  %v6549_v56 = vand.u32 15, %v6548_v2 }
 0x386   : > { %4109 = vst.msk [vmem:[%s6146_s4 + $0x58] sm:$0xff] %vm623_vm0, %v4077_v17  ;;  %v3977_v3 = vadd.f32 %v3905_v61, %v3697_v33  ;;  %v2780_v25 = vpop.f32.mrf.mxu0  ;;  %v4613_v17 = vld [vmem:[%s4690_s27 + $0x80] sm:$0xff] }
 0x387   : > { %v2814_v37 = vadd.f32 %v2780_v25, %v2668_v12  ;;  %v3009_v15 = vsel %vm2948_vm1, %v3006_v26, %v3008_v41  ;;  %v3234_v6 = vsel %vm3173_vm8, %v3231_v18, %v3233_v10 }
 0x388   : > { %v4014_v54 = vadd.f32 %v6128_v62, %v3977_v3  ;;  %v3139_v23 = vsel %vm2914_vm11, %v3009_v15, 0.0  ;;  %v3363_v47 = vsel %vm3170_vm12, %v3234_v6, 0.0  ;;  %v4614_v3 = vld [vmem:[%s4690_s27 + $0x88] sm:$0xff] }
 0x389   : > { %v2851_v60 = vadd.f32 %v6274_v16, %v2814_v37  ;;  %4543 = vmatmul.msk.f32.gmra.mxu2 %vm623_vm0, %v3139_v23 }
 0x38a   : > { %v4046_v1 = vadd.f32 %v4609_v40, %v4014_v54  ;;  %4574 = vmatmul.msk.f32.gmra.mxu3 %vm623_vm0, %v3363_v47  ;;  %v3496_v31 = vpop.f32.mrf.mxu1  ;;  %v4615_v40 = vld [vmem:[%s4690_s27 + $0x90] sm:$0xff] }
 0x38b   : > { %v2883_v53 = vmax.f32 %v2851_v60, 0.0 }
 0x38c   : > { %v4078_v7 = vmax.f32 %v4046_v1, 0.0  ;;  %v3702_v50 = vpop.f32.mrf.mxu2 }
 0x38d   : > { %v3010_v57 = vrot.slane %v2883_v53, 6  ;;  %v3235_v20 = vrot.slane %v2883_v53, 2  ;;  %v3908_v43 = vpop.f32.mrf.mxu3  ;;  %4512 = vmatmul.msk.f32.gmra.mxu1 %vm623_vm0, %v2883_v53  ;;  %v3703_v28 = vadd.f32 %v3702_v50, %v3493_v63 }
 0x38e   : > { %4110 = vst.msk [vmem:[%s6146_s4 + $0x60] sm:$0xff] %vm623_vm0, %v4078_v7  ;;  %v3978_v16 = vadd.f32 %v3908_v43, %v3700_v11  ;;  %v4616_v43 = vld [vmem:[%s4690_s27 + $0x98] sm:$0xff] }
 0x38f   : > { %v3011_v42 = vsel %vm2948_vm1, %v3008_v41, %v3010_v57  ;;  %v3236_v27 = vsel %vm3173_vm8, %v3233_v10, %v3235_v20  ;;  %vm3172_vm1 = vcmp.lt.s32.totalorder %v6549_v56, 14  ;;  %v3269_v45 = vsel %vm3173_vm8, %v3235_v20, 0.0 }
 0x390   : > { %v4015_v39 = vadd.f32 %v6128_v62, %v3978_v16  ;;  %v3365_v34 = vsel %vm3172_vm1, %v3269_v45, 0.0 }
 0x391   : > { %4544 = vmatmul.msk.f32.gmra.mxu2 %vm623_vm0, %v3011_v42 }
 0x392   : > { %v4047_v51 = vadd.f32 %v4610_v35, %v4015_v39  ;;  %4575 = vmatmul.msk.f32.gmra.mxu3 %vm623_vm0, %v3236_v27  ;;  %v3499_v58 = vpop.f32.mrf.mxu1 }
 0x394   : > { %v4079_v21 = vmax.f32 %v4047_v51, 0.0  ;;  %v3705_v48 = vpop.f32.mrf.mxu2 }
 0x395   : > { %v3911_v13 = vpop.f32.mrf.mxu3  ;;  %v3706_v18 = vadd.f32 %v3705_v48, %v3496_v31 }
 0x396   : > { %4111 = vst.msk [vmem:[%s6146_s4 + $0x68] sm:$0xff] %vm623_vm0, %v4079_v21  ;;  %v3979_v9 = vadd.f32 %v3911_v13, %v3703_v28  ;;  %v4617_v21 = vld [vmem:[%s4690_s27 + $0xa0] sm:$0xff] }
 0x398   : > { %v4016_v49 = vadd.f32 %v6128_v62, %v3979_v9 }
 0x39a   : > { %v4048_v52 = vadd.f32 %v4611_v32, %v4016_v49  ;;  %4576 = vmatmul.msk.f32.gmra.mxu3 %vm623_vm0, %v3365_v34  ;;  %v3502_v26 = vpop.f32.mrf.mxu1  ;;  %v4618_v32 = vld [vmem:[%s4690_s27 + $0xa8] sm:$0xff] }
 0x39c   : > { %v4080_v29 = vmax.f32 %v4048_v52, 0.0  ;;  %v3708_v5 = vpop.f32.mrf.mxu2 }
 0x39d   : > { %v3914_v14 = vpop.f32.mrf.mxu3  ;;  %v3709_v19 = vadd.f32 %v3708_v5, %v3499_v58 }
 0x39e   : > { %4112 = vst.msk [vmem:[%s6146_s4 + $0x70] sm:$0xff] %vm623_vm0, %v4080_v29  ;;  %v3980_v4 = vadd.f32 %v3914_v14, %v3706_v18 }
 0x3a0   : > { %v4017_v30 = vadd.f32 %v6128_v62, %v3980_v4 }
 0x3a2   : > { %v4049_v38 = vadd.f32 %v4612_v46, %v4017_v30  ;;  %v3505_v0 = vpop.f32.mrf.mxu1  ;;  %v4619_v46 = vld [vmem:[%s4690_s27 + $0xb0] sm:$0xff] }
 0x3a4   : > { %v4081_v24 = vmax.f32 %v4049_v38, 0.0  ;;  %v3711_v63 = vpop.f32.mrf.mxu2 }
 0x3a5   : > { %v3917_v36 = vpop.f32.mrf.mxu3  ;;  %v3712_v10 = vadd.f32 %v3711_v63, %v3502_v26 }
 0x3a6   : > { %4113 = vst.msk [vmem:[%s6146_s4 + $0x78] sm:$0xff] %vm623_vm0, %v4081_v24  ;;  %v3981_v12 = vadd.f32 %v3917_v36, %v3709_v19 }
 0x3a8   : > { %v4018_v33 = vadd.f32 %v6128_v62, %v3981_v12 }
 0x3aa   : > { %v4050_v8 = vadd.f32 %v4613_v17, %v4018_v33  ;;  %v3508_v41 = vpop.f32.mrf.mxu1  ;;  %v4620_v17 = vld [vmem:[%s4690_s27 + $0xb8] sm:$0xff] }
 0x3ac   : > { %v4082_v61 = vmax.f32 %v4050_v8, 0.0  ;;  %v3714_v44 = vpop.f32.mrf.mxu2 }
 0x3ad   : > { %v3920_v55 = vpop.f32.mrf.mxu3  ;;  %v3715_v15 = vadd.f32 %v3714_v44, %v3505_v0 }
 0x3ae   : > { %4114 = vst.msk [vmem:[%s6146_s4 + $0x80] sm:$0xff] %vm623_vm0, %v4082_v61  ;;  %v3982_v59 = vadd.f32 %v3920_v55, %v3712_v10 }
 0x3b0   : > { %v4019_v22 = vadd.f32 %v6128_v62, %v3982_v59 }
 0x3b2   : > { %v4051_v25 = vadd.f32 %v4614_v3, %v4019_v22  ;;  %v3511_v37 = vpop.f32.mrf.mxu1  ;;  %v4621_v3 = vld [vmem:[%s4690_s27 + $0xc0] sm:$0xff] }
 0x3b4   : > { %v4083_v6 = vmax.f32 %v4051_v25, 0.0  ;;  %v3717_v54 = vpop.f32.mrf.mxu2 }
 0x3b5   : > { %v3923_v23 = vpop.f32.mrf.mxu3  ;;  %v3718_v53 = vadd.f32 %v3717_v54, %v3508_v41 }
 0x3b6   : > { %4115 = vst.msk [vmem:[%s6146_s4 + $0x88] sm:$0xff] %vm623_vm0, %v4083_v6  ;;  %v3983_v47 = vadd.f32 %v3923_v23, %v3715_v15 }
 0x3b8   : > { %v4020_v60 = vadd.f32 %v6128_v62, %v3983_v47 }
 0x3ba   : > { %v4052_v1 = vadd.f32 %v4615_v40, %v4020_v60  ;;  %v3514_v31 = vpop.f32.mrf.mxu1  ;;  %v4622_v60 = vld [vmem:[%s4690_s27 + $0xc8] sm:$0xff] }
 0x3bc   : > { %v4084_v11 = vmax.f32 %v4052_v1, 0.0  ;;  %v3720_v7 = vpop.f32.mrf.mxu2 }
 0x3bd   : > { %v3926_v50 = vpop.f32.mrf.mxu3  ;;  %v3721_v27 = vadd.f32 %v3720_v7, %v3511_v37 }
 0x3be   : > { %4116 = vst.msk [vmem:[%s6146_s4 + $0x90] sm:$0xff] %vm623_vm0, %v4084_v11  ;;  %v3984_v57 = vadd.f32 %v3926_v50, %v3718_v53 }
 0x3c0   : > { %v4021_v20 = vadd.f32 %v6128_v62, %v3984_v57 }
 0x3c2   : > { %v4053_v16 = vadd.f32 %v4616_v43, %v4021_v20  ;;  %v3517_v42 = vpop.f32.mrf.mxu1  ;;  %v4623_v20 = vld [vmem:[%s4690_s27 + $0xd0] sm:$0xff] }
 0x3c4   : > { %v4085_v39 = vmax.f32 %v4053_v16, 0.0  ;;  %v3723_v35 = vpop.f32.mrf.mxu2 }
 0x3c5   : > { %v3929_v51 = vpop.f32.mrf.mxu3  ;;  %v3724_v9 = vadd.f32 %v3723_v35, %v3514_v31 }
 0x3c6   : > { %4117 = vst.msk [vmem:[%s6146_s4 + $0x98] sm:$0xff] %vm623_vm0, %v4085_v39  ;;  %v3985_v58 = vadd.f32 %v3929_v51, %v3721_v27 }
 0x3c8   : > { %v4022_v28 = vadd.f32 %v6128_v62, %v3985_v58 }
 0x3ca   : > { %v4054_v48 = vadd.f32 %v4617_v21, %v4022_v28  ;;  %v3520_v13 = vpop.f32.mrf.mxu1  ;;  %v4624_v28 = vld [vmem:[%s4690_s27 + $0xd8] sm:$0xff] }
 0x3cc   : > { %v4086_v2 = vmax.f32 %v4054_v48, 0.0  ;;  %v3726_v56 = vpop.f32.mrf.mxu2 }
 0x3cd   : > { %v3932_v45 = vpop.f32.mrf.mxu3  ;;  %v3727_v26 = vadd.f32 %v3726_v56, %v3517_v42 }
 0x3ce   : > { %4118 = vst.msk [vmem:[%s6146_s4 + $0xa0] sm:$0xff] %vm623_vm0, %v4086_v2  ;;  %v3986_v49 = vadd.f32 %v3932_v45, %v3724_v9 }
 0x3d0   : > { %v4023_v34 = vadd.f32 %v6128_v62, %v3986_v49 }
 0x3d2   : > { %v4055_v52 = vadd.f32 %v4618_v32, %v4023_v34  ;;  %v3523_v5 = vpop.f32.mrf.mxu1  ;;  %v4625_v34 = vld [vmem:[%s4690_s27 + $0xe0] sm:$0xff] }
 0x3d4   : > { %v4087_v18 = vmax.f32 %v4055_v52, 0.0  ;;  %v3729_v29 = vpop.f32.mrf.mxu2 }
 0x3d5   : > { %v3935_v14 = vpop.f32.mrf.mxu3  ;;  %v3730_v0 = vadd.f32 %v3729_v29, %v3520_v13 }
 0x3d6   : > { %4119 = vst.msk [vmem:[%s6146_s4 + $0xa8] sm:$0xff] %vm623_vm0, %v4087_v18  ;;  %v3987_v4 = vadd.f32 %v3935_v14, %v3727_v26 }
 0x3d8   : > { %v4024_v30 = vadd.f32 %v6128_v62, %v3987_v4 }
 0x3da   : > { %v4056_v38 = vadd.f32 %v4619_v46, %v4024_v30  ;;  %v3526_v12 = vpop.f32.mrf.mxu1  ;;  %v4626_v30 = vld [vmem:[%s4690_s27 + $0xe8] sm:$0xff] }
 0x3dc   : > { %v4088_v19 = vmax.f32 %v4056_v38, 0.0  ;;  %v3732_v24 = vpop.f32.mrf.mxu2 }
 0x3dd   : > { %v3938_v63 = vpop.f32.mrf.mxu3  ;;  %v3733_v41 = vadd.f32 %v3732_v24, %v3523_v5 }
 0x3de   : > { %4120 = vst.msk [vmem:[%s6146_s4 + $0xb0] sm:$0xff] %vm623_vm0, %v4088_v19  ;;  %v3988_v36 = vadd.f32 %v3938_v63, %v3730_v0 }
 0x3e0   : > { %v4025_v33 = vadd.f32 %v6128_v62, %v3988_v36 }
 0x3e2   : > { %v4057_v8 = vadd.f32 %v4620_v17, %v4025_v33  ;;  %v3529_v22 = vpop.f32.mrf.mxu1 }
 0x3e4   : > { %v4089_v10 = vmax.f32 %v4057_v8, 0.0  ;;  %v3735_v61 = vpop.f32.mrf.mxu2 }
 0x3e5   : > { %v3941_v44 = vpop.f32.mrf.mxu3  ;;  %v3736_v37 = vadd.f32 %v3735_v61, %v3526_v12  ;;  %v4627_v12 = vld [vmem:[%s4690_s27 + $0xf0] sm:$0xff] }
 0x3e6   : > { %4121 = vst.msk [vmem:[%s6146_s4 + $0xb8] sm:$0xff] %vm623_vm0, %v4089_v10  ;;  %v3989_v55 = vadd.f32 %v3941_v44, %v3733_v41 }
 0x3e8   : > { %v4026_v59 = vadd.f32 %v6128_v62, %v3989_v55  ;;  %v4628_v55 = vld [vmem:[%s4690_s27 + $0xf8] sm:$0xff] }
 0x3ea   : > { %v4058_v25 = vadd.f32 %v4621_v3, %v4026_v59  ;;  %v3532_v1 = vpop.f32.mrf.mxu1 }
 0x3ec   : > { %v4090_v15 = vmax.f32 %v4058_v25, 0.0  ;;  %v3738_v6 = vpop.f32.mrf.mxu2 }
 0x3ed   : > { %v3944_v54 = vpop.f32.mrf.mxu3  ;;  %v3739_v31 = vadd.f32 %v3738_v6, %v3529_v22 }
 0x3ee   : > { %4122 = vst.msk [vmem:[%s6146_s4 + $0xc0] sm:$0xff] %vm623_vm0, %v4090_v15  ;;  %v3990_v23 = vadd.f32 %v3944_v54, %v3736_v37 }
 0x3f0   : > { %v4027_v47 = vadd.f32 %v6128_v62, %v3990_v23 }
 0x3f2   : > { %v4059_v40 = vadd.f32 %v4622_v60, %v4027_v47  ;;  %v3535_v39 = vpop.f32.mrf.mxu1 }
 0x3f4   : > { %v4091_v53 = vmax.f32 %v4059_v40, 0.0  ;;  %v3741_v11 = vpop.f32.mrf.mxu2 }
 0x3f5   : > { %v3947_v7 = vpop.f32.mrf.mxu3  ;;  %v3742_v16 = vadd.f32 %v3741_v11, %v3532_v1 }
 0x3f6   : > { %4123 = vst.msk [vmem:[%s6146_s4 + $0xc8] sm:$0xff] %vm623_vm0, %v4091_v53  ;;  %v3991_v50 = vadd.f32 %v3947_v7, %v3739_v31 }
 0x3f8   : > { %v4028_v57 = vadd.f32 %v6128_v62, %v3991_v50 }
 0x3fa   : > { %v4060_v43 = vadd.f32 %v4623_v20, %v4028_v57  ;;  %v3538_v45 = vpop.f32.mrf.mxu1 }
 0x3fc   : > { %v4092_v42 = vmax.f32 %v4060_v43, 0.0  ;;  %v3744_v27 = vpop.f32.mrf.mxu2 }
 0x3fd   : > { %v3950_v35 = vpop.f32.mrf.mxu3  ;;  %v3745_v48 = vadd.f32 %v3744_v27, %v3535_v39 }
 0x3fe   : > { %4124 = vst.msk [vmem:[%s6146_s4 + $0xd0] sm:$0xff] %vm623_vm0, %v4092_v42  ;;  %v3992_v51 = vadd.f32 %v3950_v35, %v3742_v16 }
 0x400   : > { %v4029_v58 = vadd.f32 %v6128_v62, %v3992_v51 }
 0x402   : > { %v4061_v21 = vadd.f32 %v4624_v28, %v4029_v58  ;;  %v3541_v4 = vpop.f32.mrf.mxu1 }
 0x404   : > { %v4093_v13 = vmax.f32 %v4061_v21, 0.0  ;;  %v3747_v9 = vpop.f32.mrf.mxu2 }
 0x405   : > { %v3953_v2 = vpop.f32.mrf.mxu3  ;;  %v3748_v52 = vadd.f32 %v3747_v9, %v3538_v45 }
 0x406   : > { %4125 = vst.msk [vmem:[%s6146_s4 + $0xd8] sm:$0xff] %vm623_vm0, %v4093_v13  ;;  %v3993_v56 = vadd.f32 %v3953_v2, %v3745_v48 }
 0x408   : > { %v4030_v49 = vadd.f32 %v6128_v62, %v3993_v56 }
 0x40a   : > { %v4062_v32 = vadd.f32 %v4625_v34, %v4030_v49  ;;  %v3544_v17 = vpop.f32.mrf.mxu1 }
 0x40c   : > { %v4094_v26 = vmax.f32 %v4062_v32, 0.0  ;;  %v3750_v5 = vpop.f32.mrf.mxu2 }
 0x40d   : > { %v3956_v18 = vpop.f32.mrf.mxu3  ;;  %v3751_v38 = vadd.f32 %v3750_v5, %v3541_v4 }
 0x40e   : > { %4126 = vst.msk [vmem:[%s6146_s4 + $0xe0] sm:$0xff] %vm623_vm0, %v4094_v26  ;;  %v3994_v29 = vadd.f32 %v3956_v18, %v3748_v52 }
 0x410   : > { %v4031_v14 = vadd.f32 %v6128_v62, %v3994_v29 }
 0x412   : > { %v4063_v46 = vadd.f32 %v4626_v30, %v4031_v14 }
 0x414   : > { %v4095_v0 = vmax.f32 %v4063_v46, 0.0  ;;  %v3753_v36 = vpop.f32.mrf.mxu2 }
 0x415   : > { %v3959_v19 = vpop.f32.mrf.mxu3  ;;  %v3754_v8 = vadd.f32 %v3753_v36, %v3544_v17 }
 0x416   : > { %4127 = vst.msk [vmem:[%s6146_s4 + $0xe8] sm:$0xff] %vm623_vm0, %v4095_v0  ;;  %v3995_v24 = vadd.f32 %v3959_v19, %v3751_v38 }
 0x418   : > { %v4032_v63 = vadd.f32 %v6128_v62, %v3995_v24 }
 0x41a   : > { %v4064_v33 = vadd.f32 %v4627_v12, %v4032_v63 }
 0x41c   : > { %v4096_v41 = vmax.f32 %v4064_v33, 0.0 }
 0x41d   : > { %v3962_v10 = vpop.f32.mrf.mxu3 }
 0x41e   : > { %4128 = vst.msk [vmem:[%s6146_s4 + $0xf0] sm:$0xff] %vm623_vm0, %v4096_v41  ;;  %v3996_v61 = vadd.f32 %v3962_v10, %v3754_v8 }
 0x420   : > { %v4033_v44 = vadd.f32 %v6128_v62, %v3996_v61 }
 0x422   : > { %v4065_v59 = vadd.f32 %v4628_v55, %v4033_v44 }
 0x424   : > { %v4097_v22 = vmax.f32 %v4065_v59, 0.0 }
 0x426   : > { %4129 = vst.msk [vmem:[%s6146_s4 + $0xf8] sm:$0xff] %vm623_vm0, %v4097_v22 }
 0x427 PF: > { %s13_s12 = sadd.s32 1, %s4635_s12  }
 0x428   : > { %p10_p4 = scmp.ge.s32.totalorder %s13_s12, 4  }
 0x42a   :  { %12 = sbr.rel (!%p10_p4) target bundleno = 1 (0x1), region = 68 }

</bundles_post_ra>
